<compile_context>
chip_gen: v6e
topology: v6e:2x2x1
jax: 0.10.0
libtpu: 0.0.40
codegen_flags: <defaults>
</compile_context>

<pallas_src>
import functools
import inspect

import jax
import jax.numpy as jnp
from jax import lax
from jax.experimental import pallas as pl
from jax.experimental.pallas import tpu as pltpu

_FORI_HAS_UNROLL = "unroll" in inspect.signature(lax.fori_loop).parameters
_B_MIN = 8                          # f32 sublane tile
_XW_BUDGET = 24 * 1024 * 1024       # cap on hoisted-projection scratch (v7x headroom)


def _round_up(n, m):
    return ((n + m - 1) // m) * m


def _default_vmem_limit():
    """~75% of this generation's VMEM (v7x ~48 MiB, v5e/v6e ~96 MiB)."""
    cap = 128 * 1024 * 1024
    try:
        cap = int(pltpu.get_tpu_info().vmem_capacity_bytes)
    except Exception:
        pass
    return int(min(cap - cap // 4, 100 * 1024 * 1024))


_VMEM_LIMIT = _default_vmem_limit()


def _pick_batch_tiling(batch, seq_len, h_pad):
    """Pad batch to a sublane multiple and pick the per-grid-step batch tile.

    Bigger tiles feed more MXU rows per (serial) time step; but keep >= 2 grid steps
    when the batch allows it (v7x has 2 TensorCores) and keep the hoisted xw scratch
    (T * tile * 4*Hp * 4 bytes) under _XW_BUDGET.
    """
    bp = _round_up(max(batch, _B_MIN), _B_MIN)
    bytes_per_row = max(seq_len * 4 * h_pad * 4, 1)
    max_by_vmem = max(_B_MIN, (_XW_BUDGET // bytes_per_row) // _B_MIN * _B_MIN)
    tile_cap = min(128, max_by_vmem, bp)
    best = _B_MIN
    for cand in range(_B_MIN, tile_cap + 1, _B_MIN):
        if bp % cand == 0 and bp // cand >= 2:
            best = cand            # largest tile that still leaves >= 2 grid steps
    return bp, best


def _sigmoid_via_tanh(x):
    # One EUP push (tanh) instead of exp + reciprocal.
    return 0.5 * jnp.tanh(0.5 * x) + 0.5


# ----------------------------------------------------------------------------
# Fused multi-layer LSTM + FC kernel
# ----------------------------------------------------------------------------
def _make_fused_lstm_kernel(num_layers, seq_len, b_tile, h_pad, unroll):
    T, B, Hp = seq_len, b_tile, h_pad
    TB = T * B

    def kernel(*refs):
        # refs: x, (w_ih, w_hh, b) per layer, w_fc, b_fc, out, scratch...
        x_ref = refs[0]
        layer_refs = [refs[1 + 3 * l: 1 + 3 * (l + 1)] for l in range(num_layers)]
        w_fc_ref = refs[1 + 3 * num_layers]
        b_fc_ref = refs[2 + 3 * num_layers]
        out_ref = refs[3 + 3 * num_layers]
        scratch = list(refs[4 + 3 * num_layers:])
        hseq_ref = scratch.pop(0) if num_layers > 1 else None
        (xw_ref,) = scratch

        def project(xin_2d, w_ih_ref, b_ref):
            # Hoisted input projection: ONE (T*B, Din) @ (Din, 4*Hp) MXU matmul with
            # the bias folded in (no per-step broadcast inside the time loop).
            xw_ref[...] = (
                jnp.dot(xin_2d.astype(w_ih_ref.dtype), w_ih_ref[...],
                        preferred_element_type=jnp.float32)
                + b_ref[...])

        def recurrence(w_hh_ref, write_hseq):
            # h/c live in the fori_loop carry (vregs): no per-step VMEM round trip,
            # no store->load latency between steps.
            def step(t, carry):
                h, c = carry
                row = pl.multiple_of(t * B, B)            # 8-aligned sublane offset
                xw_t = xw_ref[pl.ds(row, B), :]           # (B, 4*Hp) f32
                # Single per-step matmul: (B, Hp) @ (Hp, 4*Hp), bf16 MXU, f32 acc.
                gates = xw_t + jnp.dot(h.astype(w_hh_ref.dtype), w_hh_ref[...],
                                       preferred_element_type=jnp.float32)
                # Lane-aligned gate slices (Hp % 128 == 0); PyTorch order [i, f, g, o].
                i_g = _sigmoid_via_tanh(gates[:, 0 * Hp:1 * Hp])
                f_g = _sigmoid_via_tanh(gates[:, 1 * Hp:2 * Hp])
                g_g = jnp.tanh(gates[:, 2 * Hp:3 * Hp])
                o_g = _sigmoid_via_tanh(gates[:, 3 * Hp:4 * Hp])
                c_new = f_g * c + i_g * g_g
                h_new = o_g * jnp.tanh(c_new)
                if write_hseq:                            # only if a next layer reads it
                    hseq_ref[pl.ds(row, B), :] = h_new.astype(hseq_ref.dtype)
                return (h_new, c_new)

            init = (jnp.zeros((B, Hp), jnp.float32),
                    jnp.zeros((B, Hp), jnp.float32))
            if _FORI_HAS_UNROLL:
                h, _ = lax.fori_loop(0, T, step, init, unroll=unroll)
            else:
                h, _ = lax.fori_loop(0, T, step, init)
            return h

        h_last = None
        for l in range(num_layers):
            w_ih_ref, w_hh_ref, b_ref = layer_refs[l]
            if l == 0:
                # (T, B, Dp) -> (T*B, Dp): tile-aligned leading-dim collapse.
                xin = x_ref[...].reshape(TB, x_ref.shape[2])
            else:
                xin = hseq_ref[...]                       # bf16: cast-free MXU operand
            project(xin, w_ih_ref, b_ref)
            h_last = recurrence(w_hh_ref, write_hseq=(l < num_layers - 1))

        # FC fused on the final hidden state, straight from registers (no HBM trip).
        out_ref[...] = (
            jnp.dot(h_last.astype(w_fc_ref.dtype), w_fc_ref[...],
                    preferred_element_type=jnp.float32)
            + b_fc_ref[...])

    return kernel


# ----------------------------------------------------------------------------
# Wrapper
# ----------------------------------------------------------------------------
@functools.partial(jax.jit, static_argnames=("num_classes",))
def lip_reading_lstm_forward(x, params, *, num_classes):
    """x: (B, T, input_size) batch_first like PyTorch. Returns (B, num_classes)."""
    B, T, D = x.shape
    layers = params["lstm"]
    num_layers = len(layers)
    Hp = layers[0]["w_hh"].shape[0]
    Dp = layers[0]["w_ih"].shape[0]
    Cp = params["w_fc"].shape[1]

    Bp, b_tile = _pick_batch_tiling(B, T, Hp)

    # Time-major + pad in one small fused XLA copy of the raw input; projections,
    # recurrence and FC all run inside the single fused Pallas kernel below.
    x_p = jnp.zeros((T, Bp, Dp), jnp.float32)
    x_p = x_p.at[:, :B, :D].set(jnp.transpose(x.astype(jnp.float32), (1, 0, 2)))

    unroll = max(1, min(T, 8))     # fixed unroll; fori_loop handles any remainder
    kernel = _make_fused_lstm_kernel(num_layers, T, b_tile, Hp, unroll)

    args = [x_p]
    in_specs = [pl.BlockSpec((T, b_tile, Dp), lambda b: (0, b, 0))]
    for layer in layers:
        for name in ("w_ih", "w_hh", "b"):
            arr = layer[name]
            args.append(arr)
            in_specs.append(pl.BlockSpec(arr.shape, lambda b: (0, 0)))
    for name in ("w_fc", "b_fc"):
        arr = params[name]
        args.append(arr)
        in_specs.append(pl.BlockSpec(arr.shape, lambda b: (0, 0)))

    scratch_shapes = []
    if num_layers > 1:
        # Inter-layer hidden sequence in bf16 (half the VMEM + store bandwidth).
        scratch_shapes.append(pltpu.VMEM((T * b_tile, Hp), jnp.bfloat16))
    scratch_shapes.append(pltpu.VMEM((T * b_tile, 4 * Hp), jnp.float32))  # x@W_ih + b

    out = pl.pallas_call(
        kernel,
        out_shape=jax.ShapeDtypeStruct((Bp, Cp), jnp.float32),
        grid=(Bp // b_tile,),
        in_specs=in_specs,
        out_specs=pl.BlockSpec((b_tile, Cp), lambda b: (b, 0)),
        scratch_shapes=scratch_shapes,
        compiler_params=pltpu.CompilerParams(
            dimension_semantics=("parallel",),           # batch tiles -> megacore / 2 TCs
            vmem_limit_bytes=_VMEM_LIMIT),
    )(*args)
    return out[:B, :num_classes]


# ----------------------------------------------------------------------------
# Parameters: PyTorch-style init + kernel-layout preparation
# ----------------------------------------------------------------------------
def init_raw_params(key, input_size, hidden_size, num_classes, num_layers):
    """PyTorch-layout weights, U(-1/sqrt(H), 1/sqrt(H)) init."""
    k = 1.0 / float(hidden_size) ** 0.5
    lstm = []
    for layer in range(num_layers):
        d_in = input_size if layer == 0 else hidden_size
        key, k1, k2, k3, k4 = jax.random.split(key, 5)
        lstm.append((
            jax.random.uniform(k1, (4 * hidden_size, d_in), jnp.float32, -k, k),         # w_ih
            jax.random.uniform(k2, (4 * hidden_size, hidden_size), jnp.float32, -k, k),  # w_hh
            jax.random.uniform(k3, (4 * hidden_size,), jnp.float32, -k, k),              # b_ih
            jax.random.uniform(k4, (4 * hidden_size,), jnp.float32, -k, k),              # b_hh
        ))
    key, kf1, kf2 = jax.random.split(key, 3)
    fc_w = jax.random.uniform(kf1, (num_classes, hidden_size), jnp.float32, -k, k)
    fc_b = jax.random.uniform(kf2, (num_classes,), jnp.float32, -k, k)
    return {"lstm": lstm, "fc_w": fc_w, "fc_b": fc_b}


def prepare_params(raw):
    """Pad/transpose PyTorch-layout weights into the kernel layout.

    Each gate occupies a 128-lane-aligned column block of width Hp (free vreg-view
    gate slices; padded lanes stay exactly 0 through the recurrence because the
    corresponding weight rows/columns and bias lanes are 0: gates=0 -> i,f,o=0.5,
    g=0 -> c,h stay 0). Matmul weights stored in bfloat16 (MXU bf16, f32 acc);
    biases stay f32. Layer-0 feature dim is padded only to 16 (sublane), not 128.
    """
    lstm_raw = raw["lstm"]
    H = lstm_raw[0][1].shape[1]
    Hp = _round_up(H, 128)
    layers = []
    for idx, (w_ih, w_hh, b_ih, b_hh) in enumerate(lstm_raw):
        d_in = w_ih.shape[1]
        Dp = _round_up(d_in, 16) if idx == 0 else Hp      # hidden layers read hseq (Hp)
        w_ih_p = jnp.zeros((Dp, 4 * Hp), jnp.float32)
        w_hh_p = jnp.zeros((Hp, 4 * Hp), jnp.float32)
        b_p = jnp.zeros((1, 4 * Hp), jnp.float32)
        bias = b_ih + b_hh
        for g in range(4):
            w_ih_p = w_ih_p.at[:d_in, g * Hp:g * Hp + H].set(w_ih[g * H:(g + 1) * H, :].T)
            w_hh_p = w_hh_p.at[:H, g * Hp:g * Hp + H].set(w_hh[g * H:(g + 1) * H, :].T)
            b_p = b_p.at[0, g * Hp:g * Hp + H].set(bias[g * H:(g + 1) * H])
        layers.append({"w_ih": w_ih_p.astype(jnp.bfloat16),
                       "w_hh": w_hh_p.astype(jnp.bfloat16),
                       "b": b_p})
    C = raw["fc_w"].shape[0]
    Cp = _round_up(C, 128)
    w_fc_p = jnp.zeros((Hp, Cp), jnp.float32).at[:H, :C].set(raw["fc_w"].T)
    b_fc_p = jnp.zeros((1, Cp), jnp.float32).at[0, :C].set(raw["fc_b"])
    return {"lstm": layers, "w_fc": w_fc_p.astype(jnp.bfloat16), "b_fc": b_fc_p}


# ----------------------------------------------------------------------------
# Pure-JAX reference (PyTorch LSTM semantics, same bf16/f32 matmul numerics)
# ----------------------------------------------------------------------------
def _mxu_dot(a, b):
    return jnp.dot(a.astype(jnp.bfloat16), b.astype(jnp.bfloat16),
                   preferred_element_type=jnp.float32)


def reference_forward(x, raw):
    B, T, _ = x.shape
    seq = jnp.transpose(x, (1, 0, 2))                     # (T, B, D)
    for (w_ih, w_hh, b_ih, b_hh) in raw["lstm"]:
        H = w_hh.shape[1]
        w_ih_t, w_hh_t = w_ih.T, w_hh.T
        bias = (b_ih + b_hh)[None, :]

        def step(carry, x_t, w_ih_t=w_ih_t, w_hh_t=w_hh_t, bias=bias, H=H):
            h, c = carry
            gates = _mxu_dot(x_t, w_ih_t) + _mxu_dot(h, w_hh_t) + bias
            i_g = jax.nn.sigmoid(gates[:, 0 * H:1 * H])
            f_g = jax.nn.sigmoid(gates[:, 1 * H:2 * H])
            g_g = jnp.tanh(gates[:, 2 * H:3 * H])
            o_g = jax.nn.sigmoid(gates[:, 3 * H:4 * H])
            c = f_g * c + i_g * g_g
            h = o_g * jnp.tanh(c)
            return (h, c), h

        init = (jnp.zeros((B, H), jnp.float32), jnp.zeros((B, H), jnp.float32))
        _, seq = lax.scan(step, init, seq)
    return _mxu_dot(seq[-1], raw["fc_w"].T) + raw["fc_b"][None, :]


# ----------------------------------------------------------------------------
if __name__ == "__main__":
    B, T = 2, 8
    input_size, hidden_size, num_classes, num_layers = 16, 32, 10, 2

    key = jax.random.PRNGKey(0)
    kx, kp = jax.random.split(key)
    x = jax.random.normal(kx, (B, T, input_size), jnp.float32)

    raw = init_raw_params(kp, input_size, hidden_size, num_classes, num_layers)
    params = prepare_params(raw)

    out = lip_reading_lstm_forward(x, params, num_classes=num_classes)
    out = jax.block_until_ready(out)

    ref = reference_forward(x, raw)
    assert out.shape == (B, num_classes)
    assert jnp.allclose(out, ref, atol=2e-3, rtol=2e-3), "mismatch vs pure-JAX reference"

    print("KERNEL_OK")
</pallas_src>

<mosaic_0001>
module attributes {stable_mosaic.version = 11 : i64} {
  func.func @kernel(%arg0: i32, %arg1: memref<8x8x16xf32, #tpu.memory_space<vmem>>, %arg2: memref<16x512xbf16, #tpu.memory_space<vmem>>, %arg3: memref<128x512xbf16, #tpu.memory_space<vmem>>, %arg4: memref<1x512xf32, #tpu.memory_space<vmem>>, %arg5: memref<128x512xbf16, #tpu.memory_space<vmem>>, %arg6: memref<128x512xbf16, #tpu.memory_space<vmem>>, %arg7: memref<1x512xf32, #tpu.memory_space<vmem>>, %arg8: memref<128x128xbf16, #tpu.memory_space<vmem>>, %arg9: memref<1x128xf32, #tpu.memory_space<vmem>>, %arg10: memref<8x128xf32, #tpu.memory_space<vmem>>, %arg11: memref<64x128xbf16, #tpu.memory_space<vmem>>, %arg12: memref<64x512xf32, #tpu.memory_space<vmem>>) attributes {dimension_semantics = [#tpu.dimension_semantics<parallel>], iteration_bounds = array<i64: 1>, scalar_prefetch = 0 : i64, scratch_operands = 2 : i64, tpu.core_type = #tpu.core_type<tc>, window_params = [{transform_indices = @transform_0, window_bounds = array<i64: 8, 8, 16>}, {pipeline_mode = #tpu.pipeline_mode<synchronous>, transform_indices = @transform_1, window_bounds = array<i64: 16, 512>}, {pipeline_mode = #tpu.pipeline_mode<synchronous>, transform_indices = @transform_2, window_bounds = array<i64: 128, 512>}, {pipeline_mode = #tpu.pipeline_mode<synchronous>, transform_indices = @transform_3, window_bounds = array<i64: 1, 512>}, {pipeline_mode = #tpu.pipeline_mode<synchronous>, transform_indices = @transform_4, window_bounds = array<i64: 128, 512>}, {pipeline_mode = #tpu.pipeline_mode<synchronous>, transform_indices = @transform_5, window_bounds = array<i64: 128, 512>}, {pipeline_mode = #tpu.pipeline_mode<synchronous>, transform_indices = @transform_6, window_bounds = array<i64: 1, 512>}, {pipeline_mode = #tpu.pipeline_mode<synchronous>, transform_indices = @transform_7, window_bounds = array<i64: 128, 128>}, {pipeline_mode = #tpu.pipeline_mode<synchronous>, transform_indices = @transform_8, window_bounds = array<i64: 1, 128>}, {transform_indices = @transform_9, window_bounds = array<i64: 8, 128>}]} {
    %c0 = arith.constant 0 : index
    %c0_0 = arith.constant 0 : index
    %c0_1 = arith.constant 0 : index
    %0 = vector.load %arg1[%c0, %c0_0, %c0_1] : memref<8x8x16xf32, #tpu.memory_space<vmem>>, vector<8x8x16xf32>
    %1 = vector.shape_cast %0 : vector<8x8x16xf32> to vector<64x16xf32>
    %2 = arith.truncf %1 : vector<64x16xf32> to vector<64x16xbf16>
    %c0_2 = arith.constant 0 : index
    %c0_3 = arith.constant 0 : index
    %3 = vector.load %arg2[%c0_2, %c0_3] : memref<16x512xbf16, #tpu.memory_space<vmem>>, vector<16x512xbf16>
    %cst = arith.constant dense<0.000000e+00> : vector<64x512xf32>
    %4 = tpu.matmul %2, %3, %cst {dimension_numbers = #tpu.dot_dimension_numbers<[1], [0], [0], [1], [0, 0, 1, 1], [], []>} : vector<64x16xbf16>, vector<16x512xbf16>, vector<64x512xf32> -> vector<64x512xf32>
    %c0_4 = arith.constant 0 : index
    %c0_5 = arith.constant 0 : index
    %5 = vector.load %arg4[%c0_4, %c0_5] : memref<1x512xf32, #tpu.memory_space<vmem>>, vector<1x512xf32>
    %6 = vector.broadcast %5 : vector<1x512xf32> to vector<64x512xf32>
    %7 = arith.addf %4, %6 : vector<64x512xf32>
    %c0_6 = arith.constant 0 : index
    %c0_7 = arith.constant 0 : index
    %8 = vector.load %arg12[%c0_6, %c0_7] : memref<64x512xf32, #tpu.memory_space<vmem>>, vector<64x512xf32>
    tpu.vector_store %arg12[%c0_6, %c0_7], %7 {strides = array<i32>} : memref<64x512xf32, #tpu.memory_space<vmem>>, vector<64x512xf32>,
    %cst_8 = arith.constant 0.000000e+00 : f32
    %9 = vector.broadcast %cst_8 : f32 to vector<8x128xf32>
    %cst_9 = arith.constant 0.000000e+00 : f32
    %10 = vector.broadcast %cst_9 : f32 to vector<8x128xf32>
    %c0_i32 = arith.constant 0 : i32
    %c8_i32 = arith.constant 8 : i32
    %11 = arith.muli %c0_i32, %c8_i32 : i32
    %12 = tpu.assume_multiple %11, 8 : i32
    %13 = arith.index_cast %12 : i32 to index
    %c0_10 = arith.constant 0 : index
    %14 = vector.load %arg12[%13, %c0_10] : memref<64x512xf32, #tpu.memory_space<vmem>>, vector<8x512xf32>
    %15 = arith.truncf %9 : vector<8x128xf32> to vector<8x128xbf16>
    %c0_11 = arith.constant 0 : index
    %c0_12 = arith.constant 0 : index
    %16 = vector.load %arg3[%c0_11, %c0_12] : memref<128x512xbf16, #tpu.memory_space<vmem>>, vector<128x512xbf16>
    %cst_13 = arith.constant dense<0.000000e+00> : vector<8x512xf32>
    %17 = tpu.matmul %15, %16, %cst_13 {dimension_numbers = #tpu.dot_dimension_numbers<[1], [0], [0], [1], [0, 0, 1, 1], [], []>} : vector<8x128xbf16>, vector<128x512xbf16>, vector<8x512xf32> -> vector<8x512xf32>
    %18 = arith.addf %14, %17 : vector<8x512xf32>
    %19 = vector.extract_strided_slice %18 {offsets = [0, 0], sizes = [8, 128], strides = [1, 1]} : vector<8x512xf32> to vector<8x128xf32>
    %cst_14 = arith.constant 5.000000e-01 : f32
    %20 = vector.broadcast %cst_14 : f32 to vector<8x128xf32>
    %21 = arith.mulf %20, %19 : vector<8x128xf32>
    %22 = math.tanh %21 : vector<8x128xf32>
    %cst_15 = arith.constant 5.000000e-01 : f32
    %23 = vector.broadcast %cst_15 : f32 to vector<8x128xf32>
    %24 = arith.mulf %23, %22 : vector<8x128xf32>
    %cst_16 = arith.constant 5.000000e-01 : f32
    %25 = vector.broadcast %cst_16 : f32 to vector<8x128xf32>
    %26 = arith.addf %24, %25 : vector<8x128xf32>
    %27 = vector.extract_strided_slice %18 {offsets = [0, 128], sizes = [8, 128], strides = [1, 1]} : vector<8x512xf32> to vector<8x128xf32>
    %cst_17 = arith.constant 5.000000e-01 : f32
    %28 = vector.broadcast %cst_17 : f32 to vector<8x128xf32>
    %29 = arith.mulf %28, %27 : vector<8x128xf32>
    %30 = math.tanh %29 : vector<8x128xf32>
    %cst_18 = arith.constant 5.000000e-01 : f32
    %31 = vector.broadcast %cst_18 : f32 to vector<8x128xf32>
    %32 = arith.mulf %31, %30 : vector<8x128xf32>
    %cst_19 = arith.constant 5.000000e-01 : f32
    %33 = vector.broadcast %cst_19 : f32 to vector<8x128xf32>
    %34 = arith.addf %32, %33 : vector<8x128xf32>
    %35 = vector.extract_strided_slice %18 {offsets = [0, 256], sizes = [8, 128], strides = [1, 1]} : vector<8x512xf32> to vector<8x128xf32>
    %36 = math.tanh %35 : vector<8x128xf32>
    %37 = vector.extract_strided_slice %18 {offsets = [0, 384], sizes = [8, 128], strides = [1, 1]} : vector<8x512xf32> to vector<8x128xf32>
    %cst_20 = arith.constant 5.000000e-01 : f32
    %38 = vector.broadcast %cst_20 : f32 to vector<8x128xf32>
    %39 = arith.mulf %38, %37 : vector<8x128xf32>
    %40 = math.tanh %39 : vector<8x128xf32>
    %cst_21 = arith.constant 5.000000e-01 : f32
    %41 = vector.broadcast %cst_21 : f32 to vector<8x128xf32>
    %42 = arith.mulf %41, %40 : vector<8x128xf32>
    %cst_22 = arith.constant 5.000000e-01 : f32
    %43 = vector.broadcast %cst_22 : f32 to vector<8x128xf32>
    %44 = arith.addf %42, %43 : vector<8x128xf32>
    %45 = arith.mulf %34, %10 : vector<8x128xf32>
    %46 = arith.mulf %26, %36 : vector<8x128xf32>
    %47 = arith.addf %45, %46 : vector<8x128xf32>
    %48 = math.tanh %47 : vector<8x128xf32>
    %49 = arith.mulf %44, %48 : vector<8x128xf32>
    %50 = arith.truncf %49 : vector<8x128xf32> to vector<8x128xbf16>
    %51 = arith.index_cast %12 : i32 to index
    %c0_23 = arith.constant 0 : index
    %52 = vector.load %arg11[%51, %c0_23] : memref<64x128xbf16, #tpu.memory_space<vmem>>, vector<8x128xbf16>
    tpu.vector_store %arg11[%51, %c0_23], %50 {strides = array<i32>} : memref<64x128xbf16, #tpu.memory_space<vmem>>, vector<8x128xbf16>,
    %c1_i32 = arith.constant 1 : i32
    %c8_i32_24 = arith.constant 8 : i32
    %53 = arith.muli %c1_i32, %c8_i32_24 : i32
    %54 = tpu.assume_multiple %53, 8 : i32
    %55 = arith.index_cast %54 : i32 to index
    %c0_25 = arith.constant 0 : index
    %56 = vector.load %arg12[%55, %c0_25] : memref<64x512xf32, #tpu.memory_space<vmem>>, vector<8x512xf32>
    %57 = arith.truncf %49 : vector<8x128xf32> to vector<8x128xbf16>
    %c0_26 = arith.constant 0 : index
    %c0_27 = arith.constant 0 : index
    %58 = vector.load %arg3[%c0_26, %c0_27] : memref<128x512xbf16, #tpu.memory_space<vmem>>, vector<128x512xbf16>
    %cst_28 = arith.constant dense<0.000000e+00> : vector<8x512xf32>
    %59 = tpu.matmul %57, %58, %cst_28 {dimension_numbers = #tpu.dot_dimension_numbers<[1], [0], [0], [1], [0, 0, 1, 1], [], []>} : vector<8x128xbf16>, vector<128x512xbf16>, vector<8x512xf32> -> vector<8x512xf32>
    %60 = arith.addf %56, %59 : vector<8x512xf32>
    %61 = vector.extract_strided_slice %60 {offsets = [0, 0], sizes = [8, 128], strides = [1, 1]} : vector<8x512xf32> to vector<8x128xf32>
    %cst_29 = arith.constant 5.000000e-01 : f32
    %62 = vector.broadcast %cst_29 : f32 to vector<8x128xf32>
    %63 = arith.mulf %62, %61 : vector<8x128xf32>
    %64 = math.tanh %63 : vector<8x128xf32>
    %cst_30 = arith.constant 5.000000e-01 : f32
    %65 = vector.broadcast %cst_30 : f32 to vector<8x128xf32>
    %66 = arith.mulf %65, %64 : vector<8x128xf32>
    %cst_31 = arith.constant 5.000000e-01 : f32
    %67 = vector.broadcast %cst_31 : f32 to vector<8x128xf32>
    %68 = arith.addf %66, %67 : vector<8x128xf32>
    %69 = vector.extract_strided_slice %60 {offsets = [0, 128], sizes = [8, 128], strides = [1, 1]} : vector<8x512xf32> to vector<8x128xf32>
    %cst_32 = arith.constant 5.000000e-01 : f32
    %70 = vector.broadcast %cst_32 : f32 to vector<8x128xf32>
    %71 = arith.mulf %70, %69 : vector<8x128xf32>
    %72 = math.tanh %71 : vector<8x128xf32>
    %cst_33 = arith.constant 5.000000e-01 : f32
    %73 = vector.broadcast %cst_33 : f32 to vector<8x128xf32>
    %74 = arith.mulf %73, %72 : vector<8x128xf32>
    %cst_34 = arith.constant 5.000000e-01 : f32
    %75 = vector.broadcast %cst_34 : f32 to vector<8x128xf32>
    %76 = arith.addf %74, %75 : vector<8x128xf32>
    %77 = vector.extract_strided_slice %60 {offsets = [0, 256], sizes = [8, 128], strides = [1, 1]} : vector<8x512xf32> to vector<8x128xf32>
    %78 = math.tanh %77 : vector<8x128xf32>
    %79 = vector.extract_strided_slice %60 {offsets = [0, 384], sizes = [8, 128], strides = [1, 1]} : vector<8x512xf32> to vector<8x128xf32>
    %cst_35 = arith.constant 5.000000e-01 : f32
    %80 = vector.broadcast %cst_35 : f32 to vector<8x128xf32>
    %81 = arith.mulf %80, %79 : vector<8x128xf32>
    %82 = math.tanh %81 : vector<8x128xf32>
    %cst_36 = arith.constant 5.000000e-01 : f32
    %83 = vector.broadcast %cst_36 : f32 to vector<8x128xf32>
    %84 = arith.mulf %83, %82 : vector<8x128xf32>
    %cst_37 = arith.constant 5.000000e-01 : f32
    %85 = vector.broadcast %cst_37 : f32 to vector<8x128xf32>
    %86 = arith.addf %84, %85 : vector<8x128xf32>
    %87 = arith.mulf %76, %47 : vector<8x128xf32>
    %88 = arith.mulf %68, %78 : vector<8x128xf32>
    %89 = arith.addf %87, %88 : vector<8x128xf32>
    %90 = math.tanh %89 : vector<8x128xf32>
    %91 = arith.mulf %86, %90 : vector<8x128xf32>
    %92 = arith.truncf %91 : vector<8x128xf32> to vector<8x128xbf16>
    %93 = arith.index_cast %54 : i32 to index
    %c0_38 = arith.constant 0 : index
    %94 = vector.load %arg11[%93, %c0_38] : memref<64x128xbf16, #tpu.memory_space<vmem>>, vector<8x128xbf16>
    tpu.vector_store %arg11[%93, %c0_38], %92 {strides = array<i32>} : memref<64x128xbf16, #tpu.memory_space<vmem>>, vector<8x128xbf16>,
    %c2_i32 = arith.constant 2 : i32
    %c8_i32_39 = arith.constant 8 : i32
    %95 = arith.muli %c2_i32, %c8_i32_39 : i32
    %96 = tpu.assume_multiple %95, 8 : i32
    %97 = arith.index_cast %96 : i32 to index
    %c0_40 = arith.constant 0 : index
    %98 = vector.load %arg12[%97, %c0_40] : memref<64x512xf32, #tpu.memory_space<vmem>>, vector<8x512xf32>
    %99 = arith.truncf %91 : vector<8x128xf32> to vector<8x128xbf16>
    %c0_41 = arith.constant 0 : index
    %c0_42 = arith.constant 0 : index
    %100 = vector.load %arg3[%c0_41, %c0_42] : memref<128x512xbf16, #tpu.memory_space<vmem>>, vector<128x512xbf16>
    %cst_43 = arith.constant dense<0.000000e+00> : vector<8x512xf32>
    %101 = tpu.matmul %99, %100, %cst_43 {dimension_numbers = #tpu.dot_dimension_numbers<[1], [0], [0], [1], [0, 0, 1, 1], [], []>} : vector<8x128xbf16>, vector<128x512xbf16>, vector<8x512xf32> -> vector<8x512xf32>
    %102 = arith.addf %98, %101 : vector<8x512xf32>
    %103 = vector.extract_strided_slice %102 {offsets = [0, 0], sizes = [8, 128], strides = [1, 1]} : vector<8x512xf32> to vector<8x128xf32>
    %cst_44 = arith.constant 5.000000e-01 : f32
    %104 = vector.broadcast %cst_44 : f32 to vector<8x128xf32>
    %105 = arith.mulf %104, %103 : vector<8x128xf32>
    %106 = math.tanh %105 : vector<8x128xf32>
    %cst_45 = arith.constant 5.000000e-01 : f32
    %107 = vector.broadcast %cst_45 : f32 to vector<8x128xf32>
    %108 = arith.mulf %107, %106 : vector<8x128xf32>
    %cst_46 = arith.constant 5.000000e-01 : f32
    %109 = vector.broadcast %cst_46 : f32 to vector<8x128xf32>
    %110 = arith.addf %108, %109 : vector<8x128xf32>
    %111 = vector.extract_strided_slice %102 {offsets = [0, 128], sizes = [8, 128], strides = [1, 1]} : vector<8x512xf32> to vector<8x128xf32>
    %cst_47 = arith.constant 5.000000e-01 : f32
    %112 = vector.broadcast %cst_47 : f32 to vector<8x128xf32>
    %113 = arith.mulf %112, %111 : vector<8x128xf32>
    %114 = math.tanh %113 : vector<8x128xf32>
    %cst_48 = arith.constant 5.000000e-01 : f32
    %115 = vector.broadcast %cst_48 : f32 to vector<8x128xf32>
    %116 = arith.mulf %115, %114 : vector<8x128xf32>
    %cst_49 = arith.constant 5.000000e-01 : f32
    %117 = vector.broadcast %cst_49 : f32 to vector<8x128xf32>
    %118 = arith.addf %116, %117 : vector<8x128xf32>
    %119 = vector.extract_strided_slice %102 {offsets = [0, 256], sizes = [8, 128], strides = [1, 1]} : vector<8x512xf32> to vector<8x128xf32>
    %120 = math.tanh %119 : vector<8x128xf32>
    %121 = vector.extract_strided_slice %102 {offsets = [0, 384], sizes = [8, 128], strides = [1, 1]} : vector<8x512xf32> to vector<8x128xf32>
    %cst_50 = arith.constant 5.000000e-01 : f32
    %122 = vector.broadcast %cst_50 : f32 to vector<8x128xf32>
    %123 = arith.mulf %122, %121 : vector<8x128xf32>
    %124 = math.tanh %123 : vector<8x128xf32>
    %cst_51 = arith.constant 5.000000e-01 : f32
    %125 = vector.broadcast %cst_51 : f32 to vector<8x128xf32>
    %126 = arith.mulf %125, %124 : vector<8x128xf32>
    %cst_52 = arith.constant 5.000000e-01 : f32
    %127 = vector.broadcast %cst_52 : f32 to vector<8x128xf32>
    %128 = arith.addf %126, %127 : vector<8x128xf32>
    %129 = arith.mulf %118, %89 : vector<8x128xf32>
    %130 = arith.mulf %110, %120 : vector<8x128xf32>
    %131 = arith.addf %129, %130 : vector<8x128xf32>
    %132 = math.tanh %131 : vector<8x128xf32>
    %133 = arith.mulf %128, %132 : vector<8x128xf32>
    %134 = arith.truncf %133 : vector<8x128xf32> to vector<8x128xbf16>
    %135 = arith.index_cast %96 : i32 to index
    %c0_53 = arith.constant 0 : index
    %136 = vector.load %arg11[%135, %c0_53] : memref<64x128xbf16, #tpu.memory_space<vmem>>, vector<8x128xbf16>
    tpu.vector_store %arg11[%135, %c0_53], %134 {strides = array<i32>} : memref<64x128xbf16, #tpu.memory_space<vmem>>, vector<8x128xbf16>,
    %c3_i32 = arith.constant 3 : i32
    %c8_i32_54 = arith.constant 8 : i32
    %137 = arith.muli %c3_i32, %c8_i32_54 : i32
    %138 = tpu.assume_multiple %137, 8 : i32
    %139 = arith.index_cast %138 : i32 to index
    %c0_55 = arith.constant 0 : index
    %140 = vector.load %arg12[%139, %c0_55] : memref<64x512xf32, #tpu.memory_space<vmem>>, vector<8x512xf32>
    %141 = arith.truncf %133 : vector<8x128xf32> to vector<8x128xbf16>
    %c0_56 = arith.constant 0 : index
    %c0_57 = arith.constant 0 : index
    %142 = vector.load %arg3[%c0_56, %c0_57] : memref<128x512xbf16, #tpu.memory_space<vmem>>, vector<128x512xbf16>
    %cst_58 = arith.constant dense<0.000000e+00> : vector<8x512xf32>
    %143 = tpu.matmul %141, %142, %cst_58 {dimension_numbers = #tpu.dot_dimension_numbers<[1], [0], [0], [1], [0, 0, 1, 1], [], []>} : vector<8x128xbf16>, vector<128x512xbf16>, vector<8x512xf32> -> vector<8x512xf32>
    %144 = arith.addf %140, %143 : vector<8x512xf32>
    %145 = vector.extract_strided_slice %144 {offsets = [0, 0], sizes = [8, 128], strides = [1, 1]} : vector<8x512xf32> to vector<8x128xf32>
    %cst_59 = arith.constant 5.000000e-01 : f32
    %146 = vector.broadcast %cst_59 : f32 to vector<8x128xf32>
    %147 = arith.mulf %146, %145 : vector<8x128xf32>
    %148 = math.tanh %147 : vector<8x128xf32>
    %cst_60 = arith.constant 5.000000e-01 : f32
    %149 = vector.broadcast %cst_60 : f32 to vector<8x128xf32>
    %150 = arith.mulf %149, %148 : vector<8x128xf32>
    %cst_61 = arith.constant 5.000000e-01 : f32
    %151 = vector.broadcast %cst_61 : f32 to vector<8x128xf32>
    %152 = arith.addf %150, %151 : vector<8x128xf32>
    %153 = vector.extract_strided_slice %144 {offsets = [0, 128], sizes = [8, 128], strides = [1, 1]} : vector<8x512xf32> to vector<8x128xf32>
    %cst_62 = arith.constant 5.000000e-01 : f32
    %154 = vector.broadcast %cst_62 : f32 to vector<8x128xf32>
    %155 = arith.mulf %154, %153 : vector<8x128xf32>
    %156 = math.tanh %155 : vector<8x128xf32>
    %cst_63 = arith.constant 5.000000e-01 : f32
    %157 = vector.broadcast %cst_63 : f32 to vector<8x128xf32>
    %158 = arith.mulf %157, %156 : vector<8x128xf32>
    %cst_64 = arith.constant 5.000000e-01 : f32
    %159 = vector.broadcast %cst_64 : f32 to vector<8x128xf32>
    %160 = arith.addf %158, %159 : vector<8x128xf32>
    %161 = vector.extract_strided_slice %144 {offsets = [0, 256], sizes = [8, 128], strides = [1, 1]} : vector<8x512xf32> to vector<8x128xf32>
    %162 = math.tanh %161 : vector<8x128xf32>
    %163 = vector.extract_strided_slice %144 {offsets = [0, 384], sizes = [8, 128], strides = [1, 1]} : vector<8x512xf32> to vector<8x128xf32>
    %cst_65 = arith.constant 5.000000e-01 : f32
    %164 = vector.broadcast %cst_65 : f32 to vector<8x128xf32>
    %165 = arith.mulf %164, %163 : vector<8x128xf32>
    %166 = math.tanh %165 : vector<8x128xf32>
    %cst_66 = arith.constant 5.000000e-01 : f32
    %167 = vector.broadcast %cst_66 : f32 to vector<8x128xf32>
    %168 = arith.mulf %167, %166 : vector<8x128xf32>
    %cst_67 = arith.constant 5.000000e-01 : f32
    %169 = vector.broadcast %cst_67 : f32 to vector<8x128xf32>
    %170 = arith.addf %168, %169 : vector<8x128xf32>
    %171 = arith.mulf %160, %131 : vector<8x128xf32>
    %172 = arith.mulf %152, %162 : vector<8x128xf32>
    %173 = arith.addf %171, %172 : vector<8x128xf32>
    %174 = math.tanh %173 : vector<8x128xf32>
    %175 = arith.mulf %170, %174 : vector<8x128xf32>
    %176 = arith.truncf %175 : vector<8x128xf32> to vector<8x128xbf16>
    %177 = arith.index_cast %138 : i32 to index
    %c0_68 = arith.constant 0 : index
    %178 = vector.load %arg11[%177, %c0_68] : memref<64x128xbf16, #tpu.memory_space<vmem>>, vector<8x128xbf16>
    tpu.vector_store %arg11[%177, %c0_68], %176 {strides = array<i32>} : memref<64x128xbf16, #tpu.memory_space<vmem>>, vector<8x128xbf16>,
    %c4_i32 = arith.constant 4 : i32
    %c8_i32_69 = arith.constant 8 : i32
    %179 = arith.muli %c4_i32, %c8_i32_69 : i32
    %180 = tpu.assume_multiple %179, 8 : i32
    %181 = arith.index_cast %180 : i32 to index
    %c0_70 = arith.constant 0 : index
    %182 = vector.load %arg12[%181, %c0_70] : memref<64x512xf32, #tpu.memory_space<vmem>>, vector<8x512xf32>
    %183 = arith.truncf %175 : vector<8x128xf32> to vector<8x128xbf16>
    %c0_71 = arith.constant 0 : index
    %c0_72 = arith.constant 0 : index
    %184 = vector.load %arg3[%c0_71, %c0_72] : memref<128x512xbf16, #tpu.memory_space<vmem>>, vector<128x512xbf16>
    %cst_73 = arith.constant dense<0.000000e+00> : vector<8x512xf32>
    %185 = tpu.matmul %183, %184, %cst_73 {dimension_numbers = #tpu.dot_dimension_numbers<[1], [0], [0], [1], [0, 0, 1, 1], [], []>} : vector<8x128xbf16>, vector<128x512xbf16>, vector<8x512xf32> -> vector<8x512xf32>
    %186 = arith.addf %182, %185 : vector<8x512xf32>
    %187 = vector.extract_strided_slice %186 {offsets = [0, 0], sizes = [8, 128], strides = [1, 1]} : vector<8x512xf32> to vector<8x128xf32>
    %cst_74 = arith.constant 5.000000e-01 : f32
    %188 = vector.broadcast %cst_74 : f32 to vector<8x128xf32>
    %189 = arith.mulf %188, %187 : vector<8x128xf32>
    %190 = math.tanh %189 : vector<8x128xf32>
    %cst_75 = arith.constant 5.000000e-01 : f32
    %191 = vector.broadcast %cst_75 : f32 to vector<8x128xf32>
    %192 = arith.mulf %191, %190 : vector<8x128xf32>
    %cst_76 = arith.constant 5.000000e-01 : f32
    %193 = vector.broadcast %cst_76 : f32 to vector<8x128xf32>
    %194 = arith.addf %192, %193 : vector<8x128xf32>
    %195 = vector.extract_strided_slice %186 {offsets = [0, 128], sizes = [8, 128], strides = [1, 1]} : vector<8x512xf32> to vector<8x128xf32>
    %cst_77 = arith.constant 5.000000e-01 : f32
    %196 = vector.broadcast %cst_77 : f32 to vector<8x128xf32>
    %197 = arith.mulf %196, %195 : vector<8x128xf32>
    %198 = math.tanh %197 : vector<8x128xf32>
    %cst_78 = arith.constant 5.000000e-01 : f32
    %199 = vector.broadcast %cst_78 : f32 to vector<8x128xf32>
    %200 = arith.mulf %199, %198 : vector<8x128xf32>
    %cst_79 = arith.constant 5.000000e-01 : f32
    %201 = vector.broadcast %cst_79 : f32 to vector<8x128xf32>
    %202 = arith.addf %200, %201 : vector<8x128xf32>
    %203 = vector.extract_strided_slice %186 {offsets = [0, 256], sizes = [8, 128], strides = [1, 1]} : vector<8x512xf32> to vector<8x128xf32>
    %204 = math.tanh %203 : vector<8x128xf32>
    %205 = vector.extract_strided_slice %186 {offsets = [0, 384], sizes = [8, 128], strides = [1, 1]} : vector<8x512xf32> to vector<8x128xf32>
    %cst_80 = arith.constant 5.000000e-01 : f32
    %206 = vector.broadcast %cst_80 : f32 to vector<8x128xf32>
    %207 = arith.mulf %206, %205 : vector<8x128xf32>
    %208 = math.tanh %207 : vector<8x128xf32>
    %cst_81 = arith.constant 5.000000e-01 : f32
    %209 = vector.broadcast %cst_81 : f32 to vector<8x128xf32>
    %210 = arith.mulf %209, %208 : vector<8x128xf32>
    %cst_82 = arith.constant 5.000000e-01 : f32
    %211 = vector.broadcast %cst_82 : f32 to vector<8x128xf32>
    %212 = arith.addf %210, %211 : vector<8x128xf32>
    %213 = arith.mulf %202, %173 : vector<8x128xf32>
    %214 = arith.mulf %194, %204 : vector<8x128xf32>
    %215 = arith.addf %213, %214 : vector<8x128xf32>
    %216 = math.tanh %215 : vector<8x128xf32>
    %217 = arith.mulf %212, %216 : vector<8x128xf32>
    %218 = arith.truncf %217 : vector<8x128xf32> to vector<8x128xbf16>
    %219 = arith.index_cast %180 : i32 to index
    %c0_83 = arith.constant 0 : index
    %220 = vector.load %arg11[%219, %c0_83] : memref<64x128xbf16, #tpu.memory_space<vmem>>, vector<8x128xbf16>
    tpu.vector_store %arg11[%219, %c0_83], %218 {strides = array<i32>} : memref<64x128xbf16, #tpu.memory_space<vmem>>, vector<8x128xbf16>,
    %c5_i32 = arith.constant 5 : i32
    %c8_i32_84 = arith.constant 8 : i32
    %221 = arith.muli %c5_i32, %c8_i32_84 : i32
    %222 = tpu.assume_multiple %221, 8 : i32
    %223 = arith.index_cast %222 : i32 to index
    %c0_85 = arith.constant 0 : index
    %224 = vector.load %arg12[%223, %c0_85] : memref<64x512xf32, #tpu.memory_space<vmem>>, vector<8x512xf32>
    %225 = arith.truncf %217 : vector<8x128xf32> to vector<8x128xbf16>
    %c0_86 = arith.constant 0 : index
    %c0_87 = arith.constant 0 : index
    %226 = vector.load %arg3[%c0_86, %c0_87] : memref<128x512xbf16, #tpu.memory_space<vmem>>, vector<128x512xbf16>
    %cst_88 = arith.constant dense<0.000000e+00> : vector<8x512xf32>
    %227 = tpu.matmul %225, %226, %cst_88 {dimension_numbers = #tpu.dot_dimension_numbers<[1], [0], [0], [1], [0, 0, 1, 1], [], []>} : vector<8x128xbf16>, vector<128x512xbf16>, vector<8x512xf32> -> vector<8x512xf32>
    %228 = arith.addf %224, %227 : vector<8x512xf32>
    %229 = vector.extract_strided_slice %228 {offsets = [0, 0], sizes = [8, 128], strides = [1, 1]} : vector<8x512xf32> to vector<8x128xf32>
    %cst_89 = arith.constant 5.000000e-01 : f32
    %230 = vector.broadcast %cst_89 : f32 to vector<8x128xf32>
    %231 = arith.mulf %230, %229 : vector<8x128xf32>
    %232 = math.tanh %231 : vector<8x128xf32>
    %cst_90 = arith.constant 5.000000e-01 : f32
    %233 = vector.broadcast %cst_90 : f32 to vector<8x128xf32>
    %234 = arith.mulf %233, %232 : vector<8x128xf32>
    %cst_91 = arith.constant 5.000000e-01 : f32
    %235 = vector.broadcast %cst_91 : f32 to vector<8x128xf32>
    %236 = arith.addf %234, %235 : vector<8x128xf32>
    %237 = vector.extract_strided_slice %228 {offsets = [0, 128], sizes = [8, 128], strides = [1, 1]} : vector<8x512xf32> to vector<8x128xf32>
    %cst_92 = arith.constant 5.000000e-01 : f32
    %238 = vector.broadcast %cst_92 : f32 to vector<8x128xf32>
    %239 = arith.mulf %238, %237 : vector<8x128xf32>
    %240 = math.tanh %239 : vector<8x128xf32>
    %cst_93 = arith.constant 5.000000e-01 : f32
    %241 = vector.broadcast %cst_93 : f32 to vector<8x128xf32>
    %242 = arith.mulf %241, %240 : vector<8x128xf32>
    %cst_94 = arith.constant 5.000000e-01 : f32
    %243 = vector.broadcast %cst_94 : f32 to vector<8x128xf32>
    %244 = arith.addf %242, %243 : vector<8x128xf32>
    %245 = vector.extract_strided_slice %228 {offsets = [0, 256], sizes = [8, 128], strides = [1, 1]} : vector<8x512xf32> to vector<8x128xf32>
    %246 = math.tanh %245 : vector<8x128xf32>
    %247 = vector.extract_strided_slice %228 {offsets = [0, 384], sizes = [8, 128], strides = [1, 1]} : vector<8x512xf32> to vector<8x128xf32>
    %cst_95 = arith.constant 5.000000e-01 : f32
    %248 = vector.broadcast %cst_95 : f32 to vector<8x128xf32>
    %249 = arith.mulf %248, %247 : vector<8x128xf32>
    %250 = math.tanh %249 : vector<8x128xf32>
    %cst_96 = arith.constant 5.000000e-01 : f32
    %251 = vector.broadcast %cst_96 : f32 to vector<8x128xf32>
    %252 = arith.mulf %251, %250 : vector<8x128xf32>
    %cst_97 = arith.constant 5.000000e-01 : f32
    %253 = vector.broadcast %cst_97 : f32 to vector<8x128xf32>
    %254 = arith.addf %252, %253 : vector<8x128xf32>
    %255 = arith.mulf %244, %215 : vector<8x128xf32>
    %256 = arith.mulf %236, %246 : vector<8x128xf32>
    %257 = arith.addf %255, %256 : vector<8x128xf32>
    %258 = math.tanh %257 : vector<8x128xf32>
    %259 = arith.mulf %254, %258 : vector<8x128xf32>
    %260 = arith.truncf %259 : vector<8x128xf32> to vector<8x128xbf16>
    %261 = arith.index_cast %222 : i32 to index
    %c0_98 = arith.constant 0 : index
    %262 = vector.load %arg11[%261, %c0_98] : memref<64x128xbf16, #tpu.memory_space<vmem>>, vector<8x128xbf16>
    tpu.vector_store %arg11[%261, %c0_98], %260 {strides = array<i32>} : memref<64x128xbf16, #tpu.memory_space<vmem>>, vector<8x128xbf16>,
    %c6_i32 = arith.constant 6 : i32
    %c8_i32_99 = arith.constant 8 : i32
    %263 = arith.muli %c6_i32, %c8_i32_99 : i32
    %264 = tpu.assume_multiple %263, 8 : i32
    %265 = arith.index_cast %264 : i32 to index
    %c0_100 = arith.constant 0 : index
    %266 = vector.load %arg12[%265, %c0_100] : memref<64x512xf32, #tpu.memory_space<vmem>>, vector<8x512xf32>
    %267 = arith.truncf %259 : vector<8x128xf32> to vector<8x128xbf16>
    %c0_101 = arith.constant 0 : index
    %c0_102 = arith.constant 0 : index
    %268 = vector.load %arg3[%c0_101, %c0_102] : memref<128x512xbf16, #tpu.memory_space<vmem>>, vector<128x512xbf16>
    %cst_103 = arith.constant dense<0.000000e+00> : vector<8x512xf32>
    %269 = tpu.matmul %267, %268, %cst_103 {dimension_numbers = #tpu.dot_dimension_numbers<[1], [0], [0], [1], [0, 0, 1, 1], [], []>} : vector<8x128xbf16>, vector<128x512xbf16>, vector<8x512xf32> -> vector<8x512xf32>
    %270 = arith.addf %266, %269 : vector<8x512xf32>
    %271 = vector.extract_strided_slice %270 {offsets = [0, 0], sizes = [8, 128], strides = [1, 1]} : vector<8x512xf32> to vector<8x128xf32>
    %cst_104 = arith.constant 5.000000e-01 : f32
    %272 = vector.broadcast %cst_104 : f32 to vector<8x128xf32>
    %273 = arith.mulf %272, %271 : vector<8x128xf32>
    %274 = math.tanh %273 : vector<8x128xf32>
    %cst_105 = arith.constant 5.000000e-01 : f32
    %275 = vector.broadcast %cst_105 : f32 to vector<8x128xf32>
    %276 = arith.mulf %275, %274 : vector<8x128xf32>
    %cst_106 = arith.constant 5.000000e-01 : f32
    %277 = vector.broadcast %cst_106 : f32 to vector<8x128xf32>
    %278 = arith.addf %276, %277 : vector<8x128xf32>
    %279 = vector.extract_strided_slice %270 {offsets = [0, 128], sizes = [8, 128], strides = [1, 1]} : vector<8x512xf32> to vector<8x128xf32>
    %cst_107 = arith.constant 5.000000e-01 : f32
    %280 = vector.broadcast %cst_107 : f32 to vector<8x128xf32>
    %281 = arith.mulf %280, %279 : vector<8x128xf32>
    %282 = math.tanh %281 : vector<8x128xf32>
    %cst_108 = arith.constant 5.000000e-01 : f32
    %283 = vector.broadcast %cst_108 : f32 to vector<8x128xf32>
    %284 = arith.mulf %283, %282 : vector<8x128xf32>
    %cst_109 = arith.constant 5.000000e-01 : f32
    %285 = vector.broadcast %cst_109 : f32 to vector<8x128xf32>
    %286 = arith.addf %284, %285 : vector<8x128xf32>
    %287 = vector.extract_strided_slice %270 {offsets = [0, 256], sizes = [8, 128], strides = [1, 1]} : vector<8x512xf32> to vector<8x128xf32>
    %288 = math.tanh %287 : vector<8x128xf32>
    %289 = vector.extract_strided_slice %270 {offsets = [0, 384], sizes = [8, 128], strides = [1, 1]} : vector<8x512xf32> to vector<8x128xf32>
    %cst_110 = arith.constant 5.000000e-01 : f32
    %290 = vector.broadcast %cst_110 : f32 to vector<8x128xf32>
    %291 = arith.mulf %290, %289 : vector<8x128xf32>
    %292 = math.tanh %291 : vector<8x128xf32>
    %cst_111 = arith.constant 5.000000e-01 : f32
    %293 = vector.broadcast %cst_111 : f32 to vector<8x128xf32>
    %294 = arith.mulf %293, %292 : vector<8x128xf32>
    %cst_112 = arith.constant 5.000000e-01 : f32
    %295 = vector.broadcast %cst_112 : f32 to vector<8x128xf32>
    %296 = arith.addf %294, %295 : vector<8x128xf32>
    %297 = arith.mulf %286, %257 : vector<8x128xf32>
    %298 = arith.mulf %278, %288 : vector<8x128xf32>
    %299 = arith.addf %297, %298 : vector<8x128xf32>
    %300 = math.tanh %299 : vector<8x128xf32>
    %301 = arith.mulf %296, %300 : vector<8x128xf32>
    %302 = arith.truncf %301 : vector<8x128xf32> to vector<8x128xbf16>
    %303 = arith.index_cast %264 : i32 to index
    %c0_113 = arith.constant 0 : index
    %304 = vector.load %arg11[%303, %c0_113] : memref<64x128xbf16, #tpu.memory_space<vmem>>, vector<8x128xbf16>
    tpu.vector_store %arg11[%303, %c0_113], %302 {strides = array<i32>} : memref<64x128xbf16, #tpu.memory_space<vmem>>, vector<8x128xbf16>,
    %c7_i32 = arith.constant 7 : i32
    %c8_i32_114 = arith.constant 8 : i32
    %305 = arith.muli %c7_i32, %c8_i32_114 : i32
    %306 = tpu.assume_multiple %305, 8 : i32
    %307 = arith.index_cast %306 : i32 to index
    %c0_115 = arith.constant 0 : index
    %308 = vector.load %arg12[%307, %c0_115] : memref<64x512xf32, #tpu.memory_space<vmem>>, vector<8x512xf32>
    %309 = arith.truncf %301 : vector<8x128xf32> to vector<8x128xbf16>
    %c0_116 = arith.constant 0 : index
    %c0_117 = arith.constant 0 : index
    %310 = vector.load %arg3[%c0_116, %c0_117] : memref<128x512xbf16, #tpu.memory_space<vmem>>, vector<128x512xbf16>
    %cst_118 = arith.constant dense<0.000000e+00> : vector<8x512xf32>
    %311 = tpu.matmul %309, %310, %cst_118 {dimension_numbers = #tpu.dot_dimension_numbers<[1], [0], [0], [1], [0, 0, 1, 1], [], []>} : vector<8x128xbf16>, vector<128x512xbf16>, vector<8x512xf32> -> vector<8x512xf32>
    %312 = arith.addf %308, %311 : vector<8x512xf32>
    %313 = vector.extract_strided_slice %312 {offsets = [0, 0], sizes = [8, 128], strides = [1, 1]} : vector<8x512xf32> to vector<8x128xf32>
    %cst_119 = arith.constant 5.000000e-01 : f32
    %314 = vector.broadcast %cst_119 : f32 to vector<8x128xf32>
    %315 = arith.mulf %314, %313 : vector<8x128xf32>
    %316 = math.tanh %315 : vector<8x128xf32>
    %cst_120 = arith.constant 5.000000e-01 : f32
    %317 = vector.broadcast %cst_120 : f32 to vector<8x128xf32>
    %318 = arith.mulf %317, %316 : vector<8x128xf32>
    %cst_121 = arith.constant 5.000000e-01 : f32
    %319 = vector.broadcast %cst_121 : f32 to vector<8x128xf32>
    %320 = arith.addf %318, %319 : vector<8x128xf32>
    %321 = vector.extract_strided_slice %312 {offsets = [0, 128], sizes = [8, 128], strides = [1, 1]} : vector<8x512xf32> to vector<8x128xf32>
    %cst_122 = arith.constant 5.000000e-01 : f32
    %322 = vector.broadcast %cst_122 : f32 to vector<8x128xf32>
    %323 = arith.mulf %322, %321 : vector<8x128xf32>
    %324 = math.tanh %323 : vector<8x128xf32>
    %cst_123 = arith.constant 5.000000e-01 : f32
    %325 = vector.broadcast %cst_123 : f32 to vector<8x128xf32>
    %326 = arith.mulf %325, %324 : vector<8x128xf32>
    %cst_124 = arith.constant 5.000000e-01 : f32
    %327 = vector.broadcast %cst_124 : f32 to vector<8x128xf32>
    %328 = arith.addf %326, %327 : vector<8x128xf32>
    %329 = vector.extract_strided_slice %312 {offsets = [0, 256], sizes = [8, 128], strides = [1, 1]} : vector<8x512xf32> to vector<8x128xf32>
    %330 = math.tanh %329 : vector<8x128xf32>
    %331 = vector.extract_strided_slice %312 {offsets = [0, 384], sizes = [8, 128], strides = [1, 1]} : vector<8x512xf32> to vector<8x128xf32>
    %cst_125 = arith.constant 5.000000e-01 : f32
    %332 = vector.broadcast %cst_125 : f32 to vector<8x128xf32>
    %333 = arith.mulf %332, %331 : vector<8x128xf32>
    %334 = math.tanh %333 : vector<8x128xf32>
    %cst_126 = arith.constant 5.000000e-01 : f32
    %335 = vector.broadcast %cst_126 : f32 to vector<8x128xf32>
    %336 = arith.mulf %335, %334 : vector<8x128xf32>
    %cst_127 = arith.constant 5.000000e-01 : f32
    %337 = vector.broadcast %cst_127 : f32 to vector<8x128xf32>
    %338 = arith.addf %336, %337 : vector<8x128xf32>
    %339 = arith.mulf %328, %299 : vector<8x128xf32>
    %340 = arith.mulf %320, %330 : vector<8x128xf32>
    %341 = arith.addf %339, %340 : vector<8x128xf32>
    %342 = math.tanh %341 : vector<8x128xf32>
    %343 = arith.mulf %338, %342 : vector<8x128xf32>
    %344 = arith.truncf %343 : vector<8x128xf32> to vector<8x128xbf16>
    %345 = arith.index_cast %306 : i32 to index
    %c0_128 = arith.constant 0 : index
    %346 = vector.load %arg11[%345, %c0_128] : memref<64x128xbf16, #tpu.memory_space<vmem>>, vector<8x128xbf16>
    tpu.vector_store %arg11[%345, %c0_128], %344 {strides = array<i32>} : memref<64x128xbf16, #tpu.memory_space<vmem>>, vector<8x128xbf16>,
    %c8_i32_129 = arith.constant 8 : i32
    %c0_130 = arith.constant 0 : index
    %c0_131 = arith.constant 0 : index
    %347 = vector.load %arg11[%c0_130, %c0_131] : memref<64x128xbf16, #tpu.memory_space<vmem>>, vector<64x128xbf16>
    %c0_132 = arith.constant 0 : index
    %c0_133 = arith.constant 0 : index
    %348 = vector.load %arg5[%c0_132, %c0_133] : memref<128x512xbf16, #tpu.memory_space<vmem>>, vector<128x512xbf16>
    %cst_134 = arith.constant dense<0.000000e+00> : vector<64x512xf32>
    %349 = tpu.matmul %347, %348, %cst_134 {dimension_numbers = #tpu.dot_dimension_numbers<[1], [0], [0], [1], [0, 0, 1, 1], [], []>} : vector<64x128xbf16>, vector<128x512xbf16>, vector<64x512xf32> -> vector<64x512xf32>
    %c0_135 = arith.constant 0 : index
    %c0_136 = arith.constant 0 : index
    %350 = vector.load %arg7[%c0_135, %c0_136] : memref<1x512xf32, #tpu.memory_space<vmem>>, vector<1x512xf32>
    %351 = vector.broadcast %350 : vector<1x512xf32> to vector<64x512xf32>
    %352 = arith.addf %349, %351 : vector<64x512xf32>
    %c0_137 = arith.constant 0 : index
    %c0_138 = arith.constant 0 : index
    %353 = vector.load %arg12[%c0_137, %c0_138] : memref<64x512xf32, #tpu.memory_space<vmem>>, vector<64x512xf32>
    tpu.vector_store %arg12[%c0_137, %c0_138], %352 {strides = array<i32>} : memref<64x512xf32, #tpu.memory_space<vmem>>, vector<64x512xf32>,
    %cst_139 = arith.constant 0.000000e+00 : f32
    %354 = vector.broadcast %cst_139 : f32 to vector<8x128xf32>
    %cst_140 = arith.constant 0.000000e+00 : f32
    %355 = vector.broadcast %cst_140 : f32 to vector<8x128xf32>
    %c0_i32_141 = arith.constant 0 : i32
    %c8_i32_142 = arith.constant 8 : i32
    %356 = arith.muli %c0_i32_141, %c8_i32_142 : i32
    %357 = tpu.assume_multiple %356, 8 : i32
    %358 = arith.index_cast %357 : i32 to index
    %c0_143 = arith.constant 0 : index
    %359 = vector.load %arg12[%358, %c0_143] : memref<64x512xf32, #tpu.memory_space<vmem>>, vector<8x512xf32>
    %360 = arith.truncf %354 : vector<8x128xf32> to vector<8x128xbf16>
    %c0_144 = arith.constant 0 : index
    %c0_145 = arith.constant 0 : index
    %361 = vector.load %arg6[%c0_144, %c0_145] : memref<128x512xbf16, #tpu.memory_space<vmem>>, vector<128x512xbf16>
    %cst_146 = arith.constant dense<0.000000e+00> : vector<8x512xf32>
    %362 = tpu.matmul %360, %361, %cst_146 {dimension_numbers = #tpu.dot_dimension_numbers<[1], [0], [0], [1], [0, 0, 1, 1], [], []>} : vector<8x128xbf16>, vector<128x512xbf16>, vector<8x512xf32> -> vector<8x512xf32>
    %363 = arith.addf %359, %362 : vector<8x512xf32>
    %364 = vector.extract_strided_slice %363 {offsets = [0, 0], sizes = [8, 128], strides = [1, 1]} : vector<8x512xf32> to vector<8x128xf32>
    %cst_147 = arith.constant 5.000000e-01 : f32
    %365 = vector.broadcast %cst_147 : f32 to vector<8x128xf32>
    %366 = arith.mulf %365, %364 : vector<8x128xf32>
    %367 = math.tanh %366 : vector<8x128xf32>
    %cst_148 = arith.constant 5.000000e-01 : f32
    %368 = vector.broadcast %cst_148 : f32 to vector<8x128xf32>
    %369 = arith.mulf %368, %367 : vector<8x128xf32>
    %cst_149 = arith.constant 5.000000e-01 : f32
    %370 = vector.broadcast %cst_149 : f32 to vector<8x128xf32>
    %371 = arith.addf %369, %370 : vector<8x128xf32>
    %372 = vector.extract_strided_slice %363 {offsets = [0, 128], sizes = [8, 128], strides = [1, 1]} : vector<8x512xf32> to vector<8x128xf32>
    %cst_150 = arith.constant 5.000000e-01 : f32
    %373 = vector.broadcast %cst_150 : f32 to vector<8x128xf32>
    %374 = arith.mulf %373, %372 : vector<8x128xf32>
    %375 = math.tanh %374 : vector<8x128xf32>
    %cst_151 = arith.constant 5.000000e-01 : f32
    %376 = vector.broadcast %cst_151 : f32 to vector<8x128xf32>
    %377 = arith.mulf %376, %375 : vector<8x128xf32>
    %cst_152 = arith.constant 5.000000e-01 : f32
    %378 = vector.broadcast %cst_152 : f32 to vector<8x128xf32>
    %379 = arith.addf %377, %378 : vector<8x128xf32>
    %380 = vector.extract_strided_slice %363 {offsets = [0, 256], sizes = [8, 128], strides = [1, 1]} : vector<8x512xf32> to vector<8x128xf32>
    %381 = math.tanh %380 : vector<8x128xf32>
    %382 = vector.extract_strided_slice %363 {offsets = [0, 384], sizes = [8, 128], strides = [1, 1]} : vector<8x512xf32> to vector<8x128xf32>
    %cst_153 = arith.constant 5.000000e-01 : f32
    %383 = vector.broadcast %cst_153 : f32 to vector<8x128xf32>
    %384 = arith.mulf %383, %382 : vector<8x128xf32>
    %385 = math.tanh %384 : vector<8x128xf32>
    %cst_154 = arith.constant 5.000000e-01 : f32
    %386 = vector.broadcast %cst_154 : f32 to vector<8x128xf32>
    %387 = arith.mulf %386, %385 : vector<8x128xf32>
    %cst_155 = arith.constant 5.000000e-01 : f32
    %388 = vector.broadcast %cst_155 : f32 to vector<8x128xf32>
    %389 = arith.addf %387, %388 : vector<8x128xf32>
    %390 = arith.mulf %379, %355 : vector<8x128xf32>
    %391 = arith.mulf %371, %381 : vector<8x128xf32>
    %392 = arith.addf %390, %391 : vector<8x128xf32>
    %393 = math.tanh %392 : vector<8x128xf32>
    %394 = arith.mulf %389, %393 : vector<8x128xf32>
    %c1_i32_156 = arith.constant 1 : i32
    %c8_i32_157 = arith.constant 8 : i32
    %395 = arith.muli %c1_i32_156, %c8_i32_157 : i32
    %396 = tpu.assume_multiple %395, 8 : i32
    %397 = arith.index_cast %396 : i32 to index
    %c0_158 = arith.constant 0 : index
    %398 = vector.load %arg12[%397, %c0_158] : memref<64x512xf32, #tpu.memory_space<vmem>>, vector<8x512xf32>
    %399 = arith.truncf %394 : vector<8x128xf32> to vector<8x128xbf16>
    %c0_159 = arith.constant 0 : index
    %c0_160 = arith.constant 0 : index
    %400 = vector.load %arg6[%c0_159, %c0_160] : memref<128x512xbf16, #tpu.memory_space<vmem>>, vector<128x512xbf16>
    %cst_161 = arith.constant dense<0.000000e+00> : vector<8x512xf32>
    %401 = tpu.matmul %399, %400, %cst_161 {dimension_numbers = #tpu.dot_dimension_numbers<[1], [0], [0], [1], [0, 0, 1, 1], [], []>} : vector<8x128xbf16>, vector<128x512xbf16>, vector<8x512xf32> -> vector<8x512xf32>
    %402 = arith.addf %398, %401 : vector<8x512xf32>
    %403 = vector.extract_strided_slice %402 {offsets = [0, 0], sizes = [8, 128], strides = [1, 1]} : vector<8x512xf32> to vector<8x128xf32>
    %cst_162 = arith.constant 5.000000e-01 : f32
    %404 = vector.broadcast %cst_162 : f32 to vector<8x128xf32>
    %405 = arith.mulf %404, %403 : vector<8x128xf32>
    %406 = math.tanh %405 : vector<8x128xf32>
    %cst_163 = arith.constant 5.000000e-01 : f32
    %407 = vector.broadcast %cst_163 : f32 to vector<8x128xf32>
    %408 = arith.mulf %407, %406 : vector<8x128xf32>
    %cst_164 = arith.constant 5.000000e-01 : f32
    %409 = vector.broadcast %cst_164 : f32 to vector<8x128xf32>
    %410 = arith.addf %408, %409 : vector<8x128xf32>
    %411 = vector.extract_strided_slice %402 {offsets = [0, 128], sizes = [8, 128], strides = [1, 1]} : vector<8x512xf32> to vector<8x128xf32>
    %cst_165 = arith.constant 5.000000e-01 : f32
    %412 = vector.broadcast %cst_165 : f32 to vector<8x128xf32>
    %413 = arith.mulf %412, %411 : vector<8x128xf32>
    %414 = math.tanh %413 : vector<8x128xf32>
    %cst_166 = arith.constant 5.000000e-01 : f32
    %415 = vector.broadcast %cst_166 : f32 to vector<8x128xf32>
    %416 = arith.mulf %415, %414 : vector<8x128xf32>
    %cst_167 = arith.constant 5.000000e-01 : f32
    %417 = vector.broadcast %cst_167 : f32 to vector<8x128xf32>
    %418 = arith.addf %416, %417 : vector<8x128xf32>
    %419 = vector.extract_strided_slice %402 {offsets = [0, 256], sizes = [8, 128], strides = [1, 1]} : vector<8x512xf32> to vector<8x128xf32>
    %420 = math.tanh %419 : vector<8x128xf32>
    %421 = vector.extract_strided_slice %402 {offsets = [0, 384], sizes = [8, 128], strides = [1, 1]} : vector<8x512xf32> to vector<8x128xf32>
    %cst_168 = arith.constant 5.000000e-01 : f32
    %422 = vector.broadcast %cst_168 : f32 to vector<8x128xf32>
    %423 = arith.mulf %422, %421 : vector<8x128xf32>
    %424 = math.tanh %423 : vector<8x128xf32>
    %cst_169 = arith.constant 5.000000e-01 : f32
    %425 = vector.broadcast %cst_169 : f32 to vector<8x128xf32>
    %426 = arith.mulf %425, %424 : vector<8x128xf32>
    %cst_170 = arith.constant 5.000000e-01 : f32
    %427 = vector.broadcast %cst_170 : f32 to vector<8x128xf32>
    %428 = arith.addf %426, %427 : vector<8x128xf32>
    %429 = arith.mulf %418, %392 : vector<8x128xf32>
    %430 = arith.mulf %410, %420 : vector<8x128xf32>
    %431 = arith.addf %429, %430 : vector<8x128xf32>
    %432 = math.tanh %431 : vector<8x128xf32>
    %433 = arith.mulf %428, %432 : vector<8x128xf32>
    %c2_i32_171 = arith.constant 2 : i32
    %c8_i32_172 = arith.constant 8 : i32
    %434 = arith.muli %c2_i32_171, %c8_i32_172 : i32
    %435 = tpu.assume_multiple %434, 8 : i32
    %436 = arith.index_cast %435 : i32 to index
    %c0_173 = arith.constant 0 : index
    %437 = vector.load %arg12[%436, %c0_173] : memref<64x512xf32, #tpu.memory_space<vmem>>, vector<8x512xf32>
    %438 = arith.truncf %433 : vector<8x128xf32> to vector<8x128xbf16>
    %c0_174 = arith.constant 0 : index
    %c0_175 = arith.constant 0 : index
    %439 = vector.load %arg6[%c0_174, %c0_175] : memref<128x512xbf16, #tpu.memory_space<vmem>>, vector<128x512xbf16>
    %cst_176 = arith.constant dense<0.000000e+00> : vector<8x512xf32>
    %440 = tpu.matmul %438, %439, %cst_176 {dimension_numbers = #tpu.dot_dimension_numbers<[1], [0], [0], [1], [0, 0, 1, 1], [], []>} : vector<8x128xbf16>, vector<128x512xbf16>, vector<8x512xf32> -> vector<8x512xf32>
    %441 = arith.addf %437, %440 : vector<8x512xf32>
    %442 = vector.extract_strided_slice %441 {offsets = [0, 0], sizes = [8, 128], strides = [1, 1]} : vector<8x512xf32> to vector<8x128xf32>
    %cst_177 = arith.constant 5.000000e-01 : f32
    %443 = vector.broadcast %cst_177 : f32 to vector<8x128xf32>
    %444 = arith.mulf %443, %442 : vector<8x128xf32>
    %445 = math.tanh %444 : vector<8x128xf32>
    %cst_178 = arith.constant 5.000000e-01 : f32
    %446 = vector.broadcast %cst_178 : f32 to vector<8x128xf32>
    %447 = arith.mulf %446, %445 : vector<8x128xf32>
    %cst_179 = arith.constant 5.000000e-01 : f32
    %448 = vector.broadcast %cst_179 : f32 to vector<8x128xf32>
    %449 = arith.addf %447, %448 : vector<8x128xf32>
    %450 = vector.extract_strided_slice %441 {offsets = [0, 128], sizes = [8, 128], strides = [1, 1]} : vector<8x512xf32> to vector<8x128xf32>
    %cst_180 = arith.constant 5.000000e-01 : f32
    %451 = vector.broadcast %cst_180 : f32 to vector<8x128xf32>
    %452 = arith.mulf %451, %450 : vector<8x128xf32>
    %453 = math.tanh %452 : vector<8x128xf32>
    %cst_181 = arith.constant 5.000000e-01 : f32
    %454 = vector.broadcast %cst_181 : f32 to vector<8x128xf32>
    %455 = arith.mulf %454, %453 : vector<8x128xf32>
    %cst_182 = arith.constant 5.000000e-01 : f32
    %456 = vector.broadcast %cst_182 : f32 to vector<8x128xf32>
    %457 = arith.addf %455, %456 : vector<8x128xf32>
    %458 = vector.extract_strided_slice %441 {offsets = [0, 256], sizes = [8, 128], strides = [1, 1]} : vector<8x512xf32> to vector<8x128xf32>
    %459 = math.tanh %458 : vector<8x128xf32>
    %460 = vector.extract_strided_slice %441 {offsets = [0, 384], sizes = [8, 128], strides = [1, 1]} : vector<8x512xf32> to vector<8x128xf32>
    %cst_183 = arith.constant 5.000000e-01 : f32
    %461 = vector.broadcast %cst_183 : f32 to vector<8x128xf32>
    %462 = arith.mulf %461, %460 : vector<8x128xf32>
    %463 = math.tanh %462 : vector<8x128xf32>
    %cst_184 = arith.constant 5.000000e-01 : f32
    %464 = vector.broadcast %cst_184 : f32 to vector<8x128xf32>
    %465 = arith.mulf %464, %463 : vector<8x128xf32>
    %cst_185 = arith.constant 5.000000e-01 : f32
    %466 = vector.broadcast %cst_185 : f32 to vector<8x128xf32>
    %467 = arith.addf %465, %466 : vector<8x128xf32>
    %468 = arith.mulf %457, %431 : vector<8x128xf32>
    %469 = arith.mulf %449, %459 : vector<8x128xf32>
    %470 = arith.addf %468, %469 : vector<8x128xf32>
    %471 = math.tanh %470 : vector<8x128xf32>
    %472 = arith.mulf %467, %471 : vector<8x128xf32>
    %c3_i32_186 = arith.constant 3 : i32
    %c8_i32_187 = arith.constant 8 : i32
    %473 = arith.muli %c3_i32_186, %c8_i32_187 : i32
    %474 = tpu.assume_multiple %473, 8 : i32
    %475 = arith.index_cast %474 : i32 to index
    %c0_188 = arith.constant 0 : index
    %476 = vector.load %arg12[%475, %c0_188] : memref<64x512xf32, #tpu.memory_space<vmem>>, vector<8x512xf32>
    %477 = arith.truncf %472 : vector<8x128xf32> to vector<8x128xbf16>
    %c0_189 = arith.constant 0 : index
    %c0_190 = arith.constant 0 : index
    %478 = vector.load %arg6[%c0_189, %c0_190] : memref<128x512xbf16, #tpu.memory_space<vmem>>, vector<128x512xbf16>
    %cst_191 = arith.constant dense<0.000000e+00> : vector<8x512xf32>
    %479 = tpu.matmul %477, %478, %cst_191 {dimension_numbers = #tpu.dot_dimension_numbers<[1], [0], [0], [1], [0, 0, 1, 1], [], []>} : vector<8x128xbf16>, vector<128x512xbf16>, vector<8x512xf32> -> vector<8x512xf32>
    %480 = arith.addf %476, %479 : vector<8x512xf32>
    %481 = vector.extract_strided_slice %480 {offsets = [0, 0], sizes = [8, 128], strides = [1, 1]} : vector<8x512xf32> to vector<8x128xf32>
    %cst_192 = arith.constant 5.000000e-01 : f32
    %482 = vector.broadcast %cst_192 : f32 to vector<8x128xf32>
    %483 = arith.mulf %482, %481 : vector<8x128xf32>
    %484 = math.tanh %483 : vector<8x128xf32>
    %cst_193 = arith.constant 5.000000e-01 : f32
    %485 = vector.broadcast %cst_193 : f32 to vector<8x128xf32>
    %486 = arith.mulf %485, %484 : vector<8x128xf32>
    %cst_194 = arith.constant 5.000000e-01 : f32
    %487 = vector.broadcast %cst_194 : f32 to vector<8x128xf32>
    %488 = arith.addf %486, %487 : vector<8x128xf32>
    %489 = vector.extract_strided_slice %480 {offsets = [0, 128], sizes = [8, 128], strides = [1, 1]} : vector<8x512xf32> to vector<8x128xf32>
    %cst_195 = arith.constant 5.000000e-01 : f32
    %490 = vector.broadcast %cst_195 : f32 to vector<8x128xf32>
    %491 = arith.mulf %490, %489 : vector<8x128xf32>
    %492 = math.tanh %491 : vector<8x128xf32>
    %cst_196 = arith.constant 5.000000e-01 : f32
    %493 = vector.broadcast %cst_196 : f32 to vector<8x128xf32>
    %494 = arith.mulf %493, %492 : vector<8x128xf32>
    %cst_197 = arith.constant 5.000000e-01 : f32
    %495 = vector.broadcast %cst_197 : f32 to vector<8x128xf32>
    %496 = arith.addf %494, %495 : vector<8x128xf32>
    %497 = vector.extract_strided_slice %480 {offsets = [0, 256], sizes = [8, 128], strides = [1, 1]} : vector<8x512xf32> to vector<8x128xf32>
    %498 = math.tanh %497 : vector<8x128xf32>
    %499 = vector.extract_strided_slice %480 {offsets = [0, 384], sizes = [8, 128], strides = [1, 1]} : vector<8x512xf32> to vector<8x128xf32>
    %cst_198 = arith.constant 5.000000e-01 : f32
    %500 = vector.broadcast %cst_198 : f32 to vector<8x128xf32>
    %501 = arith.mulf %500, %499 : vector<8x128xf32>
    %502 = math.tanh %501 : vector<8x128xf32>
    %cst_199 = arith.constant 5.000000e-01 : f32
    %503 = vector.broadcast %cst_199 : f32 to vector<8x128xf32>
    %504 = arith.mulf %503, %502 : vector<8x128xf32>
    %cst_200 = arith.constant 5.000000e-01 : f32
    %505 = vector.broadcast %cst_200 : f32 to vector<8x128xf32>
    %506 = arith.addf %504, %505 : vector<8x128xf32>
    %507 = arith.mulf %496, %470 : vector<8x128xf32>
    %508 = arith.mulf %488, %498 : vector<8x128xf32>
    %509 = arith.addf %507, %508 : vector<8x128xf32>
    %510 = math.tanh %509 : vector<8x128xf32>
    %511 = arith.mulf %506, %510 : vector<8x128xf32>
    %c4_i32_201 = arith.constant 4 : i32
    %c8_i32_202 = arith.constant 8 : i32
    %512 = arith.muli %c4_i32_201, %c8_i32_202 : i32
    %513 = tpu.assume_multiple %512, 8 : i32
    %514 = arith.index_cast %513 : i32 to index
    %c0_203 = arith.constant 0 : index
    %515 = vector.load %arg12[%514, %c0_203] : memref<64x512xf32, #tpu.memory_space<vmem>>, vector<8x512xf32>
    %516 = arith.truncf %511 : vector<8x128xf32> to vector<8x128xbf16>
    %c0_204 = arith.constant 0 : index
    %c0_205 = arith.constant 0 : index
    %517 = vector.load %arg6[%c0_204, %c0_205] : memref<128x512xbf16, #tpu.memory_space<vmem>>, vector<128x512xbf16>
    %cst_206 = arith.constant dense<0.000000e+00> : vector<8x512xf32>
    %518 = tpu.matmul %516, %517, %cst_206 {dimension_numbers = #tpu.dot_dimension_numbers<[1], [0], [0], [1], [0, 0, 1, 1], [], []>} : vector<8x128xbf16>, vector<128x512xbf16>, vector<8x512xf32> -> vector<8x512xf32>
    %519 = arith.addf %515, %518 : vector<8x512xf32>
    %520 = vector.extract_strided_slice %519 {offsets = [0, 0], sizes = [8, 128], strides = [1, 1]} : vector<8x512xf32> to vector<8x128xf32>
    %cst_207 = arith.constant 5.000000e-01 : f32
    %521 = vector.broadcast %cst_207 : f32 to vector<8x128xf32>
    %522 = arith.mulf %521, %520 : vector<8x128xf32>
    %523 = math.tanh %522 : vector<8x128xf32>
    %cst_208 = arith.constant 5.000000e-01 : f32
    %524 = vector.broadcast %cst_208 : f32 to vector<8x128xf32>
    %525 = arith.mulf %524, %523 : vector<8x128xf32>
    %cst_209 = arith.constant 5.000000e-01 : f32
    %526 = vector.broadcast %cst_209 : f32 to vector<8x128xf32>
    %527 = arith.addf %525, %526 : vector<8x128xf32>
    %528 = vector.extract_strided_slice %519 {offsets = [0, 128], sizes = [8, 128], strides = [1, 1]} : vector<8x512xf32> to vector<8x128xf32>
    %cst_210 = arith.constant 5.000000e-01 : f32
    %529 = vector.broadcast %cst_210 : f32 to vector<8x128xf32>
    %530 = arith.mulf %529, %528 : vector<8x128xf32>
    %531 = math.tanh %530 : vector<8x128xf32>
    %cst_211 = arith.constant 5.000000e-01 : f32
    %532 = vector.broadcast %cst_211 : f32 to vector<8x128xf32>
    %533 = arith.mulf %532, %531 : vector<8x128xf32>
    %cst_212 = arith.constant 5.000000e-01 : f32
    %534 = vector.broadcast %cst_212 : f32 to vector<8x128xf32>
    %535 = arith.addf %533, %534 : vector<8x128xf32>
    %536 = vector.extract_strided_slice %519 {offsets = [0, 256], sizes = [8, 128], strides = [1, 1]} : vector<8x512xf32> to vector<8x128xf32>
    %537 = math.tanh %536 : vector<8x128xf32>
    %538 = vector.extract_strided_slice %519 {offsets = [0, 384], sizes = [8, 128], strides = [1, 1]} : vector<8x512xf32> to vector<8x128xf32>
    %cst_213 = arith.constant 5.000000e-01 : f32
    %539 = vector.broadcast %cst_213 : f32 to vector<8x128xf32>
    %540 = arith.mulf %539, %538 : vector<8x128xf32>
    %541 = math.tanh %540 : vector<8x128xf32>
    %cst_214 = arith.constant 5.000000e-01 : f32
    %542 = vector.broadcast %cst_214 : f32 to vector<8x128xf32>
    %543 = arith.mulf %542, %541 : vector<8x128xf32>
    %cst_215 = arith.constant 5.000000e-01 : f32
    %544 = vector.broadcast %cst_215 : f32 to vector<8x128xf32>
    %545 = arith.addf %543, %544 : vector<8x128xf32>
    %546 = arith.mulf %535, %509 : vector<8x128xf32>
    %547 = arith.mulf %527, %537 : vector<8x128xf32>
    %548 = arith.addf %546, %547 : vector<8x128xf32>
    %549 = math.tanh %548 : vector<8x128xf32>
    %550 = arith.mulf %545, %549 : vector<8x128xf32>
    %c5_i32_216 = arith.constant 5 : i32
    %c8_i32_217 = arith.constant 8 : i32
    %551 = arith.muli %c5_i32_216, %c8_i32_217 : i32
    %552 = tpu.assume_multiple %551, 8 : i32
    %553 = arith.index_cast %552 : i32 to index
    %c0_218 = arith.constant 0 : index
    %554 = vector.load %arg12[%553, %c0_218] : memref<64x512xf32, #tpu.memory_space<vmem>>, vector<8x512xf32>
    %555 = arith.truncf %550 : vector<8x128xf32> to vector<8x128xbf16>
    %c0_219 = arith.constant 0 : index
    %c0_220 = arith.constant 0 : index
    %556 = vector.load %arg6[%c0_219, %c0_220] : memref<128x512xbf16, #tpu.memory_space<vmem>>, vector<128x512xbf16>
    %cst_221 = arith.constant dense<0.000000e+00> : vector<8x512xf32>
    %557 = tpu.matmul %555, %556, %cst_221 {dimension_numbers = #tpu.dot_dimension_numbers<[1], [0], [0], [1], [0, 0, 1, 1], [], []>} : vector<8x128xbf16>, vector<128x512xbf16>, vector<8x512xf32> -> vector<8x512xf32>
    %558 = arith.addf %554, %557 : vector<8x512xf32>
    %559 = vector.extract_strided_slice %558 {offsets = [0, 0], sizes = [8, 128], strides = [1, 1]} : vector<8x512xf32> to vector<8x128xf32>
    %cst_222 = arith.constant 5.000000e-01 : f32
    %560 = vector.broadcast %cst_222 : f32 to vector<8x128xf32>
    %561 = arith.mulf %560, %559 : vector<8x128xf32>
    %562 = math.tanh %561 : vector<8x128xf32>
    %cst_223 = arith.constant 5.000000e-01 : f32
    %563 = vector.broadcast %cst_223 : f32 to vector<8x128xf32>
    %564 = arith.mulf %563, %562 : vector<8x128xf32>
    %cst_224 = arith.constant 5.000000e-01 : f32
    %565 = vector.broadcast %cst_224 : f32 to vector<8x128xf32>
    %566 = arith.addf %564, %565 : vector<8x128xf32>
    %567 = vector.extract_strided_slice %558 {offsets = [0, 128], sizes = [8, 128], strides = [1, 1]} : vector<8x512xf32> to vector<8x128xf32>
    %cst_225 = arith.constant 5.000000e-01 : f32
    %568 = vector.broadcast %cst_225 : f32 to vector<8x128xf32>
    %569 = arith.mulf %568, %567 : vector<8x128xf32>
    %570 = math.tanh %569 : vector<8x128xf32>
    %cst_226 = arith.constant 5.000000e-01 : f32
    %571 = vector.broadcast %cst_226 : f32 to vector<8x128xf32>
    %572 = arith.mulf %571, %570 : vector<8x128xf32>
    %cst_227 = arith.constant 5.000000e-01 : f32
    %573 = vector.broadcast %cst_227 : f32 to vector<8x128xf32>
    %574 = arith.addf %572, %573 : vector<8x128xf32>
    %575 = vector.extract_strided_slice %558 {offsets = [0, 256], sizes = [8, 128], strides = [1, 1]} : vector<8x512xf32> to vector<8x128xf32>
    %576 = math.tanh %575 : vector<8x128xf32>
    %577 = vector.extract_strided_slice %558 {offsets = [0, 384], sizes = [8, 128], strides = [1, 1]} : vector<8x512xf32> to vector<8x128xf32>
    %cst_228 = arith.constant 5.000000e-01 : f32
    %578 = vector.broadcast %cst_228 : f32 to vector<8x128xf32>
    %579 = arith.mulf %578, %577 : vector<8x128xf32>
    %580 = math.tanh %579 : vector<8x128xf32>
    %cst_229 = arith.constant 5.000000e-01 : f32
    %581 = vector.broadcast %cst_229 : f32 to vector<8x128xf32>
    %582 = arith.mulf %581, %580 : vector<8x128xf32>
    %cst_230 = arith.constant 5.000000e-01 : f32
    %583 = vector.broadcast %cst_230 : f32 to vector<8x128xf32>
    %584 = arith.addf %582, %583 : vector<8x128xf32>
    %585 = arith.mulf %574, %548 : vector<8x128xf32>
    %586 = arith.mulf %566, %576 : vector<8x128xf32>
    %587 = arith.addf %585, %586 : vector<8x128xf32>
    %588 = math.tanh %587 : vector<8x128xf32>
    %589 = arith.mulf %584, %588 : vector<8x128xf32>
    %c6_i32_231 = arith.constant 6 : i32
    %c8_i32_232 = arith.constant 8 : i32
    %590 = arith.muli %c6_i32_231, %c8_i32_232 : i32
    %591 = tpu.assume_multiple %590, 8 : i32
    %592 = arith.index_cast %591 : i32 to index
    %c0_233 = arith.constant 0 : index
    %593 = vector.load %arg12[%592, %c0_233] : memref<64x512xf32, #tpu.memory_space<vmem>>, vector<8x512xf32>
    %594 = arith.truncf %589 : vector<8x128xf32> to vector<8x128xbf16>
    %c0_234 = arith.constant 0 : index
    %c0_235 = arith.constant 0 : index
    %595 = vector.load %arg6[%c0_234, %c0_235] : memref<128x512xbf16, #tpu.memory_space<vmem>>, vector<128x512xbf16>
    %cst_236 = arith.constant dense<0.000000e+00> : vector<8x512xf32>
    %596 = tpu.matmul %594, %595, %cst_236 {dimension_numbers = #tpu.dot_dimension_numbers<[1], [0], [0], [1], [0, 0, 1, 1], [], []>} : vector<8x128xbf16>, vector<128x512xbf16>, vector<8x512xf32> -> vector<8x512xf32>
    %597 = arith.addf %593, %596 : vector<8x512xf32>
    %598 = vector.extract_strided_slice %597 {offsets = [0, 0], sizes = [8, 128], strides = [1, 1]} : vector<8x512xf32> to vector<8x128xf32>
    %cst_237 = arith.constant 5.000000e-01 : f32
    %599 = vector.broadcast %cst_237 : f32 to vector<8x128xf32>
    %600 = arith.mulf %599, %598 : vector<8x128xf32>
    %601 = math.tanh %600 : vector<8x128xf32>
    %cst_238 = arith.constant 5.000000e-01 : f32
    %602 = vector.broadcast %cst_238 : f32 to vector<8x128xf32>
    %603 = arith.mulf %602, %601 : vector<8x128xf32>
    %cst_239 = arith.constant 5.000000e-01 : f32
    %604 = vector.broadcast %cst_239 : f32 to vector<8x128xf32>
    %605 = arith.addf %603, %604 : vector<8x128xf32>
    %606 = vector.extract_strided_slice %597 {offsets = [0, 128], sizes = [8, 128], strides = [1, 1]} : vector<8x512xf32> to vector<8x128xf32>
    %cst_240 = arith.constant 5.000000e-01 : f32
    %607 = vector.broadcast %cst_240 : f32 to vector<8x128xf32>
    %608 = arith.mulf %607, %606 : vector<8x128xf32>
    %609 = math.tanh %608 : vector<8x128xf32>
    %cst_241 = arith.constant 5.000000e-01 : f32
    %610 = vector.broadcast %cst_241 : f32 to vector<8x128xf32>
    %611 = arith.mulf %610, %609 : vector<8x128xf32>
    %cst_242 = arith.constant 5.000000e-01 : f32
    %612 = vector.broadcast %cst_242 : f32 to vector<8x128xf32>
    %613 = arith.addf %611, %612 : vector<8x128xf32>
    %614 = vector.extract_strided_slice %597 {offsets = [0, 256], sizes = [8, 128], strides = [1, 1]} : vector<8x512xf32> to vector<8x128xf32>
    %615 = math.tanh %614 : vector<8x128xf32>
    %616 = vector.extract_strided_slice %597 {offsets = [0, 384], sizes = [8, 128], strides = [1, 1]} : vector<8x512xf32> to vector<8x128xf32>
    %cst_243 = arith.constant 5.000000e-01 : f32
    %617 = vector.broadcast %cst_243 : f32 to vector<8x128xf32>
    %618 = arith.mulf %617, %616 : vector<8x128xf32>
    %619 = math.tanh %618 : vector<8x128xf32>
    %cst_244 = arith.constant 5.000000e-01 : f32
    %620 = vector.broadcast %cst_244 : f32 to vector<8x128xf32>
    %621 = arith.mulf %620, %619 : vector<8x128xf32>
    %cst_245 = arith.constant 5.000000e-01 : f32
    %622 = vector.broadcast %cst_245 : f32 to vector<8x128xf32>
    %623 = arith.addf %621, %622 : vector<8x128xf32>
    %624 = arith.mulf %613, %587 : vector<8x128xf32>
    %625 = arith.mulf %605, %615 : vector<8x128xf32>
    %626 = arith.addf %624, %625 : vector<8x128xf32>
    %627 = math.tanh %626 : vector<8x128xf32>
    %628 = arith.mulf %623, %627 : vector<8x128xf32>
    %c7_i32_246 = arith.constant 7 : i32
    %c8_i32_247 = arith.constant 8 : i32
    %629 = arith.muli %c7_i32_246, %c8_i32_247 : i32
    %630 = tpu.assume_multiple %629, 8 : i32
    %631 = arith.index_cast %630 : i32 to index
    %c0_248 = arith.constant 0 : index
    %632 = vector.load %arg12[%631, %c0_248] : memref<64x512xf32, #tpu.memory_space<vmem>>, vector<8x512xf32>
    %633 = arith.truncf %628 : vector<8x128xf32> to vector<8x128xbf16>
    %c0_249 = arith.constant 0 : index
    %c0_250 = arith.constant 0 : index
    %634 = vector.load %arg6[%c0_249, %c0_250] : memref<128x512xbf16, #tpu.memory_space<vmem>>, vector<128x512xbf16>
    %cst_251 = arith.constant dense<0.000000e+00> : vector<8x512xf32>
    %635 = tpu.matmul %633, %634, %cst_251 {dimension_numbers = #tpu.dot_dimension_numbers<[1], [0], [0], [1], [0, 0, 1, 1], [], []>} : vector<8x128xbf16>, vector<128x512xbf16>, vector<8x512xf32> -> vector<8x512xf32>
    %636 = arith.addf %632, %635 : vector<8x512xf32>
    %637 = vector.extract_strided_slice %636 {offsets = [0, 0], sizes = [8, 128], strides = [1, 1]} : vector<8x512xf32> to vector<8x128xf32>
    %cst_252 = arith.constant 5.000000e-01 : f32
    %638 = vector.broadcast %cst_252 : f32 to vector<8x128xf32>
    %639 = arith.mulf %638, %637 : vector<8x128xf32>
    %640 = math.tanh %639 : vector<8x128xf32>
    %cst_253 = arith.constant 5.000000e-01 : f32
    %641 = vector.broadcast %cst_253 : f32 to vector<8x128xf32>
    %642 = arith.mulf %641, %640 : vector<8x128xf32>
    %cst_254 = arith.constant 5.000000e-01 : f32
    %643 = vector.broadcast %cst_254 : f32 to vector<8x128xf32>
    %644 = arith.addf %642, %643 : vector<8x128xf32>
    %645 = vector.extract_strided_slice %636 {offsets = [0, 128], sizes = [8, 128], strides = [1, 1]} : vector<8x512xf32> to vector<8x128xf32>
    %cst_255 = arith.constant 5.000000e-01 : f32
    %646 = vector.broadcast %cst_255 : f32 to vector<8x128xf32>
    %647 = arith.mulf %646, %645 : vector<8x128xf32>
    %648 = math.tanh %647 : vector<8x128xf32>
    %cst_256 = arith.constant 5.000000e-01 : f32
    %649 = vector.broadcast %cst_256 : f32 to vector<8x128xf32>
    %650 = arith.mulf %649, %648 : vector<8x128xf32>
    %cst_257 = arith.constant 5.000000e-01 : f32
    %651 = vector.broadcast %cst_257 : f32 to vector<8x128xf32>
    %652 = arith.addf %650, %651 : vector<8x128xf32>
    %653 = vector.extract_strided_slice %636 {offsets = [0, 256], sizes = [8, 128], strides = [1, 1]} : vector<8x512xf32> to vector<8x128xf32>
    %654 = math.tanh %653 : vector<8x128xf32>
    %655 = vector.extract_strided_slice %636 {offsets = [0, 384], sizes = [8, 128], strides = [1, 1]} : vector<8x512xf32> to vector<8x128xf32>
    %cst_258 = arith.constant 5.000000e-01 : f32
    %656 = vector.broadcast %cst_258 : f32 to vector<8x128xf32>
    %657 = arith.mulf %656, %655 : vector<8x128xf32>
    %658 = math.tanh %657 : vector<8x128xf32>
    %cst_259 = arith.constant 5.000000e-01 : f32
    %659 = vector.broadcast %cst_259 : f32 to vector<8x128xf32>
    %660 = arith.mulf %659, %658 : vector<8x128xf32>
    %cst_260 = arith.constant 5.000000e-01 : f32
    %661 = vector.broadcast %cst_260 : f32 to vector<8x128xf32>
    %662 = arith.addf %660, %661 : vector<8x128xf32>
    %663 = arith.mulf %652, %626 : vector<8x128xf32>
    %664 = arith.mulf %644, %654 : vector<8x128xf32>
    %665 = arith.addf %663, %664 : vector<8x128xf32>
    %666 = math.tanh %665 : vector<8x128xf32>
    %667 = arith.mulf %662, %666 : vector<8x128xf32>
    %c8_i32_261 = arith.constant 8 : i32
    %668 = arith.truncf %667 : vector<8x128xf32> to vector<8x128xbf16>
    %c0_262 = arith.constant 0 : index
    %c0_263 = arith.constant 0 : index
    %669 = vector.load %arg8[%c0_262, %c0_263] : memref<128x128xbf16, #tpu.memory_space<vmem>>, vector<128x128xbf16>
    %cst_264 = arith.constant dense<0.000000e+00> : vector<8x128xf32>
    %670 = tpu.matmul %668, %669, %cst_264 {dimension_numbers = #tpu.dot_dimension_numbers<[1], [0], [0], [1], [0, 0, 1, 1], [], []>} : vector<8x128xbf16>, vector<128x128xbf16>, vector<8x128xf32> -> vector<8x128xf32>
    %c0_265 = arith.constant 0 : index
    %c0_266 = arith.constant 0 : index
    %671 = vector.load %arg9[%c0_265, %c0_266] : memref<1x128xf32, #tpu.memory_space<vmem>>, vector<1x128xf32>
    %672 = vector.broadcast %671 : vector<1x128xf32> to vector<8x128xf32>
    %673 = arith.addf %670, %672 : vector<8x128xf32>
    %c0_267 = arith.constant 0 : index
    %c0_268 = arith.constant 0 : index
    %674 = vector.load %arg10[%c0_267, %c0_268] : memref<8x128xf32, #tpu.memory_space<vmem>>, vector<8x128xf32>
    tpu.vector_store %arg10[%c0_267, %c0_268], %673 {strides = array<i32>} : memref<8x128xf32, #tpu.memory_space<vmem>>, vector<8x128xf32>,
    return
  }
  func.func @transform_0(%arg0: i32) -> (i32, i32, i32) {
    %c0_i32 = arith.constant 0 : i32
    %c0_i32_0 = arith.constant 0 : i32
    %c0_i32_1 = arith.constant 0 : i32
    return %c0_i32, %arg0, %c0_i32_0 : i32, i32, i32
  }
  func.func @transform_1(%arg0: i32) -> (i32, i32) {
    %c0_i32 = arith.constant 0 : i32
    %c0_i32_0 = arith.constant 0 : i32
    %c0_i32_1 = arith.constant 0 : i32
    return %c0_i32, %c0_i32_0 : i32, i32
  }
  func.func @transform_2(%arg0: i32) -> (i32, i32) {
    %c0_i32 = arith.constant 0 : i32
    %c0_i32_0 = arith.constant 0 : i32
    %c0_i32_1 = arith.constant 0 : i32
    return %c0_i32, %c0_i32_0 : i32, i32
  }
  func.func @transform_3(%arg0: i32) -> (i32, i32) {
    %c0_i32 = arith.constant 0 : i32
    %c0_i32_0 = arith.constant 0 : i32
    %c0_i32_1 = arith.constant 0 : i32
    return %c0_i32, %c0_i32_0 : i32, i32
  }
  func.func @transform_4(%arg0: i32) -> (i32, i32) {
    %c0_i32 = arith.constant 0 : i32
    %c0_i32_0 = arith.constant 0 : i32
    %c0_i32_1 = arith.constant 0 : i32
    return %c0_i32, %c0_i32_0 : i32, i32
  }
  func.func @transform_5(%arg0: i32) -> (i32, i32) {
    %c0_i32 = arith.constant 0 : i32
    %c0_i32_0 = arith.constant 0 : i32
    %c0_i32_1 = arith.constant 0 : i32
    return %c0_i32, %c0_i32_0 : i32, i32
  }
  func.func @transform_6(%arg0: i32) -> (i32, i32) {
    %c0_i32 = arith.constant 0 : i32
    %c0_i32_0 = arith.constant 0 : i32
    %c0_i32_1 = arith.constant 0 : i32
    return %c0_i32, %c0_i32_0 : i32, i32
  }
  func.func @transform_7(%arg0: i32) -> (i32, i32) {
    %c0_i32 = arith.constant 0 : i32
    %c0_i32_0 = arith.constant 0 : i32
    %c0_i32_1 = arith.constant 0 : i32
    return %c0_i32, %c0_i32_0 : i32, i32
  }
  func.func @transform_8(%arg0: i32) -> (i32, i32) {
    %c0_i32 = arith.constant 0 : i32
    %c0_i32_0 = arith.constant 0 : i32
    %c0_i32_1 = arith.constant 0 : i32
    return %c0_i32, %c0_i32_0 : i32, i32
  }
  func.func @transform_9(%arg0: i32) -> (i32, i32) {
    %c0_i32 = arith.constant 0 : i32
    %c0_i32_0 = arith.constant 0 : i32
    return %arg0, %c0_i32 : i32, i32
  }
}

</mosaic_0001>

<bundles_post_ra>
// kernel: lip_reading_lstm_forward.1
= control target key start
LH: loop header
LB: loop body
LE: loop exit
PB: predicated region body
PF: predicated region fallthrough
CT: control target
= control target key end

     0   :  { %14 = vsyncpa [#allocation5], 0  ;;  %s6474_s0 = inlined_call_operand.vmem [shape: f32[8,8,16], index: 0, kind: input, shape index: {}]   ;;  %s6475_s1 = inlined_call_operand.vmem [shape: bf16[16,512], index: 1, kind: input, shape index: {}]   ;;  %s6476_s2 = inlined_call_operand.hbm [shape: bf16[128,512], index: 2, kind: input, shape index: {}]   ;;  %s6477_s3 = inlined_call_operand.vmem [shape: f32[1,512], index: 3, kind: input, shape index: {}]   ;;  %s6478_s4 = inlined_call_operand.hbm [shape: bf16[128,512], index: 4, kind: input, shape index: {}]   ;;  %s6479_s5 = inlined_call_operand.hbm [shape: bf16[128,512], index: 5, kind: input, shape index: {}]   ;;  %s6480_s6 = inlined_call_operand.vmem [shape: f32[1,512], index: 6, kind: input, shape index: {}]   ;;  %s6481_s7 = inlined_call_operand.vmem [shape: bf16[128,128], index: 7, kind: input, shape index: {}]   ;;  %s6482_s8 = inlined_call_operand.vmem [shape: f32[1,128], index: 8, kind: input, shape index: {}]   ;;  %s6483_s9 = inlined_call_operand.vmem [shape: f32[8,128], index: 9, kind: output, shape index: {}]  }
   0x1   :  { %15 = vsyncpa [#allocation7], 0  ;;  %s5231_s30 = smov [#allocation6]   ;;  %s5232_s11 = smov [#allocation4]  }
   0x2   :  { %s39_s10 = sshll.u32 %s5231_s30, 4  ;;  %s25_s12 = sshll.u32 %s5232_s11, 4  ;;  %s40_s10 = int_to_ptr.vmem [resolvable:$true] %s39_s10  ;;  %s26_s12 = int_to_ptr.vmem [resolvable:$true] %s25_s12 }
   0x3   :  { %s5175_s13 = scalar_lea.vmem %s40_s10, 4096  ;;  %p5180_p1 = scmp.lt.s32.totalorder %s40_s10, %s40_s10 }
   0x4   :  { %p5176_p0 = scmp.ne.s32.totalorder %s40_s10, %s5175_s13  ;;  %p5181_p2 = scmp.lt.s32.totalorder %s5175_s13, %s5175_s13 }
   0x6   :  { %p5182_p3 = por %p5181_p2, %p5180_p1 }
   0x8   :  { %p5183_p4 = pnand %p5182_p3, %p5176_p0 }
   0xa   :  { %5186 = shalt.err (!%p5183_p4)
}
   0xb   :  { %s5233_s14 = smov 256   ;;  %s5234_s15 = smov 16  }
   0xc   :  { %45 = dma.hbm_to_vmem [thread:$0]  %s6478_s4, 4096, %s40_s10, [#allocation7], %s5233_s14, %s5233_s14, %s5234_s15  }
   0xd   :  { %s5195_s18 = scalar_lea.vmem %s26_s12, 4096  ;;  %p5200_p6 = scmp.lt.s32.totalorder %s26_s12, %s26_s12 }
   0xe   :  { %p5196_p5 = scmp.ne.s32.totalorder %s26_s12, %s5195_s18  ;;  %p5201_p7 = scmp.lt.s32.totalorder %s5195_s18, %s5195_s18 }
  0x10   :  { %p5202_p8 = por %p5201_p7, %p5200_p6 }
  0x12   :  { %p5203_p9 = pnand %p5202_p8, %p5196_p5 }
  0x14   :  { %5206 = shalt.err (!%p5203_p9)
}
  0x15   :  { %31 = dma.hbm_to_vmem [thread:$0]  %s6476_s2, 4096, %s26_s12, [#allocation5], %s5233_s14, %s5233_s14, %s5234_s15  }
  0x16   :  { %s5235_s21 = smov [#allocation8]  }
  0x17   :  { %s51_s22 = sshll.u32 %s5235_s21, 4  ;;  %s52_s22 = int_to_ptr.vmem [resolvable:$true] %s51_s22 }
  0x18   :  { %s5215_s23 = scalar_lea.vmem %s52_s22, 4096  ;;  %p5220_p11 = scmp.lt.s32.totalorder %s52_s22, %s52_s22 }
  0x19   :  { %p5216_p10 = scmp.ne.s32.totalorder %s52_s22, %s5215_s23  ;;  %p5221_p12 = scmp.lt.s32.totalorder %s5215_s23, %s5215_s23 }
  0x1b   :  { %p5222_p13 = por %p5221_p12, %p5220_p11 }
  0x1d   :  { %p5223_p0 = pnand %p5222_p13, %p5216_p10 }
  0x1f   :  { %5226 = shalt.err (!%p5223_p0)
}
  0x20   :  { %57 = dma.hbm_to_vmem [thread:$0]  %s6479_s5, 4096, %s52_s22, [#allocation7], %s5233_s14, %s5233_s14, %s5234_s15  }
  0x21   :  { %5227 = dma.done.wait [#allocation5], 4096  }
  0x22   :  { %5228 = vsyncadd [#allocation5], 4294963200 }
  0x23   :  { %5229 = dma.done.wait [#allocation7], 8192  }
  0x24   :  { %5230 = vsyncadd [#allocation7], 4294959104  ;;  %v6488_v0 = vmov 0   ;;  %v4765_v1 = vld [vmem:[%s6475_s1 + $0x4] ss:$16 sps:$4 sm:$0xff]   ;;  %v75_v6 = vld [vmem:[%s6474_s0 + $0x8] sm:$0xff]  ;;  %v92_v49 = vlaneseq }
  0x25   :  { %177 = vmatprep.mubr.bf16.mxu0 %v6488_v0  ;;  %250 = vmatprep.mubr.bf16.mxu1 %v6488_v0  ;;  %v4767_v2 = vld [vmem:[%s6475_s1 + $0xc] ss:$16 sps:$4 sm:$0xff]   ;;  %v4769_v3 = vld [vmem:[%s6475_s1] ss:$16 sps:$4 sm:$0xff]   ;;  %v4770_v4 = vld [vmem:[%s6475_s1 + $0x8] ss:$16 sps:$4 sm:$0xff]  }
  0x26   :  { %159 = vmatprep.subr.bf16.mxu0 %v4765_v1  ;;  %v74_v5 = vld [vmem:[%s6474_s0] sm:$0xff]  ;;  %232 = vmatprep.subr.bf16.mxu1 %v4767_v2  ;;  %vm132_vm0 = vcmask 130048   ;;  %v5322_v10 = vld [vmem:[#allocation4 + $0xe8] ss:$16 sps:$4 sm:$0xff]   ;;  %v5324_v11 = vld [vmem:[#allocation4 + $0xec] ss:$16 sps:$4 sm:$0xff]  }
  0x27   :  { %160 = vmatpush1.bf16.msra.mxu0 %v4769_v3  ;;  %233 = vmatpush1.bf16.msra.mxu1 %v4770_v4  ;;  %v82_v7 = vpack.c.bf16 %v75_v6, %v74_v5  ;;  %v5318_v8 = vld [vmem:[#allocation4 + $0xe0] ss:$16 sps:$4 sm:$0xff]   ;;  %v5320_v9 = vld [vmem:[#allocation4 + $0xe4] ss:$16 sps:$4 sm:$0xff]   ;;  %v5335_v14 = vld [vmem:[#allocation4 + $0xc8] ss:$16 sps:$4 sm:$0xff]  }
  0x28   :  { %522 = vmatprep.subr.bf16.mxu0 %v5320_v9  ;;  %v5327_v12 = vld [vmem:[#allocation4 + $0xc0] ss:$16 sps:$4 sm:$0xff]   ;;  %v5331_v13 = vld [vmem:[#allocation4 + $0xc4] ss:$16 sps:$4 sm:$0xff]   ;;  %563 = vmatprep.subr.bf16.mxu1 %v5324_v11  ;;  %v5337_v15 = vld [vmem:[#allocation4 + $0xcc] ss:$16 sps:$4 sm:$0xff]  }
  0x29   :  { %v76_v16 = vld [vmem:[%s6474_s0 + $0x10] sm:$0xff]  ;;  %v77_v17 = vld [vmem:[%s6474_s0 + $0x18] sm:$0xff]  ;;  %v78_v26 = vld [vmem:[%s6474_s0 + $0x20] sm:$0xff]  ;;  %v5486_v50 = vshrl.u32 %v92_v49, 7  ;;  %vm5238_vm1 = vmmov 0  }
  0x2a   :  { %4387 = vmatmul.mubr.msk.bf16.vlgmr.msra.gmra.mxu0 %vm132_vm0, %v82_v7  ;;  %4391 = vmatmul.mubr.msk.bf16.vlgmr.msra.gmra.mxu1 %vm132_vm0, %v82_v7  ;;  %v5349_v18 = vld [vmem:[#allocation4 + $0xa4] ss:$16 sps:$4 sm:$0xff]   ;;  %v83_v19 = vpack.c.bf16 %v77_v17, %v76_v16  ;;  %v5352_v20 = vld [vmem:[#allocation4 + $0xa0] ss:$16 sps:$4 sm:$0xff]   ;;  %v5354_v21 = vld [vmem:[#allocation4 + $0xac] ss:$16 sps:$4 sm:$0xff]  }
  0x2b   :  { %523 = vmatpush1.bf16.msra.mxu0 %v5318_v8  ;;  %564 = vmatpush1.bf16.msra.mxu1 %v5322_v10  ;;  %v5357_v22 = vld [vmem:[#allocation4 + $0xa8] ss:$16 sps:$4 sm:$0xff]   ;;  %v5361_v23 = vld [vmem:[#allocation4 + $0x84] ss:$16 sps:$4 sm:$0xff]   ;;  %v5364_v24 = vld [vmem:[#allocation4 + $0x8c] ss:$16 sps:$4 sm:$0xff]  }
  0x2c   :  { %524 = vmatprep.subr.bf16.mxu0 %v5331_v13  ;;  %565 = vmatprep.subr.bf16.mxu1 %v5337_v15  ;;  %v5368_v25 = vld [vmem:[#allocation4 + $0x80] ss:$16 sps:$4 sm:$0xff]   ;;  %v79_v27 = vld [vmem:[%s6474_s0 + $0x28] sm:$0xff]  ;;  %v5382_v29 = vld [vmem:[#allocation4 + $0x64] ss:$16 sps:$4 sm:$0xff]   ;;  %6492 = vst [vmem:[#allocation11_spill] sm:$0xff] %v5486_v50 }
  0x2d   :  { %187 = vmatprep.mubr.bf16.mxu0 %v6488_v0  ;;  %260 = vmatprep.mubr.bf16.mxu1 %v6488_v0  ;;  %v5380_v28 = vld [vmem:[#allocation4 + $0x88] ss:$16 sps:$4 sm:$0xff]   ;;  %v5386_v30 = vld [vmem:[#allocation4 + $0x6c] ss:$16 sps:$4 sm:$0xff]   ;;  %v84_v31 = vpack.c.bf16 %v79_v27, %v78_v26  ;;  %v5389_v32 = vld [vmem:[#allocation4 + $0x60] ss:$16 sps:$4 sm:$0xff]  }
  0x2e   :  { %v5391_v33 = vld [vmem:[#allocation4 + $0x68] ss:$16 sps:$4 sm:$0xff]   ;;  %v5395_v34 = vld [vmem:[#allocation4 + $0x44] ss:$16 sps:$4 sm:$0xff]   ;;  %v5398_v35 = vld [vmem:[#allocation4 + $0x40] ss:$16 sps:$4 sm:$0xff]  }
  0x2f   :  { %525 = vmatpush1.bf16.msra.mxu0 %v5327_v12  ;;  %566 = vmatpush1.bf16.msra.mxu1 %v5335_v14  ;;  %v5400_v36 = vld [vmem:[#allocation4 + $0x4c] ss:$16 sps:$4 sm:$0xff]   ;;  %v5404_v37 = vld [vmem:[#allocation4 + $0x48] ss:$16 sps:$4 sm:$0xff]   ;;  %v80_v38 = vld [vmem:[%s6474_s0 + $0x30] sm:$0xff]  ;;  %v6485_v51 = vsub.s32 2, %v5486_v50 }
  0x30   :  { %526 = vmatprep.subr.bf16.mxu0 %v5349_v18  ;;  %567 = vmatprep.subr.bf16.mxu1 %v5354_v21  ;;  %v81_v39 = vld [vmem:[%s6474_s0 + $0x38] sm:$0xff]  ;;  %v5416_v40 = vld [vmem:[#allocation4 + $0x24] ss:$16 sps:$4 sm:$0xff]   ;;  %v5420_v41 = vld [vmem:[#allocation4 + $0x20] ss:$16 sps:$4 sm:$0xff]   ;;  %v6487_v52 = vsub.s32 0, %v5486_v50 }
  0x31   :  { %v5422_v42 = vld [vmem:[#allocation4 + $0x2c] ss:$16 sps:$4 sm:$0xff]   ;;  %v85_v43 = vpack.c.bf16 %v81_v39, %v80_v38  ;;  %v5424_v44 = vld [vmem:[#allocation4 + $0x28] ss:$16 sps:$4 sm:$0xff]   ;;  %v5426_v45 = vld [vmem:[#allocation4 + $0x4] ss:$16 sps:$4 sm:$0xff]  }
  0x32   :  { %4388 = vmatmul.mubr.msk.bf16.gmra.mxu0 %vm132_vm0, %v83_v19  ;;  %4392 = vmatmul.mubr.msk.bf16.gmra.mxu1 %vm132_vm0, %v83_v19  ;;  %v5429_v46 = vld [vmem:[#allocation4 + $0xc] ss:$16 sps:$4 sm:$0xff]   ;;  %v5434_v47 = vld [vmem:[#allocation4] ss:$16 sps:$4 sm:$0xff]   ;;  %v5438_v48 = vld [vmem:[#allocation4 + $0x8] ss:$16 sps:$4 sm:$0xff]  }
  0x33   :  { %527 = vmatpush1.bf16.msra.mxu0 %v5352_v20  ;;  %197 = vmatprep.mubr.bf16.mxu0 %v6488_v0  ;;  %v6484_v53 = vsub.s32 3, %v5486_v50  ;;  %v90_v54 = vld [vmem:[%s6477_s3] sm:$0xf]  ;;  %v6486_v58 = vsub.s32 1, %v5486_v50 }
  0x34   :  { %568 = vmatpush1.bf16.msra.mxu1 %v5357_v22  ;;  %528 = vmatprep.subr.bf16.mxu0 %v5361_v23  ;;  %v5500_v57 = vrot.slane %v90_v54, %v6485_v51  ;;  %v95_v61 = vrot.slane %v90_v54, %v6487_v52 }
  0x35   :  { %569 = vmatprep.subr.bf16.mxu1 %v5364_v24  ;;  %270 = vmatprep.mubr.bf16.mxu1 %v6488_v0  ;;  %v5511_v62 = vrot.slane %v90_v54, %v6484_v53  ;;  %v99_v2 = vrot.slane %v90_v54, %v6486_v58 }
  0x37   :  { %529 = vmatpush1.bf16.msra.mxu0 %v5368_v25 }
  0x38   :  { %570 = vmatpush1.bf16.msra.mxu1 %v5380_v28  ;;  %530 = vmatprep.subr.bf16.mxu0 %v5382_v29 }
  0x39   :  { %571 = vmatprep.subr.bf16.mxu1 %v5386_v30 }
  0x3a   :  { %4389 = vmatmul.mubr.msk.bf16.gmra.mxu0 %vm132_vm0, %v84_v31  ;;  %4393 = vmatmul.mubr.msk.bf16.gmra.mxu1 %vm132_vm0, %v84_v31 }
  0x3b   :  { %531 = vmatpush1.bf16.msra.mxu0 %v5389_v32  ;;  %207 = vmatprep.mubr.bf16.mxu0 %v6488_v0 }
  0x3c   :  { %572 = vmatpush1.bf16.msra.mxu1 %v5391_v33  ;;  %532 = vmatprep.subr.bf16.mxu0 %v5395_v34 }
  0x3d   :  { %573 = vmatprep.subr.bf16.mxu1 %v5400_v36  ;;  %280 = vmatprep.mubr.bf16.mxu1 %v6488_v0 }
  0x3f   :  { %533 = vmatpush1.bf16.msra.mxu0 %v5398_v35 }
  0x40   :  { %574 = vmatpush1.bf16.msra.mxu1 %v5404_v37  ;;  %534 = vmatprep.subr.bf16.mxu0 %v5416_v40 }
  0x41   :  { %575 = vmatprep.subr.bf16.mxu1 %v5422_v42 }
  0x42   :  { %4390 = vmatmul.mubr.msk.bf16.gmra.mxu0 %vm132_vm0, %v85_v43  ;;  %4394 = vmatmul.mubr.msk.bf16.gmra.mxu1 %vm132_vm0, %v85_v43 }
  0x43   :  { %535 = vmatpush1.bf16.msra.mxu0 %v5420_v41  ;;  %554 = vmatprep.mubr.bf16.mxu0 %v6488_v0 }
  0x44   :  { %576 = vmatpush1.bf16.msra.mxu1 %v5424_v44  ;;  %536 = vmatprep.subr.bf16.mxu0 %v5426_v45 }
  0x45   :  { %577 = vmatprep.subr.bf16.mxu1 %v5429_v46  ;;  %595 = vmatprep.mubr.bf16.mxu1 %v6488_v0 }
  0x47   :  { %537 = vmatpush1.bf16.msra.mxu0 %v5434_v47 }
  0x48   :  { %578 = vmatpush1.bf16.msra.mxu1 %v5438_v48  ;;  %827 = vmatprep.subr.bf16.mxu0 %v5320_v9 }
  0x49   :  { %868 = vmatprep.subr.bf16.mxu1 %v5324_v11 }
  0x4a   :  { %555 = vmatmul.mubr.bf16.vlgmr.msra.gmra.mxu0 %v6488_v0 }
  0x4b   :  { %596 = vmatmul.mubr.bf16.vlgmr.msra.gmra.mxu1 %v6488_v0  ;;  %828 = vmatpush1.bf16.msra.mxu0 %v5318_v8 }
  0x4c   :  { %869 = vmatpush1.bf16.msra.mxu1 %v5322_v10  ;;  %829 = vmatprep.subr.bf16.mxu0 %v5331_v13 }
  0x4d   :  { %870 = vmatprep.subr.bf16.mxu1 %v5337_v15  ;;  %859 = vmatprep.mubr.bf16.mxu0 %v6488_v0 }
  0x4e   :  { %900 = vmatprep.mubr.bf16.mxu1 %v6488_v0 }
  0x4f   :  { %830 = vmatpush1.bf16.msra.mxu0 %v5327_v12 }
  0x50   :  { %871 = vmatpush1.bf16.msra.mxu1 %v5335_v14  ;;  %831 = vmatprep.subr.bf16.mxu0 %v5349_v18 }
  0x51   :  { %872 = vmatprep.subr.bf16.mxu1 %v5354_v21 }
  0x53   :  { %832 = vmatpush1.bf16.msra.mxu0 %v5352_v20 }
  0x54   :  { %873 = vmatpush1.bf16.msra.mxu1 %v5357_v22  ;;  %833 = vmatprep.subr.bf16.mxu0 %v5361_v23 }
  0x55   :  { %874 = vmatprep.subr.bf16.mxu1 %v5364_v24 }
  0x57   :  { %834 = vmatpush1.bf16.msra.mxu0 %v5368_v25 }
  0x58   :  { %875 = vmatpush1.bf16.msra.mxu1 %v5380_v28  ;;  %835 = vmatprep.subr.bf16.mxu0 %v5382_v29 }
  0x59   :  { %876 = vmatprep.subr.bf16.mxu1 %v5386_v30 }
  0x5b   :  { %836 = vmatpush1.bf16.msra.mxu0 %v5389_v32 }
  0x5c   :  { %877 = vmatpush1.bf16.msra.mxu1 %v5391_v33  ;;  %837 = vmatprep.subr.bf16.mxu0 %v5395_v34 }
  0x5d   :  { %878 = vmatprep.subr.bf16.mxu1 %v5400_v36 }
  0x5f   :  { %838 = vmatpush1.bf16.msra.mxu0 %v5398_v35 }
  0x60   :  { %879 = vmatpush1.bf16.msra.mxu1 %v5404_v37  ;;  %839 = vmatprep.subr.bf16.mxu0 %v5416_v40 }
  0x61   :  { %880 = vmatprep.subr.bf16.mxu1 %v5422_v42 }
  0x63   :  { %840 = vmatpush1.bf16.msra.mxu0 %v5420_v41 }
  0x64   :  { %881 = vmatpush1.bf16.msra.mxu1 %v5424_v44  ;;  %841 = vmatprep.subr.bf16.mxu0 %v5426_v45 }
  0x65   :  { %882 = vmatprep.subr.bf16.mxu1 %v5429_v46 }
  0x67   :  { %842 = vmatpush1.bf16.msra.mxu0 %v5434_v47 }
  0x68   :  { %883 = vmatpush1.bf16.msra.mxu1 %v5438_v48  ;;  %1133 = vmatprep.subr.bf16.mxu0 %v5320_v9 }
  0x69   :  { %1174 = vmatprep.subr.bf16.mxu1 %v5324_v11 }
  0xea   :  { %v5494_v55 = vpop.f32.mrf.mxu0  ;;  %v5496_v56 = vpop.f32.mrf.mxu1 }
  0xec   :  { %v5503_v59 = vpop.f32.mrf.mxu0  ;;  %v5505_v60 = vpop.f32.mrf.mxu1 }
  0xee   :  { %v183_v63 = vpop.f32.mrf.mxu0  ;;  %v256_v1 = vpop.f32.mrf.mxu1 }
  0xef   :  { %v5515_v3 = vadd.f32 %v183_v63, %v95_v61  ;;  %v5518_v4 = vadd.f32 %v256_v1, %v5500_v57 }
  0xf0   :  { %v185_v5 = vpop.f32.mrf.mxu0  ;;  %v258_v6 = vpop.f32.mrf.mxu1 }
  0xf1   :  { %v5520_v7 = vadd.f32 %v185_v5, %v99_v2  ;;  %v5523_v16 = vadd.f32 %v258_v6, %v5511_v62 }
  0xf2   :  { %v189_v17 = vpop.f32.mrf.mxu0  ;;  %v262_v19 = vpop.f32.mrf.mxu1 }
  0xf3   :  { %v5525_v26 = vadd.f32 %v189_v17, %v95_v61  ;;  %v5528_v27 = vadd.f32 %v262_v19, %v5500_v57 }
  0xf4   :  { %v191_v31 = vpop.f32.mrf.mxu0  ;;  %v264_v38 = vpop.f32.mrf.mxu1 }
  0xf5   :  { %v5530_v39 = vadd.f32 %v191_v31, %v99_v2  ;;  %v5533_v43 = vadd.f32 %v264_v38, %v5511_v62 }
  0xf6   :  { %v193_v49 = vpop.f32.mrf.mxu0  ;;  %v266_v54 = vpop.f32.mrf.mxu1 }
  0xf7   :  { %v5535_v63 = vadd.f32 %v193_v49, %v95_v61  ;;  %v5538_v1 = vadd.f32 %v266_v54, %v5500_v57 }
  0xf8   :  { %v195_v5 = vpop.f32.mrf.mxu0  ;;  %v268_v6 = vpop.f32.mrf.mxu1 }
  0xf9   :  { %6493 = vst [vmem:[#allocation12_spill] sm:$0xff] %v5538_v1  ;;  %v5540_v17 = vadd.f32 %v195_v5, %v99_v2  ;;  %v5543_v19 = vadd.f32 %v268_v6, %v5511_v62 }
  0xfa   :  { %v199_v53 = vpop.f32.mrf.mxu0  ;;  %v272_v31 = vpop.f32.mrf.mxu1 }
  0xfb   :  { %6494 = vst [vmem:[#allocation13_spill] sm:$0xff] %v5540_v17  ;;  %6495 = vst [vmem:[#allocation14_spill] sm:$0xff] %v5543_v19  ;;  %v5545_v51 = vadd.f32 %v199_v53, %v95_v61  ;;  %v5548_v38 = vadd.f32 %v272_v31, %v5500_v57 }
  0xfc   :  { %v201_v58 = vpop.f32.mrf.mxu0  ;;  %v274_v49 = vpop.f32.mrf.mxu1 }
  0xfd   :  { %6496 = vst [vmem:[#allocation15_spill] sm:$0xff] %v5545_v51  ;;  %6497 = vst [vmem:[#allocation16_spill] sm:$0xff] %v5548_v38  ;;  %v5550_v52 = vadd.f32 %v201_v58, %v99_v2  ;;  %v5553_v54 = vadd.f32 %v274_v49, %v5511_v62 }
  0xfe   :  { %v203_v0 = vpop.f32.mrf.mxu0  ;;  %v276_v5 = vpop.f32.mrf.mxu1 }
  0xff   :  { %6498 = vst [vmem:[#allocation17_spill] sm:$0xff] %v5550_v52  ;;  %6499 = vst [vmem:[#allocation18_spill] sm:$0xff] %v5553_v54  ;;  %v5555_v50 = vadd.f32 %v203_v0, %v95_v61  ;;  %v5558_v6 = vadd.f32 %v276_v5, %v5500_v57 }
 0x100   :  { %v205_v19 = vpop.f32.mrf.mxu0  ;;  %v278_v53 = vpop.f32.mrf.mxu1 }
 0x101   :  { %6500 = vst [vmem:[#allocation19_spill] sm:$0xff] %v5555_v50  ;;  %6501 = vst [vmem:[#allocation20_spill] sm:$0xff] %v5558_v6  ;;  %v5560_v51 = vadd.f32 %v205_v19, %v99_v2  ;;  %v5563_v31 = vadd.f32 %v278_v53, %v5511_v62 }
 0x102   :  { %v209_v38 = vpop.f32.mrf.mxu0  ;;  %v282_v58 = vpop.f32.mrf.mxu1 }
 0x103   :  { %6502 = vst [vmem:[#allocation21_spill] sm:$0xff] %v5560_v51  ;;  %6503 = vst [vmem:[#allocation22_spill] sm:$0xff] %v5563_v31  ;;  %v5565_v52 = vadd.f32 %v209_v38, %v95_v61  ;;  %v5568_v49 = vadd.f32 %v282_v58, %v5500_v57 }
 0x104   :  { %v211_v54 = vpop.f32.mrf.mxu0  ;;  %v284_v0 = vpop.f32.mrf.mxu1 }
 0x105   :  { %6504 = vst [vmem:[#allocation23_spill] sm:$0xff] %v5565_v52  ;;  %6505 = vst [vmem:[#allocation24_spill] sm:$0xff] %v5568_v49  ;;  %v5570_v50 = vadd.f32 %v211_v54, %v99_v2  ;;  %v5573_v5 = vadd.f32 %v284_v0, %v5511_v62  ;;  %v180_v52 = vadd.f32 %v5494_v55, %v95_v61 }
 0x106   :  { %v213_v6 = vpop.f32.mrf.mxu0  ;;  %v286_v19 = vpop.f32.mrf.mxu1  ;;  %v182_v0 = vadd.f32 %v5503_v59, %v99_v2  ;;  %v255_v59 = vadd.f32 %v5505_v60, %v5511_v62 }
 0x107   :  { %6506 = vst [vmem:[#allocation25_spill] sm:$0xff] %v5570_v50  ;;  %6507 = vst [vmem:[#allocation26_spill] sm:$0xff] %v5573_v5  ;;  %v5575_v51 = vadd.f32 %v213_v6, %v95_v61  ;;  %v5578_v53 = vadd.f32 %v286_v19, %v5500_v57 }
 0x108   :  { %v215_v31 = vpop.f32.mrf.mxu0  ;;  %v288_v38 = vpop.f32.mrf.mxu1 }
 0x109   :  { %6508 = vst [vmem:[#allocation27_spill] sm:$0xff] %v5575_v51  ;;  %6509 = vst [vmem:[#allocation28_spill] sm:$0xff] %v5578_v53  ;;  %v5581_v58 = vadd.f32 %v215_v31, %v99_v2  ;;  %v5584_v49 = vadd.f32 %v288_v38, %v5511_v62  ;;  %v253_v53 = vadd.f32 %v5496_v56, %v5500_v57 }
 0x10a   :  { %v556_v54 = vpop.f32.mrf.mxu0 }
 0x10b   :  { %6510 = vst [vmem:[#allocation29_spill] sm:$0xff] %v5581_v58  ;;  %v604_v5 = vadd.f32 %v556_v54, %v180_v52  ;;  %v597_v50 = vpop.f32.mrf.mxu1 }
 0x10c   :  { %v558_v1 = vpop.f32.mrf.mxu0  ;;  %v606_v58 = vadd.f32 %v597_v50, %v253_v53 }
 0x10d   :  { %v608_v6 = vmul.f32 0.5, %v604_v5  ;;  %v605_v51 = vadd.f32 %v558_v1, %v182_v0  ;;  %v599_v17 = vpop.f32.mrf.mxu1 }
 0x10e   :  { %v560_v19 = vpop.f32.mrf.mxu0  ;;  %v607_v52 = vadd.f32 %v599_v17, %v255_v59 }
 0x10f   :  { %4975 = vtanh.f32 %v608_v6  ;;  %v612_v55 = vmul.f32 0.5, %v605_v51  ;;  %v601_v61 = vpop.f32.mrf.mxu1 }
 0x110   :  { %v561_v31 = vpop.f32.mrf.mxu0  ;;  %v617_v2 = vmul.f32 0.5, %v607_v52 }
 0x111   :  { %4977 = vtanh.f32 %v612_v55  ;;  %v602_v38 = vpop.f32.mrf.mxu1  ;;  %v6511_v55 = vmov 0  }
 0x112   :  { %4979 = vtanh.f32 %v606_v58 }
 0x113   :  { %4981 = vtanh.f32 %v617_v2 }
 0x11c   :  { %v4976_v5 = vpop.eup %4975 }
 0x11d   :  { %v610_v1 = vmul.f32 0.5, %v4976_v5 }
 0x11e   :  { %v4978_v54 = vpop.eup %4977 }
 0x11f   :  { %v611_v0 = vadd.f32 0.5, %v610_v1  ;;  %v614_v19 = vmul.f32 0.5, %v4978_v54  ;;  %v4980_v57 = vpop.eup %4979 }
 0x120   :  { %v4982_v50 = vpop.eup %4981 }
 0x121   :  { %v615_v56 = vadd.f32 0.5, %v614_v19  ;;  %v622_v6 = vmul.f32 %v4980_v57, %v611_v0  ;;  %v619_v53 = vmul.f32 0.5, %v4982_v50 }
 0x123   :  { %v621_v51 = vmul.f32 0.0, %v615_v56  ;;  %v620_v60 = vadd.f32 0.5, %v619_v53 }
 0x125   :  { %v5591_v61 = vadd.f32 %v622_v6, %v621_v51 }
 0x127   :  { %4983 = vtanh.f32 %v5591_v61 }
 0x134   :  { %v4984_v62 = vpop.eup %4983 }
 0x135   :  { %v625_v17 = vmul.f32 %v4984_v62, %v620_v60 }
 0x137   :  { %v626_v58 = vpack.c.bf16 %v625_v17, %v625_v17 }
 0x139   :  { %627 = vst [vmem:[#allocation2] sm:$0xf] %v626_v58  ;;  %860 = vmatmul.mubr.bf16.vlgmr.msra.gmra.mxu0 %v626_v58  ;;  %901 = vmatmul.mubr.bf16.vlgmr.msra.gmra.mxu1 %v626_v58 }
 0x13a   :  { %1134 = vmatpush1.bf16.msra.mxu0 %v5318_v8  ;;  %1175 = vmatpush1.bf16.msra.mxu1 %v5322_v10 }
 0x13b   :  { %1135 = vmatprep.subr.bf16.mxu0 %v5331_v13  ;;  %1176 = vmatprep.subr.bf16.mxu1 %v5337_v15 }
 0x13c   :  { %1165 = vmatprep.mubr.bf16.mxu0 %v6511_v55  ;;  %1206 = vmatprep.mubr.bf16.mxu1 %v6511_v55 }
 0x13e   :  { %1136 = vmatpush1.bf16.msra.mxu0 %v5327_v12  ;;  %1177 = vmatpush1.bf16.msra.mxu1 %v5335_v14 }
 0x13f   :  { %1137 = vmatprep.subr.bf16.mxu0 %v5349_v18  ;;  %1178 = vmatprep.subr.bf16.mxu1 %v5354_v21 }
 0x142   :  { %1138 = vmatpush1.bf16.msra.mxu0 %v5352_v20  ;;  %1179 = vmatpush1.bf16.msra.mxu1 %v5357_v22 }
 0x143   :  { %1139 = vmatprep.subr.bf16.mxu0 %v5361_v23  ;;  %1180 = vmatprep.subr.bf16.mxu1 %v5364_v24 }
 0x146   :  { %1140 = vmatpush1.bf16.msra.mxu0 %v5368_v25  ;;  %1181 = vmatpush1.bf16.msra.mxu1 %v5380_v28 }
 0x147   :  { %1141 = vmatprep.subr.bf16.mxu0 %v5382_v29  ;;  %1182 = vmatprep.subr.bf16.mxu1 %v5386_v30 }
 0x14a   :  { %1142 = vmatpush1.bf16.msra.mxu0 %v5389_v32  ;;  %1183 = vmatpush1.bf16.msra.mxu1 %v5391_v33 }
 0x14b   :  { %1143 = vmatprep.subr.bf16.mxu0 %v5395_v34  ;;  %1184 = vmatprep.subr.bf16.mxu1 %v5400_v36 }
 0x14e   :  { %1144 = vmatpush1.bf16.msra.mxu0 %v5398_v35  ;;  %1185 = vmatpush1.bf16.msra.mxu1 %v5404_v37 }
 0x14f   :  { %1145 = vmatprep.subr.bf16.mxu0 %v5416_v40  ;;  %1186 = vmatprep.subr.bf16.mxu1 %v5422_v42 }
 0x152   :  { %1146 = vmatpush1.bf16.msra.mxu0 %v5420_v41  ;;  %1187 = vmatpush1.bf16.msra.mxu1 %v5424_v44 }
 0x153   :  { %1147 = vmatprep.subr.bf16.mxu0 %v5426_v45  ;;  %1188 = vmatprep.subr.bf16.mxu1 %v5429_v46 }
 0x156   :  { %1148 = vmatpush1.bf16.msra.mxu0 %v5434_v47  ;;  %1189 = vmatpush1.bf16.msra.mxu1 %v5438_v48 }
 0x157   :  { %1439 = vmatprep.subr.bf16.mxu0 %v5320_v9  ;;  %1480 = vmatprep.subr.bf16.mxu1 %v5324_v11 }
 0x1f9   :  { %v861_v31 = vpop.f32.mrf.mxu0  ;;  %v902_v38 = vpop.f32.mrf.mxu1 }
 0x1fa   :  { %v909_v59 = vadd.f32 %v861_v31, %v5515_v3  ;;  %v911_v19 = vadd.f32 %v902_v38, %v5518_v4 }
 0x1fb   :  { %v863_v52 = vpop.f32.mrf.mxu0  ;;  %v904_v2 = vpop.f32.mrf.mxu1 }
 0x1fc   :  { %v913_v5 = vmul.f32 0.5, %v909_v59  ;;  %v910_v1 = vadd.f32 %v863_v52, %v5520_v7  ;;  %v912_v9 = vadd.f32 %v904_v2, %v5523_v16 }
 0x1fd   :  { %v865_v54 = vpop.f32.mrf.mxu0  ;;  %v906_v0 = vpop.f32.mrf.mxu1 }
 0x1fe   :  { %4985 = vtanh.f32 %v913_v5  ;;  %v917_v56 = vmul.f32 0.5, %v910_v1  ;;  %v922_v11 = vmul.f32 0.5, %v912_v9  ;;  %v5690_v5 = vld [vmem:[#allocation4 + $0xc4] ss:$16 sps:$4 sm:$0xff]   ;;  %v5692_v1 = vld [vmem:[#allocation4 + $0xcc] ss:$16 sps:$4 sm:$0xff]  }
 0x1ff   :  { %v866_v57 = vpop.f32.mrf.mxu0  ;;  %v907_v51 = vpop.f32.mrf.mxu1  ;;  %v5694_v54 = vld [vmem:[#allocation4 + $0xc0] ss:$16 sps:$4 sm:$0xff]   ;;  %v5696_v0 = vld [vmem:[#allocation4 + $0xc8] ss:$16 sps:$4 sm:$0xff]   ;;  %v5714_v9 = vld [vmem:[#allocation4 + $0x84] ss:$16 sps:$4 sm:$0xff]  }
 0x200   :  { %4987 = vtanh.f32 %v917_v56  ;;  %v5704_v56 = vld [vmem:[#allocation4 + $0xac] ss:$16 sps:$4 sm:$0xff]   ;;  %v5706_v57 = vld [vmem:[#allocation4 + $0xa0] ss:$16 sps:$4 sm:$0xff]   ;;  %v5708_v51 = vld [vmem:[#allocation4 + $0xa8] ss:$16 sps:$4 sm:$0xff]  }
 0x201   :  { %4989 = vtanh.f32 %v911_v19  ;;  %v5702_v19 = vld [vmem:[#allocation4 + $0xa4] ss:$16 sps:$4 sm:$0xff]  }
 0x202   :  { %4991 = vtanh.f32 %v922_v11  ;;  %v5716_v11 = vld [vmem:[#allocation4 + $0x8c] ss:$16 sps:$4 sm:$0xff]  }
 0x20b   :  { %v4986_v6 = vpop.eup %4985 }
 0x20c   :  { %v915_v3 = vmul.f32 0.5, %v4986_v6  ;;  %v5718_v6 = vld [vmem:[#allocation4 + $0x80] ss:$16 sps:$4 sm:$0xff]  }
 0x20d   :  { %v4988_v50 = vpop.eup %4987 }
 0x20e   :  { %v916_v53 = vadd.f32 0.5, %v915_v3  ;;  %v919_v60 = vmul.f32 0.5, %v4988_v50  ;;  %v4990_v7 = vpop.eup %4989  ;;  %v5720_v3 = vld [vmem:[#allocation4 + $0x88] ss:$16 sps:$4 sm:$0xff]   ;;  %v5726_v50 = vld [vmem:[#allocation4 + $0x64] ss:$16 sps:$4 sm:$0xff]  }
 0x20f   :  { %v4992_v31 = vpop.eup %4991 }
 0x210   :  { %v920_v62 = vadd.f32 0.5, %v919_v60  ;;  %v927_v17 = vmul.f32 %v4990_v7, %v916_v53  ;;  %v924_v38 = vmul.f32 0.5, %v4992_v31  ;;  %v5728_v53 = vld [vmem:[#allocation4 + $0x6c] ss:$16 sps:$4 sm:$0xff]   ;;  %v5730_v60 = vld [vmem:[#allocation4 + $0x60] ss:$16 sps:$4 sm:$0xff]  }
 0x211   :  { %v5732_v7 = vld [vmem:[#allocation4 + $0x68] ss:$16 sps:$4 sm:$0xff]   ;;  %v5750_v31 = vld [vmem:[#allocation4 + $0x24] ss:$16 sps:$4 sm:$0xff]  }
 0x212   :  { %v926_v58 = vmul.f32 %v920_v62, %v5591_v61  ;;  %v925_v59 = vadd.f32 0.5, %v924_v38  ;;  %v5684_v61 = vld [vmem:[#allocation4 + $0xe8] ss:$16 sps:$4 sm:$0xff]   ;;  %v5738_v62 = vld [vmem:[#allocation4 + $0x44] ss:$16 sps:$4 sm:$0xff]  }
 0x213   :  { %v5752_v38 = vld [vmem:[#allocation4 + $0x2c] ss:$16 sps:$4 sm:$0xff]  }
 0x214   :  { %v5633_v4 = vadd.f32 %v927_v17, %v926_v58  ;;  %v5740_v17 = vld [vmem:[#allocation4 + $0x4c] ss:$16 sps:$4 sm:$0xff]   ;;  %v5742_v58 = vld [vmem:[#allocation4 + $0x40] ss:$16 sps:$4 sm:$0xff]  }
 0x216   :  { %4993 = vtanh.f32 %v5633_v4 }
 0x223   :  { %v4994_v16 = vpop.eup %4993 }
 0x224   :  { %v930_v52 = vmul.f32 %v4994_v16, %v925_v59  ;;  %v5754_v59 = vld [vmem:[#allocation4 + $0x20] ss:$16 sps:$4 sm:$0xff]   ;;  %v5756_v16 = vld [vmem:[#allocation4 + $0x28] ss:$16 sps:$4 sm:$0xff]  }
 0x226   :  { %v931_v2 = vpack.c.bf16 %v930_v52, %v930_v52  ;;  %v5762_v52 = vld [vmem:[#allocation4 + $0x4] ss:$16 sps:$4 sm:$0xff]  }
 0x228   :  { %933 = vst [vmem:[#allocation2 + $0x4] sm:$0xf] %v931_v2  ;;  %1166 = vmatmul.mubr.bf16.vlgmr.msra.gmra.mxu0 %v931_v2  ;;  %1207 = vmatmul.mubr.bf16.vlgmr.msra.gmra.mxu1 %v931_v2  ;;  %v5764_v2 = vld [vmem:[#allocation4 + $0xc] ss:$16 sps:$4 sm:$0xff]  }
 0x229   :  { %1440 = vmatpush1.bf16.msra.mxu0 %v5318_v8  ;;  %1481 = vmatpush1.bf16.msra.mxu1 %v5322_v10 }
 0x22a   :  { %1441 = vmatprep.subr.bf16.mxu0 %v5331_v13  ;;  %1482 = vmatprep.subr.bf16.mxu1 %v5337_v15 }
 0x22b   :  { %1471 = vmatprep.mubr.bf16.mxu0 %v6511_v55  ;;  %1512 = vmatprep.mubr.bf16.mxu1 %v6511_v55 }
 0x22d   :  { %1442 = vmatpush1.bf16.msra.mxu0 %v5327_v12  ;;  %1483 = vmatpush1.bf16.msra.mxu1 %v5335_v14 }
 0x22e   :  { %1443 = vmatprep.subr.bf16.mxu0 %v5349_v18  ;;  %1484 = vmatprep.subr.bf16.mxu1 %v5354_v21 }
 0x231   :  { %1444 = vmatpush1.bf16.msra.mxu0 %v5352_v20  ;;  %1485 = vmatpush1.bf16.msra.mxu1 %v5357_v22 }
 0x232   :  { %1445 = vmatprep.subr.bf16.mxu0 %v5361_v23  ;;  %1486 = vmatprep.subr.bf16.mxu1 %v5364_v24 }
 0x235   :  { %1446 = vmatpush1.bf16.msra.mxu0 %v5368_v25  ;;  %1487 = vmatpush1.bf16.msra.mxu1 %v5380_v28 }
 0x236   :  { %1447 = vmatprep.subr.bf16.mxu0 %v5382_v29  ;;  %1488 = vmatprep.subr.bf16.mxu1 %v5386_v30 }
 0x239   :  { %1448 = vmatpush1.bf16.msra.mxu0 %v5389_v32  ;;  %1489 = vmatpush1.bf16.msra.mxu1 %v5391_v33 }
 0x23a   :  { %1449 = vmatprep.subr.bf16.mxu0 %v5395_v34  ;;  %1490 = vmatprep.subr.bf16.mxu1 %v5400_v36 }
 0x23d   :  { %1450 = vmatpush1.bf16.msra.mxu0 %v5398_v35  ;;  %1491 = vmatpush1.bf16.msra.mxu1 %v5404_v37 }
 0x23e   :  { %1451 = vmatprep.subr.bf16.mxu0 %v5416_v40  ;;  %1492 = vmatprep.subr.bf16.mxu1 %v5422_v42 }
 0x241   :  { %1452 = vmatpush1.bf16.msra.mxu0 %v5420_v41  ;;  %1493 = vmatpush1.bf16.msra.mxu1 %v5424_v44 }
 0x242   :  { %1453 = vmatprep.subr.bf16.mxu0 %v5426_v45  ;;  %1494 = vmatprep.subr.bf16.mxu1 %v5429_v46 }
 0x245   :  { %1454 = vmatpush1.bf16.msra.mxu0 %v5434_v47  ;;  %1495 = vmatpush1.bf16.msra.mxu1 %v5438_v48 }
 0x2e8   :  { %v1167_v8 = vpop.f32.mrf.mxu0  ;;  %v1208_v10 = vpop.f32.mrf.mxu1 }
 0x2e9   :  { %v1215_v12 = vadd.f32 %v1167_v8, %v5525_v26  ;;  %v1217_v22 = vadd.f32 %v1208_v10, %v5528_v27  ;;  %v5678_v27 = vld [vmem:[#allocation4 + $0xe4] ss:$16 sps:$4 sm:$0xff]   ;;  %v5766_v8 = vld [vmem:[#allocation4] ss:$16 sps:$4 sm:$0xff]   ;;  %v5768_v10 = vld [vmem:[#allocation4 + $0x8] ss:$16 sps:$4 sm:$0xff]  }
 0x2ea   :  { %v1169_v13 = vpop.f32.mrf.mxu0  ;;  %v1210_v14 = vpop.f32.mrf.mxu1  ;;  %1745 = vmatprep.subr.bf16.mxu0 %v5678_v27 }
 0x2eb   :  { %v1219_v15 = vmul.f32 0.5, %v1215_v12  ;;  %v1216_v18 = vadd.f32 %v1169_v13, %v5530_v39  ;;  %v1218_v28 = vadd.f32 %v1210_v14, %v5533_v43  ;;  %v5680_v39 = vld [vmem:[#allocation4 + $0xec] ss:$16 sps:$4 sm:$0xff]   ;;  %v5682_v43 = vld [vmem:[#allocation4 + $0xe0] ss:$16 sps:$4 sm:$0xff]  }
 0x2ec   :  { %v1171_v20 = vpop.f32.mrf.mxu0  ;;  %v1212_v21 = vpop.f32.mrf.mxu1  ;;  %1786 = vmatprep.subr.bf16.mxu1 %v5680_v39 }
 0x2ed   :  { %4995 = vtanh.f32 %v1219_v15  ;;  %v1223_v23 = vmul.f32 0.5, %v1216_v18  ;;  %v1228_v29 = vmul.f32 0.5, %v1218_v28  ;;  %v6512_v21 = vld [vmem:[#allocation13_spill] sm:$0xff] }
 0x2ee   :  { %v1172_v24 = vpop.f32.mrf.mxu0  ;;  %v1213_v25 = vpop.f32.mrf.mxu1 }
 0x2ef   :  { %4997 = vtanh.f32 %v1223_v23  ;;  %v6513_v25 = vld [vmem:[#allocation12_spill] sm:$0xff] }
 0x2f0   :  { %4999 = vtanh.f32 %v1217_v22 }
 0x2f1   :  { %5001 = vtanh.f32 %v1228_v29 }
 0x2fa   :  { %v4996_v30 = vpop.eup %4995 }
 0x2fb   :  { %v1221_v32 = vmul.f32 0.5, %v4996_v30 }
 0x2fc   :  { %v4998_v33 = vpop.eup %4997 }
 0x2fd   :  { %v1222_v34 = vadd.f32 0.5, %v1221_v32  ;;  %v1225_v35 = vmul.f32 0.5, %v4998_v33  ;;  %v5000_v36 = vpop.eup %4999  ;;  %v6514_v33 = vld [vmem:[#allocation14_spill] sm:$0xff] }
 0x2fe   :  { %v5002_v44 = vpop.eup %5001 }
 0x2ff   :  { %v1226_v37 = vadd.f32 0.5, %v1225_v35  ;;  %v1233_v40 = vmul.f32 %v5000_v36, %v1222_v34  ;;  %v1230_v45 = vmul.f32 0.5, %v5002_v44 }
 0x301   :  { %v1232_v41 = vmul.f32 %v1226_v37, %v5633_v4  ;;  %v1231_v46 = vadd.f32 0.5, %v1230_v45  ;;  %v5744_v4 = vld [vmem:[#allocation4 + $0x48] ss:$16 sps:$4 sm:$0xff]  }
 0x303   :  { %v5673_v42 = vadd.f32 %v1233_v40, %v1232_v41 }
 0x305   :  { %5003 = vtanh.f32 %v5673_v42 }
 0x312   :  { %v5004_v47 = vpop.eup %5003 }
 0x313   :  { %v1236_v48 = vmul.f32 %v5004_v47, %v1231_v46 }
 0x315   :  { %v1237_v26 = vpack.c.bf16 %v1236_v48, %v1236_v48 }
 0x317   :  { %1239 = vst [vmem:[#allocation2 + $0x8] sm:$0xf] %v1237_v26  ;;  %1472 = vmatmul.mubr.bf16.vlgmr.msra.gmra.mxu0 %v1237_v26  ;;  %1513 = vmatmul.mubr.bf16.vlgmr.msra.gmra.mxu1 %v1237_v26 }
 0x318   :  { %1777 = vmatprep.mubr.bf16.mxu0 %v6511_v55  ;;  %1818 = vmatprep.mubr.bf16.mxu1 %v6511_v55 }
 0x319   :  { %1746 = vmatpush1.bf16.msra.mxu0 %v5682_v43  ;;  %1787 = vmatpush1.bf16.msra.mxu1 %v5684_v61 }
 0x31a   :  { %1747 = vmatprep.subr.bf16.mxu0 %v5690_v5  ;;  %1788 = vmatprep.subr.bf16.mxu1 %v5692_v1 }
 0x31d   :  { %1748 = vmatpush1.bf16.msra.mxu0 %v5694_v54  ;;  %1789 = vmatpush1.bf16.msra.mxu1 %v5696_v0 }
 0x31e   :  { %1749 = vmatprep.subr.bf16.mxu0 %v5702_v19  ;;  %1790 = vmatprep.subr.bf16.mxu1 %v5704_v56 }
 0x321   :  { %1750 = vmatpush1.bf16.msra.mxu0 %v5706_v57  ;;  %1791 = vmatpush1.bf16.msra.mxu1 %v5708_v51 }
 0x322   :  { %1751 = vmatprep.subr.bf16.mxu0 %v5714_v9  ;;  %1792 = vmatprep.subr.bf16.mxu1 %v5716_v11 }
 0x325   :  { %1752 = vmatpush1.bf16.msra.mxu0 %v5718_v6  ;;  %1793 = vmatpush1.bf16.msra.mxu1 %v5720_v3 }
 0x326   :  { %1753 = vmatprep.subr.bf16.mxu0 %v5726_v50  ;;  %1794 = vmatprep.subr.bf16.mxu1 %v5728_v53 }
 0x329   :  { %1754 = vmatpush1.bf16.msra.mxu0 %v5730_v60  ;;  %1795 = vmatpush1.bf16.msra.mxu1 %v5732_v7 }
 0x32a   :  { %1755 = vmatprep.subr.bf16.mxu0 %v5738_v62  ;;  %1796 = vmatprep.subr.bf16.mxu1 %v5740_v17 }
 0x32d   :  { %1756 = vmatpush1.bf16.msra.mxu0 %v5742_v58  ;;  %1797 = vmatpush1.bf16.msra.mxu1 %v5744_v4 }
 0x32e   :  { %1757 = vmatprep.subr.bf16.mxu0 %v5750_v31  ;;  %1798 = vmatprep.subr.bf16.mxu1 %v5752_v38 }
 0x331   :  { %1758 = vmatpush1.bf16.msra.mxu0 %v5754_v59  ;;  %1799 = vmatpush1.bf16.msra.mxu1 %v5756_v16 }
 0x332   :  { %1759 = vmatprep.subr.bf16.mxu0 %v5762_v52  ;;  %1800 = vmatprep.subr.bf16.mxu1 %v5764_v2 }
 0x335   :  { %1760 = vmatpush1.bf16.msra.mxu0 %v5766_v8  ;;  %1801 = vmatpush1.bf16.msra.mxu1 %v5768_v10 }
 0x336   :  { %2051 = vmatprep.subr.bf16.mxu0 %v5678_v27  ;;  %2092 = vmatprep.subr.bf16.mxu1 %v5680_v39 }
 0x3d7   :  { %v1473_v12 = vpop.f32.mrf.mxu0  ;;  %v1514_v13 = vpop.f32.mrf.mxu1 }
 0x3d8   :  { %v1521_v14 = vadd.f32 %v1473_v12, %v5535_v63  ;;  %v1523_v28 = vadd.f32 %v1514_v13, %v6513_v25 }
 0x3d9   :  { %v1475_v15 = vpop.f32.mrf.mxu0  ;;  %v1516_v18 = vpop.f32.mrf.mxu1 }
 0x3da   :  { %v1525_v20 = vmul.f32 0.5, %v1521_v14  ;;  %v1522_v22 = vadd.f32 %v1475_v15, %v6512_v21  ;;  %v1524_v34 = vadd.f32 %v1516_v18, %v6514_v33  ;;  %v6515_v21 = vld [vmem:[#allocation15_spill] sm:$0xff]  ;;  %v6517_v33 = vld [vmem:[#allocation16_spill] sm:$0xff] }
 0x3db   :  { %v1477_v23 = vpop.f32.mrf.mxu0  ;;  %v1518_v24 = vpop.f32.mrf.mxu1 }
 0x3dc   :  { %5005 = vtanh.f32 %v1525_v20  ;;  %v1529_v29 = vmul.f32 0.5, %v1522_v22  ;;  %v1534_v35 = vmul.f32 0.5, %v1524_v34 }
 0x3dd   :  { %v1478_v30 = vpop.f32.mrf.mxu0  ;;  %v1519_v32 = vpop.f32.mrf.mxu1 }
 0x3de   :  { %5007 = vtanh.f32 %v1529_v29 }
 0x3df   :  { %5009 = vtanh.f32 %v1523_v28  ;;  %v6516_v28 = vld [vmem:[#allocation17_spill] sm:$0xff] }
 0x3e0   :  { %5011 = vtanh.f32 %v1534_v35 }
 0x3e9   :  { %v5006_v36 = vpop.eup %5005 }
 0x3ea   :  { %v1527_v63 = vmul.f32 0.5, %v5006_v36 }
 0x3eb   :  { %v5008_v37 = vpop.eup %5007 }
 0x3ec   :  { %v1528_v40 = vadd.f32 0.5, %v1527_v63  ;;  %v1531_v41 = vmul.f32 0.5, %v5008_v37  ;;  %v5010_v44 = vpop.eup %5009  ;;  %v6518_v37 = vld [vmem:[#allocation18_spill] sm:$0xff] }
 0x3ed   :  { %v5012_v26 = vpop.eup %5011 }
 0x3ee   :  { %v1532_v45 = vadd.f32 0.5, %v1531_v41  ;;  %v1539_v46 = vmul.f32 %v5010_v44, %v1528_v40  ;;  %v1536_v12 = vmul.f32 0.5, %v5012_v26 }
 0x3f0   :  { %v1538_v47 = vmul.f32 %v1532_v45, %v5673_v42  ;;  %v1537_v13 = vadd.f32 0.5, %v1536_v12 }
 0x3f2   :  { %v5781_v48 = vadd.f32 %v1539_v46, %v1538_v47 }
 0x3f4   :  { %5013 = vtanh.f32 %v5781_v48 }
 0x401   :  { %v5014_v14 = vpop.eup %5013 }
 0x402   :  { %v1542_v15 = vmul.f32 %v5014_v14, %v1537_v13 }
 0x404   :  { %v1543_v18 = vpack.c.bf16 %v1542_v15, %v1542_v15 }
 0x406   :  { %1545 = vst [vmem:[#allocation2 + $0xc] sm:$0xf] %v1543_v18  ;;  %1778 = vmatmul.mubr.bf16.vlgmr.msra.gmra.mxu0 %v1543_v18  ;;  %1819 = vmatmul.mubr.bf16.vlgmr.msra.gmra.mxu1 %v1543_v18 }
 0x407   :  { %2052 = vmatpush1.bf16.msra.mxu0 %v5682_v43  ;;  %2093 = vmatpush1.bf16.msra.mxu1 %v5684_v61 }
 0x408   :  { %2053 = vmatprep.subr.bf16.mxu0 %v5690_v5  ;;  %2094 = vmatprep.subr.bf16.mxu1 %v5692_v1 }
 0x409   :  { %2083 = vmatprep.mubr.bf16.mxu0 %v6511_v55  ;;  %2124 = vmatprep.mubr.bf16.mxu1 %v6511_v55 }
 0x40b   :  { %2054 = vmatpush1.bf16.msra.mxu0 %v5694_v54  ;;  %2095 = vmatpush1.bf16.msra.mxu1 %v5696_v0 }
 0x40c   :  { %2055 = vmatprep.subr.bf16.mxu0 %v5702_v19  ;;  %2096 = vmatprep.subr.bf16.mxu1 %v5704_v56 }
 0x40f   :  { %2056 = vmatpush1.bf16.msra.mxu0 %v5706_v57  ;;  %2097 = vmatpush1.bf16.msra.mxu1 %v5708_v51 }
 0x410   :  { %2057 = vmatprep.subr.bf16.mxu0 %v5714_v9  ;;  %2098 = vmatprep.subr.bf16.mxu1 %v5716_v11 }
 0x413   :  { %2058 = vmatpush1.bf16.msra.mxu0 %v5718_v6  ;;  %2099 = vmatpush1.bf16.msra.mxu1 %v5720_v3 }
 0x414   :  { %2059 = vmatprep.subr.bf16.mxu0 %v5726_v50  ;;  %2100 = vmatprep.subr.bf16.mxu1 %v5728_v53 }
 0x417   :  { %2060 = vmatpush1.bf16.msra.mxu0 %v5730_v60  ;;  %2101 = vmatpush1.bf16.msra.mxu1 %v5732_v7 }
 0x418   :  { %2061 = vmatprep.subr.bf16.mxu0 %v5738_v62  ;;  %2102 = vmatprep.subr.bf16.mxu1 %v5740_v17 }
 0x41b   :  { %2062 = vmatpush1.bf16.msra.mxu0 %v5742_v58  ;;  %2103 = vmatpush1.bf16.msra.mxu1 %v5744_v4 }
 0x41c   :  { %2063 = vmatprep.subr.bf16.mxu0 %v5750_v31  ;;  %2104 = vmatprep.subr.bf16.mxu1 %v5752_v38 }
 0x41f   :  { %2064 = vmatpush1.bf16.msra.mxu0 %v5754_v59  ;;  %2105 = vmatpush1.bf16.msra.mxu1 %v5756_v16 }
 0x420   :  { %2065 = vmatprep.subr.bf16.mxu0 %v5762_v52  ;;  %2106 = vmatprep.subr.bf16.mxu1 %v5764_v2 }
 0x423   :  { %2066 = vmatpush1.bf16.msra.mxu0 %v5766_v8  ;;  %2107 = vmatpush1.bf16.msra.mxu1 %v5768_v10 }
 0x424   :  { %2357 = vmatprep.subr.bf16.mxu0 %v5678_v27  ;;  %2398 = vmatprep.subr.bf16.mxu1 %v5680_v39 }
 0x4c6   :  { %v1779_v42 = vpop.f32.mrf.mxu0  ;;  %v1820_v20 = vpop.f32.mrf.mxu1 }
 0x4c7   :  { %v1827_v22 = vadd.f32 %v1779_v42, %v6515_v21  ;;  %v1829_v34 = vadd.f32 %v1820_v20, %v6517_v33 }
 0x4c8   :  { %v1781_v23 = vpop.f32.mrf.mxu0  ;;  %v1822_v24 = vpop.f32.mrf.mxu1 }
 0x4c9   :  { %v1831_v25 = vmul.f32 0.5, %v1827_v22  ;;  %v1828_v29 = vadd.f32 %v1781_v23, %v6516_v28  ;;  %v1830_v40 = vadd.f32 %v1822_v24, %v6518_v37  ;;  %v6519_v28 = vld [vmem:[#allocation19_spill] sm:$0xff]  ;;  %v6521_v37 = vld [vmem:[#allocation20_spill] sm:$0xff] }
 0x4ca   :  { %v1783_v30 = vpop.f32.mrf.mxu0  ;;  %v1824_v32 = vpop.f32.mrf.mxu1 }
 0x4cb   :  { %5015 = vtanh.f32 %v1831_v25  ;;  %v1835_v35 = vmul.f32 0.5, %v1828_v29  ;;  %v1840_v41 = vmul.f32 0.5, %v1830_v40 }
 0x4cc   :  { %v1784_v36 = vpop.f32.mrf.mxu0  ;;  %v1825_v63 = vpop.f32.mrf.mxu1 }
 0x4cd   :  { %5017 = vtanh.f32 %v1835_v35 }
 0x4ce   :  { %5019 = vtanh.f32 %v1829_v34  ;;  %v6520_v34 = vld [vmem:[#allocation21_spill] sm:$0xff] }
 0x4cf   :  { %5021 = vtanh.f32 %v1840_v41 }
 0x4d8   :  { %v5016_v44 = vpop.eup %5015 }
 0x4d9   :  { %v1833_v45 = vmul.f32 0.5, %v5016_v44 }
 0x4da   :  { %v5018_v46 = vpop.eup %5017 }
 0x4db   :  { %v1834_v47 = vadd.f32 0.5, %v1833_v45  ;;  %v1837_v26 = vmul.f32 0.5, %v5018_v46  ;;  %v5020_v12 = vpop.eup %5019 }
 0x4dc   :  { %v5022_v42 = vpop.eup %5021 }
 0x4dd   :  { %v1838_v13 = vadd.f32 0.5, %v1837_v26  ;;  %v1845_v14 = vmul.f32 %v5020_v12, %v1834_v47  ;;  %v1842_v20 = vmul.f32 0.5, %v5022_v42 }
 0x4df   :  { %v1844_v15 = vmul.f32 %v1838_v13, %v5781_v48  ;;  %v1843_v21 = vadd.f32 0.5, %v1842_v20 }
 0x4e1   :  { %v5823_v18 = vadd.f32 %v1845_v14, %v1844_v15 }
 0x4e3   :  { %5023 = vtanh.f32 %v5823_v18 }
 0x4f0   :  { %v5024_v22 = vpop.eup %5023 }
 0x4f1   :  { %v1848_v23 = vmul.f32 %v5024_v22, %v1843_v21 }
 0x4f3   :  { %v1849_v24 = vpack.c.bf16 %v1848_v23, %v1848_v23 }
 0x4f5   :  { %1851 = vst [vmem:[#allocation2 + $0x10] sm:$0xf] %v1849_v24  ;;  %2084 = vmatmul.mubr.bf16.vlgmr.msra.gmra.mxu0 %v1849_v24  ;;  %2125 = vmatmul.mubr.bf16.vlgmr.msra.gmra.mxu1 %v1849_v24 }
 0x4f6   :  { %2358 = vmatpush1.bf16.msra.mxu0 %v5682_v43  ;;  %2399 = vmatpush1.bf16.msra.mxu1 %v5684_v61 }
 0x4f7   :  { %2359 = vmatprep.subr.bf16.mxu0 %v5690_v5  ;;  %2400 = vmatprep.subr.bf16.mxu1 %v5692_v1 }
 0x4f8   :  { %2389 = vmatprep.mubr.bf16.mxu0 %v6511_v55  ;;  %2430 = vmatprep.mubr.bf16.mxu1 %v6511_v55 }
 0x4fa   :  { %2360 = vmatpush1.bf16.msra.mxu0 %v5694_v54  ;;  %2401 = vmatpush1.bf16.msra.mxu1 %v5696_v0 }
 0x4fb   :  { %2361 = vmatprep.subr.bf16.mxu0 %v5702_v19  ;;  %2402 = vmatprep.subr.bf16.mxu1 %v5704_v56 }
 0x4fe   :  { %2362 = vmatpush1.bf16.msra.mxu0 %v5706_v57  ;;  %2403 = vmatpush1.bf16.msra.mxu1 %v5708_v51 }
 0x4ff   :  { %2363 = vmatprep.subr.bf16.mxu0 %v5714_v9  ;;  %2404 = vmatprep.subr.bf16.mxu1 %v5716_v11 }
 0x502   :  { %2364 = vmatpush1.bf16.msra.mxu0 %v5718_v6  ;;  %2405 = vmatpush1.bf16.msra.mxu1 %v5720_v3 }
 0x503   :  { %2365 = vmatprep.subr.bf16.mxu0 %v5726_v50  ;;  %2406 = vmatprep.subr.bf16.mxu1 %v5728_v53 }
 0x506   :  { %2366 = vmatpush1.bf16.msra.mxu0 %v5730_v60  ;;  %2407 = vmatpush1.bf16.msra.mxu1 %v5732_v7 }
 0x507   :  { %2367 = vmatprep.subr.bf16.mxu0 %v5738_v62  ;;  %2408 = vmatprep.subr.bf16.mxu1 %v5740_v17 }
 0x50a   :  { %2368 = vmatpush1.bf16.msra.mxu0 %v5742_v58  ;;  %2409 = vmatpush1.bf16.msra.mxu1 %v5744_v4 }
 0x50b   :  { %2369 = vmatprep.subr.bf16.mxu0 %v5750_v31  ;;  %2410 = vmatprep.subr.bf16.mxu1 %v5752_v38 }
 0x50e   :  { %2370 = vmatpush1.bf16.msra.mxu0 %v5754_v59  ;;  %2411 = vmatpush1.bf16.msra.mxu1 %v5756_v16 }
 0x50f   :  { %2371 = vmatprep.subr.bf16.mxu0 %v5762_v52  ;;  %2412 = vmatprep.subr.bf16.mxu1 %v5764_v2 }
 0x512   :  { %2372 = vmatpush1.bf16.msra.mxu0 %v5766_v8  ;;  %2413 = vmatpush1.bf16.msra.mxu1 %v5768_v10 }
 0x513   :  { %2663 = vmatprep.subr.bf16.mxu0 %v5678_v27  ;;  %2704 = vmatprep.subr.bf16.mxu1 %v5680_v39  ;;  %v6522_v27 = vld [vmem:[#allocation22_spill] sm:$0xff] }
 0x5b5   :  { %v2085_v48 = vpop.f32.mrf.mxu0  ;;  %v2126_v25 = vpop.f32.mrf.mxu1 }
 0x5b6   :  { %v2133_v29 = vadd.f32 %v2085_v48, %v6519_v28  ;;  %v2135_v40 = vadd.f32 %v2126_v25, %v6521_v37 }
 0x5b7   :  { %v2087_v30 = vpop.f32.mrf.mxu0  ;;  %v2128_v32 = vpop.f32.mrf.mxu1 }
 0x5b8   :  { %v2137_v33 = vmul.f32 0.5, %v2133_v29  ;;  %v2134_v35 = vadd.f32 %v2087_v30, %v6520_v34  ;;  %v2136_v39 = vadd.f32 %v2128_v32, %v6522_v27  ;;  %v4881_v27 = vld [vmem:[#allocation6 + $0xa4] ss:$16 sps:$4 sm:$0xff]  }
 0x5b9   :  { %v2089_v36 = vpop.f32.mrf.mxu0  ;;  %v2130_v63 = vpop.f32.mrf.mxu1 }
 0x5ba   :  { %5025 = vtanh.f32 %v2137_v33  ;;  %v2141_v41 = vmul.f32 0.5, %v2134_v35  ;;  %v2146_v46 = vmul.f32 0.5, %v2136_v39  ;;  %v4867_v36 = vld [vmem:[#allocation6 + $0xe0] ss:$16 sps:$4 sm:$0xff]   ;;  %v4870_v63 = vld [vmem:[#allocation6 + $0xe8] ss:$16 sps:$4 sm:$0xff]  }
 0x5bb   :  { %v2090_v44 = vpop.f32.mrf.mxu0  ;;  %v2131_v45 = vpop.f32.mrf.mxu1  ;;  %v4884_v39 = vld [vmem:[#allocation6 + $0xac] ss:$16 sps:$4 sm:$0xff]  }
 0x5bc   :  { %5027 = vtanh.f32 %v2141_v41  ;;  %v4878_v41 = vld [vmem:[#allocation6 + $0xcc] ss:$16 sps:$4 sm:$0xff]   ;;  %v4873_v44 = vld [vmem:[#allocation6 + $0xc0] ss:$16 sps:$4 sm:$0xff]   ;;  %v4876_v45 = vld [vmem:[#allocation6 + $0xc8] ss:$16 sps:$4 sm:$0xff]  }
 0x5bd   :  { %5029 = vtanh.f32 %v2135_v40  ;;  %v4875_v40 = vld [vmem:[#allocation6 + $0xc4] ss:$16 sps:$4 sm:$0xff]  }
 0x5be   :  { %5031 = vtanh.f32 %v2146_v46  ;;  %v4879_v46 = vld [vmem:[#allocation6 + $0xa0] ss:$16 sps:$4 sm:$0xff]  }
 0x5c7   :  { %v5026_v47 = vpop.eup %5025 }
 0x5c8   :  { %v2139_v26 = vmul.f32 0.5, %v5026_v47  ;;  %v4882_v47 = vld [vmem:[#allocation6 + $0xa8] ss:$16 sps:$4 sm:$0xff]  }
 0x5c9   :  { %v5028_v12 = vpop.eup %5027 }
 0x5ca   :  { %v2140_v13 = vadd.f32 0.5, %v2139_v26  ;;  %v2143_v14 = vmul.f32 0.5, %v5028_v12  ;;  %v5030_v15 = vpop.eup %5029  ;;  %v4887_v26 = vld [vmem:[#allocation6 + $0x84] ss:$16 sps:$4 sm:$0xff]   ;;  %v4890_v12 = vld [vmem:[#allocation6 + $0x8c] ss:$16 sps:$4 sm:$0xff]  }
 0x5cb   :  { %v5032_v23 = vpop.eup %5031 }
 0x5cc   :  { %v2144_v42 = vadd.f32 0.5, %v2143_v14  ;;  %v2151_v20 = vmul.f32 %v5030_v15, %v2140_v13  ;;  %v2148_v24 = vmul.f32 0.5, %v5032_v23  ;;  %v4885_v13 = vld [vmem:[#allocation6 + $0x80] ss:$16 sps:$4 sm:$0xff]   ;;  %v4888_v14 = vld [vmem:[#allocation6 + $0x88] ss:$16 sps:$4 sm:$0xff]  }
 0x5cd   :  { %v4893_v15 = vld [vmem:[#allocation6 + $0x64] ss:$16 sps:$4 sm:$0xff]   ;;  %v4902_v23 = vld [vmem:[#allocation6 + $0x4c] ss:$16 sps:$4 sm:$0xff]  }
 0x5ce   :  { %v2150_v21 = vmul.f32 %v2144_v42, %v5823_v18  ;;  %v2149_v48 = vadd.f32 0.5, %v2148_v24  ;;  %v4896_v42 = vld [vmem:[#allocation6 + $0x6c] ss:$16 sps:$4 sm:$0xff]   ;;  %v4897_v24 = vld [vmem:[#allocation6 + $0x40] ss:$16 sps:$4 sm:$0xff]  }
 0x5d0   :  { %v5865_v22 = vadd.f32 %v2151_v20, %v2150_v21  ;;  %v4891_v20 = vld [vmem:[#allocation6 + $0x60] ss:$16 sps:$4 sm:$0xff]   ;;  %v4894_v21 = vld [vmem:[#allocation6 + $0x68] ss:$16 sps:$4 sm:$0xff]  }
 0x5d2   :  { %5033 = vtanh.f32 %v5865_v22 }
 0x5df   :  { %v5034_v25 = vpop.eup %5033 }
 0x5e0   :  { %v2154_v28 = vmul.f32 %v5034_v25, %v2149_v48  ;;  %v4900_v48 = vld [vmem:[#allocation6 + $0x48] ss:$16 sps:$4 sm:$0xff]   ;;  %v4905_v25 = vld [vmem:[#allocation6 + $0x24] ss:$16 sps:$4 sm:$0xff]  }
 0x5e2   :  { %v2155_v29 = vpack.c.bf16 %v2154_v28, %v2154_v28  ;;  %v4908_v28 = vld [vmem:[#allocation6 + $0x2c] ss:$16 sps:$4 sm:$0xff]  }
 0x5e4   :  { %2157 = vst [vmem:[#allocation2 + $0x14] sm:$0xf] %v2155_v29  ;;  %2390 = vmatmul.mubr.bf16.vlgmr.msra.gmra.mxu0 %v2155_v29  ;;  %2431 = vmatmul.mubr.bf16.vlgmr.msra.gmra.mxu1 %v2155_v29  ;;  %v4903_v29 = vld [vmem:[#allocation6 + $0x20] ss:$16 sps:$4 sm:$0xff]  }
 0x5e5   :  { %2664 = vmatpush1.bf16.msra.mxu0 %v5682_v43  ;;  %2705 = vmatpush1.bf16.msra.mxu1 %v5684_v61  ;;  %v4869_v43 = vld [vmem:[#allocation6 + $0xe4] ss:$16 sps:$4 sm:$0xff]   ;;  %v4872_v61 = vld [vmem:[#allocation6 + $0xec] ss:$16 sps:$4 sm:$0xff]  }
 0x5e6   :  { %2665 = vmatprep.subr.bf16.mxu0 %v5690_v5  ;;  %2706 = vmatprep.subr.bf16.mxu1 %v5692_v1 }
 0x5e7   :  { %2695 = vmatprep.mubr.bf16.mxu0 %v6511_v55  ;;  %2736 = vmatprep.mubr.bf16.mxu1 %v6511_v55 }
 0x5e9   :  { %2666 = vmatpush1.bf16.msra.mxu0 %v5694_v54  ;;  %2707 = vmatpush1.bf16.msra.mxu1 %v5696_v0  ;;  %v6523_v54 = vld [vmem:[#allocation23_spill] sm:$0xff] }
 0x5ea   :  { %2667 = vmatprep.subr.bf16.mxu0 %v5702_v19  ;;  %2708 = vmatprep.subr.bf16.mxu1 %v5704_v56 }
 0x5ed   :  { %2668 = vmatpush1.bf16.msra.mxu0 %v5706_v57  ;;  %2709 = vmatpush1.bf16.msra.mxu1 %v5708_v51  ;;  %v6524_v51 = vld [vmem:[#allocation25_spill] sm:$0xff] }
 0x5ee   :  { %2669 = vmatprep.subr.bf16.mxu0 %v5714_v9  ;;  %2710 = vmatprep.subr.bf16.mxu1 %v5716_v11 }
 0x5f1   :  { %2670 = vmatpush1.bf16.msra.mxu0 %v5718_v6  ;;  %2711 = vmatpush1.bf16.msra.mxu1 %v5720_v3  ;;  %v6525_v3 = vld [vmem:[#allocation24_spill] sm:$0xff] }
 0x5f2   :  { %2671 = vmatprep.subr.bf16.mxu0 %v5726_v50  ;;  %2712 = vmatprep.subr.bf16.mxu1 %v5728_v53 }
 0x5f5   :  { %2672 = vmatpush1.bf16.msra.mxu0 %v5730_v60  ;;  %2713 = vmatpush1.bf16.msra.mxu1 %v5732_v7 }
 0x5f6   :  { %2673 = vmatprep.subr.bf16.mxu0 %v5738_v62  ;;  %2714 = vmatprep.subr.bf16.mxu1 %v5740_v17  ;;  %v6526_v62 = vld [vmem:[#allocation26_spill] sm:$0xff] }
 0x5f9   :  { %2674 = vmatpush1.bf16.msra.mxu0 %v5742_v58  ;;  %2715 = vmatpush1.bf16.msra.mxu1 %v5744_v4 }
 0x5fa   :  { %2675 = vmatprep.subr.bf16.mxu0 %v5750_v31  ;;  %2716 = vmatprep.subr.bf16.mxu1 %v5752_v38 }
 0x5fd   :  { %2676 = vmatpush1.bf16.msra.mxu0 %v5754_v59  ;;  %2717 = vmatpush1.bf16.msra.mxu1 %v5756_v16 }
 0x5fe   :  { %2677 = vmatprep.subr.bf16.mxu0 %v5762_v52  ;;  %2718 = vmatprep.subr.bf16.mxu1 %v5764_v2 }
 0x601   :  { %2678 = vmatpush1.bf16.msra.mxu0 %v5766_v8  ;;  %2719 = vmatpush1.bf16.msra.mxu1 %v5768_v10 }
 0x602   :  { %3016 = vmatprep.subr.bf16.mxu0 %v4869_v43  ;;  %3089 = vmatprep.subr.bf16.mxu1 %v4872_v61  ;;  %v4906_v43 = vld [vmem:[#allocation6 + $0x28] ss:$16 sps:$4 sm:$0xff]   ;;  %v4911_v61 = vld [vmem:[#allocation6 + $0x4] ss:$16 sps:$4 sm:$0xff]  }
 0x6a4   :  { %v2391_v5 = vpop.f32.mrf.mxu0  ;;  %v2432_v1 = vpop.f32.mrf.mxu1 }
 0x6a5   :  { %v2439_v0 = vadd.f32 %v2391_v5, %v6523_v54  ;;  %v2441_v50 = vadd.f32 %v2432_v1, %v6525_v3  ;;  %v4914_v5 = vld [vmem:[#allocation6 + $0xc] ss:$16 sps:$4 sm:$0xff]   ;;  %v4909_v1 = vld [vmem:[#allocation6] ss:$16 sps:$4 sm:$0xff]   ;;  %v4912_v54 = vld [vmem:[#allocation6 + $0x8] ss:$16 sps:$4 sm:$0xff]  }
 0x6a6   :  { %v2393_v19 = vpop.f32.mrf.mxu0  ;;  %v2434_v56 = vpop.f32.mrf.mxu1  ;;  %v5930_v3 = vld [vmem:[#allocation8 + $0xcc] ss:$16 sps:$4 sm:$0xff]  }
 0x6a7   :  { %v2443_v57 = vmul.f32 0.5, %v2439_v0  ;;  %v2440_v9 = vadd.f32 %v2393_v19, %v6524_v51  ;;  %v2442_v17 = vadd.f32 %v2434_v56, %v6526_v62  ;;  %v4915_v0 = vld [vmem:[#allocation2] sm:$0xff]   ;;  %v4916_v19 = vld [vmem:[#allocation2 + $0x8] sm:$0xff]   ;;  %v4917_v56 = vld [vmem:[#allocation2 + $0x10] sm:$0xff]  }
 0x6a8   :  { %v2395_v11 = vpop.f32.mrf.mxu0  ;;  %v2436_v6 = vpop.f32.mrf.mxu1  ;;  %v5918_v51 = vld [vmem:[#allocation8 + $0xec] ss:$16 sps:$4 sm:$0xff]   ;;  %v5944_v62 = vld [vmem:[#allocation8 + $0xa0] ss:$16 sps:$4 sm:$0xff]  }
 0x6a9   :  { %5035 = vtanh.f32 %v2443_v57  ;;  %v2447_v53 = vmul.f32 0.5, %v2440_v9  ;;  %v2452_v58 = vmul.f32 0.5, %v2442_v17  ;;  %v5916_v57 = vld [vmem:[#allocation8 + $0xe4] ss:$16 sps:$4 sm:$0xff]   ;;  %v5920_v9 = vld [vmem:[#allocation8 + $0xe0] ss:$16 sps:$4 sm:$0xff]  }
 0x6aa   :  { %v2396_v60 = vpop.f32.mrf.mxu0  ;;  %v2437_v7 = vpop.f32.mrf.mxu1  ;;  %v5922_v11 = vld [vmem:[#allocation8 + $0xe8] ss:$16 sps:$4 sm:$0xff]   ;;  %v5928_v6 = vld [vmem:[#allocation8 + $0xc4] ss:$16 sps:$4 sm:$0xff]  }
 0x6ab   :  { %5037 = vtanh.f32 %v2447_v53  ;;  %v5934_v53 = vld [vmem:[#allocation8 + $0xc8] ss:$16 sps:$4 sm:$0xff]   ;;  %v5940_v60 = vld [vmem:[#allocation8 + $0xa4] ss:$16 sps:$4 sm:$0xff]   ;;  %v5942_v7 = vld [vmem:[#allocation8 + $0xac] ss:$16 sps:$4 sm:$0xff]  }
 0x6ac   :  { %5039 = vtanh.f32 %v2441_v50  ;;  %v5932_v50 = vld [vmem:[#allocation8 + $0xc0] ss:$16 sps:$4 sm:$0xff]   ;;  %v5946_v17 = vld [vmem:[#allocation8 + $0xa8] ss:$16 sps:$4 sm:$0xff]  }
 0x6ad   :  { %5041 = vtanh.f32 %v2452_v58  ;;  %v5952_v58 = vld [vmem:[#allocation8 + $0x84] ss:$16 sps:$4 sm:$0xff]  }
 0x6b6   :  { %v5036_v4 = vpop.eup %5035 }
 0x6b7   :  { %v2445_v31 = vmul.f32 0.5, %v5036_v4  ;;  %v5954_v4 = vld [vmem:[#allocation8 + $0x8c] ss:$16 sps:$4 sm:$0xff]  }
 0x6b8   :  { %v5038_v38 = vpop.eup %5037 }
 0x6b9   :  { %v2446_v59 = vadd.f32 0.5, %v2445_v31  ;;  %v2449_v16 = vmul.f32 0.5, %v5038_v38  ;;  %v5040_v52 = vpop.eup %5039  ;;  %v5956_v31 = vld [vmem:[#allocation8 + $0x80] ss:$16 sps:$4 sm:$0xff]   ;;  %v5958_v38 = vld [vmem:[#allocation8 + $0x88] ss:$16 sps:$4 sm:$0xff]  }
 0x6ba   :  { %v5042_v30 = vpop.eup %5041 }
 0x6bb   :  { %v2450_v2 = vadd.f32 0.5, %v2449_v16  ;;  %v2457_v8 = vmul.f32 %v5040_v52, %v2446_v59  ;;  %v2454_v32 = vmul.f32 0.5, %v5042_v30  ;;  %v5964_v59 = vld [vmem:[#allocation8 + $0x64] ss:$16 sps:$4 sm:$0xff]   ;;  %v5966_v16 = vld [vmem:[#allocation8 + $0x6c] ss:$16 sps:$4 sm:$0xff]  }
 0x6bc   :  { %v5968_v52 = vld [vmem:[#allocation8 + $0x60] ss:$16 sps:$4 sm:$0xff]  }
 0x6bd   :  { %v2456_v10 = vmul.f32 %v2450_v2, %v5865_v22  ;;  %v2455_v33 = vadd.f32 0.5, %v2454_v32  ;;  %v4899_v22 = vld [vmem:[#allocation6 + $0x44] ss:$16 sps:$4 sm:$0xff]   ;;  %v5970_v2 = vld [vmem:[#allocation8 + $0x68] ss:$16 sps:$4 sm:$0xff]  }
 0x6be   :  { %v5980_v30 = vld [vmem:[#allocation8 + $0x40] ss:$16 sps:$4 sm:$0xff]   ;;  %v5982_v32 = vld [vmem:[#allocation8 + $0x48] ss:$16 sps:$4 sm:$0xff]  }
 0x6bf   :  { %v5905_v18 = vadd.f32 %v2457_v8, %v2456_v10  ;;  %v5976_v8 = vld [vmem:[#allocation8 + $0x44] ss:$16 sps:$4 sm:$0xff]   ;;  %v5978_v10 = vld [vmem:[#allocation8 + $0x4c] ss:$16 sps:$4 sm:$0xff]  }
 0x6c1   :  { %5043 = vtanh.f32 %v5905_v18 }
 0x6ce   :  { %v5044_v34 = vpop.eup %5043 }
 0x6cf   :  { %v2460_v35 = vmul.f32 %v5044_v34, %v2455_v33  ;;  %v5988_v33 = vld [vmem:[#allocation8 + $0x24] ss:$16 sps:$4 sm:$0xff]   ;;  %v5990_v34 = vld [vmem:[#allocation8 + $0x2c] ss:$16 sps:$4 sm:$0xff]  }
 0x6d1   :  { %v2461_v37 = vpack.c.bf16 %v2460_v35, %v2460_v35  ;;  %v5992_v35 = vld [vmem:[#allocation8 + $0x20] ss:$16 sps:$4 sm:$0xff]  }
 0x6d3   :  { %2463 = vst [vmem:[#allocation2 + $0x18] sm:$0xf] %v2461_v37  ;;  %2696 = vmatmul.mubr.bf16.vlgmr.msra.gmra.mxu0 %v2461_v37  ;;  %2737 = vmatmul.mubr.bf16.vlgmr.msra.gmra.mxu1 %v2461_v37  ;;  %v6000_v37 = vld [vmem:[#allocation8 + $0xc] ss:$16 sps:$4 sm:$0xff]  }
 0x6d4   :  { %3017 = vmatpush1.bf16.msra.mxu0 %v4867_v36  ;;  %3090 = vmatpush1.bf16.msra.mxu1 %v4870_v63  ;;  %v5994_v36 = vld [vmem:[#allocation8 + $0x28] ss:$16 sps:$4 sm:$0xff]   ;;  %v5996_v63 = vld [vmem:[#allocation8 + $0x4] ss:$16 sps:$4 sm:$0xff]  }
 0x6d5   :  { %3018 = vmatprep.subr.bf16.mxu0 %v4875_v40  ;;  %3091 = vmatprep.subr.bf16.mxu1 %v4878_v41  ;;  %v6004_v40 = vld [vmem:[#allocation8] ss:$16 sps:$4 sm:$0xff]   ;;  %v6006_v41 = vld [vmem:[#allocation8 + $0x8] ss:$16 sps:$4 sm:$0xff]  }
 0x6d6   :  { %3048 = vmatprep.mubr.bf16.mxu0 %v6511_v55  ;;  %3121 = vmatprep.mubr.bf16.mxu1 %v6511_v55 }
 0x6d8   :  { %3019 = vmatpush1.bf16.msra.mxu0 %v4873_v44  ;;  %3092 = vmatpush1.bf16.msra.mxu1 %v4876_v45 }
 0x6d9   :  { %3020 = vmatprep.subr.bf16.mxu0 %v4881_v27  ;;  %3093 = vmatprep.subr.bf16.mxu1 %v4884_v39  ;;  %v6527_v27 = vld [vmem:[#allocation27_spill] sm:$0xff] }
 0x6dc   :  { %3021 = vmatpush1.bf16.msra.mxu0 %v4879_v46  ;;  %3094 = vmatpush1.bf16.msra.mxu1 %v4882_v47 }
 0x6dd   :  { %3022 = vmatprep.subr.bf16.mxu0 %v4887_v26  ;;  %3095 = vmatprep.subr.bf16.mxu1 %v4890_v12  ;;  %v6528_v12 = vld [vmem:[#allocation29_spill] sm:$0xff] }
 0x6e0   :  { %3023 = vmatpush1.bf16.msra.mxu0 %v4885_v13  ;;  %3096 = vmatpush1.bf16.msra.mxu1 %v4888_v14 }
 0x6e1   :  { %3024 = vmatprep.subr.bf16.mxu0 %v4893_v15  ;;  %3097 = vmatprep.subr.bf16.mxu1 %v4896_v42  ;;  %v6529_v42 = vld [vmem:[#allocation28_spill] sm:$0xff] }
 0x6e4   :  { %3025 = vmatpush1.bf16.msra.mxu0 %v4891_v20  ;;  %3098 = vmatpush1.bf16.msra.mxu1 %v4894_v21 }
 0x6e5   :  { %3026 = vmatprep.subr.bf16.mxu0 %v4899_v22  ;;  %3099 = vmatprep.subr.bf16.mxu1 %v4902_v23 }
 0x6e8   :  { %3027 = vmatpush1.bf16.msra.mxu0 %v4897_v24  ;;  %3100 = vmatpush1.bf16.msra.mxu1 %v4900_v48 }
 0x6e9   :  { %3028 = vmatprep.subr.bf16.mxu0 %v4905_v25  ;;  %3101 = vmatprep.subr.bf16.mxu1 %v4908_v28 }
 0x6ec   :  { %3029 = vmatpush1.bf16.msra.mxu0 %v4903_v29  ;;  %3102 = vmatpush1.bf16.msra.mxu1 %v4906_v43 }
 0x6ed   :  { %3030 = vmatprep.subr.bf16.mxu0 %v4911_v61  ;;  %3103 = vmatprep.subr.bf16.mxu1 %v4914_v5 }
 0x6f0   :  { %3031 = vmatpush1.bf16.msra.mxu0 %v4909_v1  ;;  %3104 = vmatpush1.bf16.msra.mxu1 %v4912_v54 }
 0x6f1   :  { %3390 = vmatprep.subr.bf16.mxu0 %v5916_v57  ;;  %3431 = vmatprep.subr.bf16.mxu1 %v5918_v51 }
 0x6f3   :  { %3049 = vmatmul.mubr.bf16.vlgmr.msra.gmra.mxu0 %v4915_v0  ;;  %3122 = vmatmul.mubr.bf16.vlgmr.msra.gmra.mxu1 %v4915_v0 }
 0x6f4   :  { %3058 = vmatprep.mubr.bf16.mxu0 %v6511_v55  ;;  %3131 = vmatprep.mubr.bf16.mxu1 %v6511_v55 }
 0x6f5   :  { %3391 = vmatpush1.bf16.msra.mxu0 %v5920_v9  ;;  %3432 = vmatpush1.bf16.msra.mxu1 %v5922_v11 }
 0x6f6   :  { %3392 = vmatprep.subr.bf16.mxu0 %v5928_v6  ;;  %3433 = vmatprep.subr.bf16.mxu1 %v5930_v3 }
 0x6f9   :  { %3393 = vmatpush1.bf16.msra.mxu0 %v5932_v50  ;;  %3434 = vmatpush1.bf16.msra.mxu1 %v5934_v53 }
 0x6fa   :  { %3394 = vmatprep.subr.bf16.mxu0 %v5940_v60  ;;  %3435 = vmatprep.subr.bf16.mxu1 %v5942_v7 }
 0x6fb   :  { %3059 = vmatmul.mubr.bf16.gmra.mxu0 %v4916_v19  ;;  %3132 = vmatmul.mubr.bf16.gmra.mxu1 %v4916_v19 }
 0x6fc   :  { %3068 = vmatprep.mubr.bf16.mxu0 %v6511_v55  ;;  %3141 = vmatprep.mubr.bf16.mxu1 %v6511_v55 }
 0x6fd   :  { %3395 = vmatpush1.bf16.msra.mxu0 %v5944_v62  ;;  %3436 = vmatpush1.bf16.msra.mxu1 %v5946_v17 }
 0x6fe   :  { %3396 = vmatprep.subr.bf16.mxu0 %v5952_v58  ;;  %3437 = vmatprep.subr.bf16.mxu1 %v5954_v4 }
 0x701   :  { %3397 = vmatpush1.bf16.msra.mxu0 %v5956_v31  ;;  %3438 = vmatpush1.bf16.msra.mxu1 %v5958_v38 }
 0x702   :  { %3398 = vmatprep.subr.bf16.mxu0 %v5964_v59  ;;  %3439 = vmatprep.subr.bf16.mxu1 %v5966_v16 }
 0x703   :  { %3069 = vmatmul.mubr.bf16.gmra.mxu0 %v4917_v56  ;;  %3142 = vmatmul.mubr.bf16.gmra.mxu1 %v4917_v56 }
 0x704   :  { %3078 = vmatprep.mubr.bf16.mxu0 %v6511_v55  ;;  %3151 = vmatprep.mubr.bf16.mxu1 %v6511_v55 }
 0x705   :  { %3399 = vmatpush1.bf16.msra.mxu0 %v5968_v52  ;;  %3440 = vmatpush1.bf16.msra.mxu1 %v5970_v2 }
 0x706   :  { %3400 = vmatprep.subr.bf16.mxu0 %v5976_v8  ;;  %3441 = vmatprep.subr.bf16.mxu1 %v5978_v10 }
 0x709   :  { %3401 = vmatpush1.bf16.msra.mxu0 %v5980_v30  ;;  %3442 = vmatpush1.bf16.msra.mxu1 %v5982_v32 }
 0x70a   :  { %3402 = vmatprep.subr.bf16.mxu0 %v5988_v33  ;;  %3443 = vmatprep.subr.bf16.mxu1 %v5990_v34 }
 0x70d   :  { %3403 = vmatpush1.bf16.msra.mxu0 %v5992_v35  ;;  %3444 = vmatpush1.bf16.msra.mxu1 %v5994_v36 }
 0x70e   :  { %3404 = vmatprep.subr.bf16.mxu0 %v5996_v63  ;;  %3445 = vmatprep.subr.bf16.mxu1 %v6000_v37 }
 0x711   :  { %3405 = vmatpush1.bf16.msra.mxu0 %v6004_v40  ;;  %3446 = vmatpush1.bf16.msra.mxu1 %v6006_v41 }
 0x712   :  { %3499 = vmatprep.subr.bf16.mxu0 %v5916_v57  ;;  %3540 = vmatprep.subr.bf16.mxu1 %v5918_v51 }
 0x793   :  { %v2697_v44 = vpop.f32.mrf.mxu0  ;;  %v2738_v45 = vpop.f32.mrf.mxu1 }
 0x794   :  { %v2745_v39 = vadd.f32 %v2697_v44, %v6527_v27  ;;  %v2747_v20 = vadd.f32 %v2738_v45, %v6529_v42 }
 0x795   :  { %v2699_v46 = vpop.f32.mrf.mxu0  ;;  %v2740_v47 = vpop.f32.mrf.mxu1 }
 0x796   :  { %v2749_v26 = vmul.f32 0.5, %v2745_v39  ;;  %v2746_v13 = vadd.f32 %v2699_v46, %v6528_v12  ;;  %v2748_v24 = vadd.f32 %v2740_v47, %v5584_v49 }
 0x797   :  { %v2701_v14 = vpop.f32.mrf.mxu0  ;;  %v2742_v15 = vpop.f32.mrf.mxu1 }
 0x798   :  { %5045 = vtanh.f32 %v2749_v26  ;;  %v2753_v21 = vmul.f32 0.5, %v2746_v13  ;;  %v2758_v48 = vmul.f32 0.5, %v2748_v24 }
 0x799   :  { %v2702_v22 = vpop.f32.mrf.mxu0  ;;  %v2743_v23 = vpop.f32.mrf.mxu1 }
 0x79a   :  { %5047 = vtanh.f32 %v2753_v21 }
 0x79b   :  { %5049 = vtanh.f32 %v2747_v20 }
 0x79c   :  { %5051 = vtanh.f32 %v2758_v48 }
 0x7a5   :  { %v5046_v25 = vpop.eup %5045 }
 0x7a6   :  { %v2751_v28 = vmul.f32 0.5, %v5046_v25 }
 0x7a7   :  { %v5048_v29 = vpop.eup %5047 }
 0x7a8   :  { %v2752_v43 = vadd.f32 0.5, %v2751_v28  ;;  %v2755_v61 = vmul.f32 0.5, %v5048_v29  ;;  %v5050_v5 = vpop.eup %5049 }
 0x7a9   :  { %v5052_v56 = vpop.eup %5051 }
 0x7aa   :  { %v2756_v1 = vadd.f32 0.5, %v2755_v61  ;;  %v2763_v54 = vmul.f32 %v5050_v5, %v2752_v43  ;;  %v2760_v44 = vmul.f32 0.5, %v5052_v56  ;;  %v2810_v56 = vld [vmem:[%s6480_s6] sm:$0xf] }
 0x7ac   :  { %v2762_v0 = vmul.f32 %v2756_v1, %v5905_v18  ;;  %v2761_v45 = vadd.f32 0.5, %v2760_v44 }
 0x7ae   :  { %v2764_v19 = vadd.f32 %v2763_v54, %v2762_v0 }
 0x7b0   :  { %5053 = vtanh.f32 %v2764_v19 }
 0x7b3   :  { %v3050_v18 = vpop.f32.mrf.mxu0  ;;  %v3123_v47 = vpop.f32.mrf.mxu1 }
 0x7b5   :  { %v3052_v26 = vpop.f32.mrf.mxu0  ;;  %v3125_v12 = vpop.f32.mrf.mxu1 }
 0x7b7   :  { %v6057_v13 = vpop.f32.mrf.mxu0  ;;  %v6059_v14 = vpop.f32.mrf.mxu1 }
 0x7b9   :  { %v6061_v15 = vpop.f32.mrf.mxu0  ;;  %v6063_v42 = vpop.f32.mrf.mxu1 }
 0x7bb   :  { %v6065_v20 = vpop.f32.mrf.mxu0  ;;  %v6067_v21 = vpop.f32.mrf.mxu1 }
 0x7bc   :  { %6530 = vst [vmem:[#allocation13_spill] sm:$0xff] %v6067_v21 }
 0x7bd   :  { %v5054_v27 = vpop.eup %5053  ;;  %v6069_v22 = vpop.f32.mrf.mxu0 }
 0x7be   :  { %v2766_v39 = vmul.f32 %v5054_v27, %v2761_v45  ;;  %6531 = vst [vmem:[#allocation12_spill] sm:$0xff] %v6069_v22  ;;  %v6071_v23 = vpop.f32.mrf.mxu1 }
 0x7bf   :  { %6532 = vst [vmem:[#allocation14_spill] sm:$0xff] %v6071_v23  ;;  %v6073_v24 = vpop.f32.mrf.mxu0 }
 0x7c0   :  { %v2767_v49 = vpack.c.bf16 %v2766_v39, %v2766_v39  ;;  %6533 = vst [vmem:[#allocation15_spill] sm:$0xff] %v6073_v24  ;;  %v6075_v48 = vpop.f32.mrf.mxu1 }
 0x7c1   :  { %6534 = vst [vmem:[#allocation17_spill] sm:$0xff] %v6075_v48  ;;  %v6077_v25 = vpop.f32.mrf.mxu0 }
 0x7c2   :  { %2769 = vst [vmem:[#allocation2 + $0x1c] sm:$0xf] %v2767_v49  ;;  %6535 = vst [vmem:[#allocation16_spill] sm:$0xff] %v6077_v25  ;;  %v6079_v28 = vpop.f32.mrf.mxu1  ;;  %v6549_v49 = vld [vmem:[#allocation11_spill] sm:$0xff] }
 0x7c3   :  { %6536 = vst [vmem:[#allocation18_spill] sm:$0xff] %v6079_v28  ;;  %v6081_v29 = vpop.f32.mrf.mxu0  ;;  %v6557_v21 = vsub.s32 3, %v6549_v49 }
 0x7c4   :  { %6537 = vst [vmem:[#allocation19_spill] sm:$0xff] %v6081_v29  ;;  %v6083_v43 = vpop.f32.mrf.mxu1 }
 0x7c5   :  { %6538 = vst [vmem:[#allocation21_spill] sm:$0xff] %v6083_v43  ;;  %v6085_v61 = vpop.f32.mrf.mxu0  ;;  %v6133_v22 = vrot.slane %v2810_v56, %v6557_v21 }
 0x7c6   :  { %6539 = vst [vmem:[#allocation20_spill] sm:$0xff] %v6085_v61  ;;  %v6087_v5 = vpop.f32.mrf.mxu1  ;;  %v6556_v61 = vsub.s32 2, %v6549_v49 }
 0x7c7   :  { %6540 = vst [vmem:[#allocation22_spill] sm:$0xff] %v6087_v5  ;;  %v6089_v1 = vpop.f32.mrf.mxu0 }
 0x7c8   :  { %6541 = vst [vmem:[#allocation23_spill] sm:$0xff] %v6089_v1  ;;  %v6091_v54 = vpop.f32.mrf.mxu1 }
 0x7c9   :  { %v4954_v46 = vld [vmem:[#allocation2 + $0x18] sm:$0xff]   ;;  %6542 = vst [vmem:[#allocation25_spill] sm:$0xff] %v6091_v54  ;;  %v6093_v0 = vpop.f32.mrf.mxu0 }
 0x7ca   :  { %3079 = vmatmul.mubr.bf16.gmra.mxu0 %v4954_v46  ;;  %3152 = vmatmul.mubr.bf16.gmra.mxu1 %v4954_v46  ;;  %6543 = vst [vmem:[#allocation24_spill] sm:$0xff] %v6093_v0  ;;  %v6095_v19 = vpop.f32.mrf.mxu1  ;;  %v6550_v46 = vsub.s32 0, %v6549_v49 }
 0x7cb   :  { %3422 = vmatprep.mubr.bf16.mxu0 %v6511_v55  ;;  %3463 = vmatprep.mubr.bf16.mxu1 %v6511_v55  ;;  %6544 = vst [vmem:[#allocation26_spill] sm:$0xff] %v6095_v19  ;;  %v6553_v19 = vsub.s32 1, %v6549_v49 }
 0x7cc   :  { %v6110_v1 = vrot.slane %v2810_v56, %v6550_v46  ;;  %v6127_v46 = vrot.slane %v2810_v56, %v6556_v61 }
 0x7cd   :  { %v6118_v5 = vrot.slane %v2810_v56, %v6553_v19 }
 0x7d2   :  { %3423 = vmatmul.mubr.bf16.vlgmr.msra.gmra.mxu0 %v6511_v55  ;;  %3464 = vmatmul.mubr.bf16.vlgmr.msra.gmra.mxu1 %v6511_v55 }
 0x7d3   :  { %3500 = vmatpush1.bf16.msra.mxu0 %v5920_v9  ;;  %3541 = vmatpush1.bf16.msra.mxu1 %v5922_v11 }
 0x7d4   :  { %3501 = vmatprep.subr.bf16.mxu0 %v5928_v6  ;;  %3542 = vmatprep.subr.bf16.mxu1 %v5930_v3 }
 0x7d5   :  { %3531 = vmatprep.mubr.bf16.mxu0 %v6511_v55  ;;  %3572 = vmatprep.mubr.bf16.mxu1 %v6511_v55 }
 0x7d7   :  { %3502 = vmatpush1.bf16.msra.mxu0 %v5932_v50  ;;  %3543 = vmatpush1.bf16.msra.mxu1 %v5934_v53 }
 0x7d8   :  { %3503 = vmatprep.subr.bf16.mxu0 %v5940_v60  ;;  %3544 = vmatprep.subr.bf16.mxu1 %v5942_v7 }
 0x7db   :  { %3504 = vmatpush1.bf16.msra.mxu0 %v5944_v62  ;;  %3545 = vmatpush1.bf16.msra.mxu1 %v5946_v17 }
 0x7dc   :  { %3505 = vmatprep.subr.bf16.mxu0 %v5952_v58  ;;  %3546 = vmatprep.subr.bf16.mxu1 %v5954_v4 }
 0x7df   :  { %3506 = vmatpush1.bf16.msra.mxu0 %v5956_v31  ;;  %3547 = vmatpush1.bf16.msra.mxu1 %v5958_v38 }
 0x7e0   :  { %3507 = vmatprep.subr.bf16.mxu0 %v5964_v59  ;;  %3548 = vmatprep.subr.bf16.mxu1 %v5966_v16 }
 0x7e3   :  { %3508 = vmatpush1.bf16.msra.mxu0 %v5968_v52  ;;  %3549 = vmatpush1.bf16.msra.mxu1 %v5970_v2 }
 0x7e4   :  { %3509 = vmatprep.subr.bf16.mxu0 %v5976_v8  ;;  %3550 = vmatprep.subr.bf16.mxu1 %v5978_v10 }
 0x7e7   :  { %3510 = vmatpush1.bf16.msra.mxu0 %v5980_v30  ;;  %3551 = vmatpush1.bf16.msra.mxu1 %v5982_v32 }
 0x7e8   :  { %3511 = vmatprep.subr.bf16.mxu0 %v5988_v33  ;;  %3552 = vmatprep.subr.bf16.mxu1 %v5990_v34 }
 0x7eb   :  { %3512 = vmatpush1.bf16.msra.mxu0 %v5992_v35  ;;  %3553 = vmatpush1.bf16.msra.mxu1 %v5994_v36 }
 0x7ec   :  { %3513 = vmatprep.subr.bf16.mxu0 %v5996_v63  ;;  %3554 = vmatprep.subr.bf16.mxu1 %v6000_v37 }
 0x7ef   :  { %3514 = vmatpush1.bf16.msra.mxu0 %v6004_v40  ;;  %3555 = vmatpush1.bf16.msra.mxu1 %v6006_v41 }
 0x7f0   :  { %3608 = vmatprep.subr.bf16.mxu0 %v5916_v57  ;;  %3649 = vmatprep.subr.bf16.mxu1 %v5918_v51 }
 0x88a   :  { %v6100_v44 = vpop.f32.mrf.mxu0  ;;  %v6102_v45 = vpop.f32.mrf.mxu1 }
 0x88b   :  { %6545 = vst [vmem:[#allocation27_spill] sm:$0xff] %v6100_v44  ;;  %6546 = vst [vmem:[#allocation29_spill] sm:$0xff] %v6102_v45  ;;  %v3051_v45 = vadd.f32 %v3050_v18, %v6110_v1 }
 0x88c   :  { %v6104_v27 = vpop.f32.mrf.mxu0  ;;  %v6106_v39 = vpop.f32.mrf.mxu1 }
 0x88d   :  { %6547 = vst [vmem:[#allocation28_spill] sm:$0xff] %v6104_v27  ;;  %6548 = vst [vmem:[#allocation30_spill] sm:$0xff] %v6106_v39 }
 0x88e   :  { %v6112_v54 = vpop.f32.mrf.mxu0  ;;  %v6114_v0 = vpop.f32.mrf.mxu1 }
 0x88f   :  { %6551 = vst [vmem:[#allocation11_spill] sm:$0xff] %v6112_v54  ;;  %6552 = vst [vmem:[#allocation31_spill] sm:$0xff] %v6114_v0  ;;  %v3053_v54 = vadd.f32 %v3052_v26, %v6118_v5  ;;  %v3126_v26 = vadd.f32 %v3125_v12, %v6133_v22 }
 0x890   :  { %v6120_v43 = vpop.f32.mrf.mxu0  ;;  %v6122_v44 = vpop.f32.mrf.mxu1 }
 0x891   :  { %6554 = vst [vmem:[#allocation32_spill] sm:$0xff] %v6120_v43  ;;  %6555 = vst [vmem:[#allocation33_spill] sm:$0xff] %v6122_v44  ;;  %v3124_v43 = vadd.f32 %v3123_v47, %v6127_v46 }
 0x892   :  { %v3424_v27 = vpop.f32.mrf.mxu0  ;;  %v3465_v39 = vpop.f32.mrf.mxu1 }
 0x893   :  { %v3472_v29 = vadd.f32 %v3424_v27, %v3051_v45  ;;  %v3474_v61 = vadd.f32 %v3465_v39, %v3124_v43  ;;  %v3055_v39 = vadd.f32 %v6057_v13, %v6110_v1 }
 0x894   :  { %v3426_v0 = vpop.f32.mrf.mxu0  ;;  %v3467_v28 = vpop.f32.mrf.mxu1 }
 0x895   :  { %v3476_v48 = vmul.f32 0.5, %v3472_v29  ;;  %v3473_v19 = vadd.f32 %v3426_v0, %v3053_v54  ;;  %v3475_v45 = vadd.f32 %v3467_v28, %v3126_v26  ;;  %v3057_v26 = vadd.f32 %v6061_v15, %v6118_v5 }
 0x896   :  { %v3428_v25 = vpop.f32.mrf.mxu0  ;;  %v3469_v24 = vpop.f32.mrf.mxu1  ;;  %v3130_v15 = vadd.f32 %v6063_v42, %v6133_v22 }
 0x897   :  { %5055 = vtanh.f32 %v3476_v48  ;;  %v3480_v44 = vmul.f32 0.5, %v3473_v19  ;;  %v3485_v29 = vmul.f32 0.5, %v3475_v45 }
 0x898   :  { %v3429_v18 = vpop.f32.mrf.mxu0  ;;  %v3470_v23 = vpop.f32.mrf.mxu1 }
 0x899   :  { %5057 = vtanh.f32 %v3480_v44 }
 0x89a   :  { %5059 = vtanh.f32 %v3474_v61 }
 0x89b   :  { %5061 = vtanh.f32 %v3485_v29 }
 0x8a4   :  { %v5056_v54 = vpop.eup %5055 }
 0x8a5   :  { %v3478_v25 = vmul.f32 0.5, %v5056_v54 }
 0x8a6   :  { %v5058_v24 = vpop.eup %5057 }
 0x8a7   :  { %v3479_v0 = vadd.f32 0.5, %v3478_v25  ;;  %v3482_v47 = vmul.f32 0.5, %v5058_v24  ;;  %v5060_v27 = vpop.eup %5059  ;;  %v3128_v25 = vadd.f32 %v6059_v14, %v6127_v46 }
 0x8a8   :  { %v5062_v21 = vpop.eup %5061 }
 0x8a9   :  { %v3483_v48 = vadd.f32 0.5, %v3482_v47  ;;  %v3490_v19 = vmul.f32 %v5060_v27, %v3479_v0  ;;  %v3487_v43 = vmul.f32 0.5, %v5062_v21 }
 0x8ab   :  { %v3489_v23 = vmul.f32 0.0, %v3483_v48  ;;  %v3488_v12 = vadd.f32 0.5, %v3487_v43 }
 0x8ad   :  { %v6136_v49 = vadd.f32 %v3490_v19, %v3489_v23 }
 0x8af   :  { %5063 = vtanh.f32 %v6136_v49 }
 0x8bc   :  { %v5064_v56 = vpop.eup %5063 }
 0x8bd   :  { %v3493_v28 = vmul.f32 %v5064_v56, %v3488_v12 }
 0x8bf   :  { %v3498_v44 = vpack.c.bf16 %v3493_v28, %v3493_v28 }
 0x8c1   :  { %3532 = vmatmul.mubr.bf16.vlgmr.msra.gmra.mxu0 %v3498_v44  ;;  %3573 = vmatmul.mubr.bf16.vlgmr.msra.gmra.mxu1 %v3498_v44 }
 0x8c2   :  { %3609 = vmatpush1.bf16.msra.mxu0 %v5920_v9  ;;  %3650 = vmatpush1.bf16.msra.mxu1 %v5922_v11 }
 0x8c3   :  { %3610 = vmatprep.subr.bf16.mxu0 %v5928_v6  ;;  %3651 = vmatprep.subr.bf16.mxu1 %v5930_v3 }
 0x8c4   :  { %3640 = vmatprep.mubr.bf16.mxu0 %v6511_v55  ;;  %3681 = vmatprep.mubr.bf16.mxu1 %v6511_v55 }
 0x8c6   :  { %3611 = vmatpush1.bf16.msra.mxu0 %v5932_v50  ;;  %3652 = vmatpush1.bf16.msra.mxu1 %v5934_v53 }
 0x8c7   :  { %3612 = vmatprep.subr.bf16.mxu0 %v5940_v60  ;;  %3653 = vmatprep.subr.bf16.mxu1 %v5942_v7 }
 0x8ca   :  { %3613 = vmatpush1.bf16.msra.mxu0 %v5944_v62  ;;  %3654 = vmatpush1.bf16.msra.mxu1 %v5946_v17 }
 0x8cb   :  { %3614 = vmatprep.subr.bf16.mxu0 %v5952_v58  ;;  %3655 = vmatprep.subr.bf16.mxu1 %v5954_v4 }
 0x8ce   :  { %3615 = vmatpush1.bf16.msra.mxu0 %v5956_v31  ;;  %3656 = vmatpush1.bf16.msra.mxu1 %v5958_v38 }
 0x8cf   :  { %3616 = vmatprep.subr.bf16.mxu0 %v5964_v59  ;;  %3657 = vmatprep.subr.bf16.mxu1 %v5966_v16 }
 0x8d2   :  { %3617 = vmatpush1.bf16.msra.mxu0 %v5968_v52  ;;  %3658 = vmatpush1.bf16.msra.mxu1 %v5970_v2 }
 0x8d3   :  { %3618 = vmatprep.subr.bf16.mxu0 %v5976_v8  ;;  %3659 = vmatprep.subr.bf16.mxu1 %v5978_v10 }
 0x8d6   :  { %3619 = vmatpush1.bf16.msra.mxu0 %v5980_v30  ;;  %3660 = vmatpush1.bf16.msra.mxu1 %v5982_v32 }
 0x8d7   :  { %3620 = vmatprep.subr.bf16.mxu0 %v5988_v33  ;;  %3661 = vmatprep.subr.bf16.mxu1 %v5990_v34 }
 0x8da   :  { %3621 = vmatpush1.bf16.msra.mxu0 %v5992_v35  ;;  %3662 = vmatpush1.bf16.msra.mxu1 %v5994_v36 }
 0x8db   :  { %3622 = vmatprep.subr.bf16.mxu0 %v5996_v63  ;;  %3663 = vmatprep.subr.bf16.mxu1 %v6000_v37 }
 0x8de   :  { %3623 = vmatpush1.bf16.msra.mxu0 %v6004_v40  ;;  %3664 = vmatpush1.bf16.msra.mxu1 %v6006_v41 }
 0x8df   :  { %3717 = vmatprep.subr.bf16.mxu0 %v5916_v57  ;;  %3758 = vmatprep.subr.bf16.mxu1 %v5918_v51 }
 0x981   :  { %v3533_v18 = vpop.f32.mrf.mxu0  ;;  %v3574_v61 = vpop.f32.mrf.mxu1 }
 0x982   :  { %v3581_v45 = vadd.f32 %v3533_v18, %v3055_v39  ;;  %v3583_v27 = vadd.f32 %v3574_v61, %v3128_v25 }
 0x983   :  { %v3535_v29 = vpop.f32.mrf.mxu0  ;;  %v3576_v54 = vpop.f32.mrf.mxu1 }
 0x984   :  { %v3585_v24 = vmul.f32 0.5, %v3581_v45  ;;  %v3582_v0 = vadd.f32 %v3535_v29, %v3057_v26  ;;  %v3584_v21 = vadd.f32 %v3576_v54, %v3130_v15 }
 0x985   :  { %v3537_v47 = vpop.f32.mrf.mxu0  ;;  %v3578_v48 = vpop.f32.mrf.mxu1 }
 0x986   :  { %5065 = vtanh.f32 %v3585_v24  ;;  %v3589_v23 = vmul.f32 0.5, %v3582_v0  ;;  %v3594_v43 = vmul.f32 0.5, %v3584_v21  ;;  %v6559_v21 = vld [vmem:[#allocation13_spill] sm:$0xff] }
 0x987   :  { %v3538_v19 = vpop.f32.mrf.mxu0  ;;  %v3579_v13 = vpop.f32.mrf.mxu1 }
 0x988   :  { %5067 = vtanh.f32 %v3589_v23 }
 0x989   :  { %5069 = vtanh.f32 %v3583_v27  ;;  %v6558_v27 = vld [vmem:[#allocation12_spill] sm:$0xff] }
 0x98a   :  { %5071 = vtanh.f32 %v3594_v43  ;;  %v3063_v23 = vadd.f32 %v6558_v27, %v6118_v5  ;;  %v3134_v43 = vadd.f32 %v6559_v21, %v6127_v46 }
 0x993   :  { %v5066_v12 = vpop.eup %5065 }
 0x994   :  { %v3587_v56 = vmul.f32 0.5, %v5066_v12 }
 0x995   :  { %v5068_v28 = vpop.eup %5067 }
 0x996   :  { %v3588_v14 = vadd.f32 0.5, %v3587_v56  ;;  %v3591_v44 = vmul.f32 0.5, %v5068_v28  ;;  %v5070_v39 = vpop.eup %5069 }
 0x997   :  { %v5072_v29 = vpop.eup %5071 }
 0x998   :  { %v3592_v18 = vadd.f32 0.5, %v3591_v44  ;;  %v3599_v26 = vmul.f32 %v5070_v39, %v3588_v14  ;;  %v3596_v25 = vmul.f32 0.5, %v5072_v29 }
 0x99a   :  { %v3598_v61 = vmul.f32 %v3592_v18, %v6136_v49  ;;  %v3597_v42 = vadd.f32 0.5, %v3596_v25  ;;  %v3061_v49 = vadd.f32 %v6065_v20, %v6110_v1 }
 0x99c   :  { %v6182_v45 = vadd.f32 %v3599_v26, %v3598_v61  ;;  %v6560_v26 = vld [vmem:[#allocation14_spill] sm:$0xff] }
 0x99d   :  { %v3136_v61 = vadd.f32 %v6560_v26, %v6133_v22 }
 0x99e   :  { %5073 = vtanh.f32 %v6182_v45 }
 0x9ab   :  { %v5074_v54 = vpop.eup %5073 }
 0x9ac   :  { %v3602_v24 = vmul.f32 %v5074_v54, %v3597_v42 }
 0x9ae   :  { %v3607_v0 = vpack.c.bf16 %v3602_v24, %v3602_v24 }
 0x9b0   :  { %3641 = vmatmul.mubr.bf16.vlgmr.msra.gmra.mxu0 %v3607_v0  ;;  %3682 = vmatmul.mubr.bf16.vlgmr.msra.gmra.mxu1 %v3607_v0 }
 0x9b1   :  { %3718 = vmatpush1.bf16.msra.mxu0 %v5920_v9  ;;  %3759 = vmatpush1.bf16.msra.mxu1 %v5922_v11 }
 0x9b2   :  { %3719 = vmatprep.subr.bf16.mxu0 %v5928_v6  ;;  %3760 = vmatprep.subr.bf16.mxu1 %v5930_v3 }
 0x9b3   :  { %3749 = vmatprep.mubr.bf16.mxu0 %v6511_v55  ;;  %3790 = vmatprep.mubr.bf16.mxu1 %v6511_v55 }
 0x9b5   :  { %3720 = vmatpush1.bf16.msra.mxu0 %v5932_v50  ;;  %3761 = vmatpush1.bf16.msra.mxu1 %v5934_v53 }
 0x9b6   :  { %3721 = vmatprep.subr.bf16.mxu0 %v5940_v60  ;;  %3762 = vmatprep.subr.bf16.mxu1 %v5942_v7 }
 0x9b9   :  { %3722 = vmatpush1.bf16.msra.mxu0 %v5944_v62  ;;  %3763 = vmatpush1.bf16.msra.mxu1 %v5946_v17 }
 0x9ba   :  { %3723 = vmatprep.subr.bf16.mxu0 %v5952_v58  ;;  %3764 = vmatprep.subr.bf16.mxu1 %v5954_v4 }
 0x9bd   :  { %3724 = vmatpush1.bf16.msra.mxu0 %v5956_v31  ;;  %3765 = vmatpush1.bf16.msra.mxu1 %v5958_v38 }
 0x9be   :  { %3725 = vmatprep.subr.bf16.mxu0 %v5964_v59  ;;  %3766 = vmatprep.subr.bf16.mxu1 %v5966_v16 }
 0x9c1   :  { %3726 = vmatpush1.bf16.msra.mxu0 %v5968_v52  ;;  %3767 = vmatpush1.bf16.msra.mxu1 %v5970_v2 }
 0x9c2   :  { %3727 = vmatprep.subr.bf16.mxu0 %v5976_v8  ;;  %3768 = vmatprep.subr.bf16.mxu1 %v5978_v10 }
 0x9c5   :  { %3728 = vmatpush1.bf16.msra.mxu0 %v5980_v30  ;;  %3769 = vmatpush1.bf16.msra.mxu1 %v5982_v32 }
 0x9c6   :  { %3729 = vmatprep.subr.bf16.mxu0 %v5988_v33  ;;  %3770 = vmatprep.subr.bf16.mxu1 %v5990_v34 }
 0x9c9   :  { %3730 = vmatpush1.bf16.msra.mxu0 %v5992_v35  ;;  %3771 = vmatpush1.bf16.msra.mxu1 %v5994_v36 }
 0x9ca   :  { %3731 = vmatprep.subr.bf16.mxu0 %v5996_v63  ;;  %3772 = vmatprep.subr.bf16.mxu1 %v6000_v37 }
 0x9cd   :  { %3732 = vmatpush1.bf16.msra.mxu0 %v6004_v40  ;;  %3773 = vmatpush1.bf16.msra.mxu1 %v6006_v41 }
 0x9ce   :  { %3826 = vmatprep.subr.bf16.mxu0 %v5916_v57  ;;  %3867 = vmatprep.subr.bf16.mxu1 %v5918_v51 }
 0xa70   :  { %v3642_v47 = vpop.f32.mrf.mxu0  ;;  %v3683_v48 = vpop.f32.mrf.mxu1 }
 0xa71   :  { %v3690_v19 = vadd.f32 %v3642_v47, %v3061_v49  ;;  %v3692_v44 = vadd.f32 %v3683_v48, %v3134_v43 }
 0xa72   :  { %v3644_v13 = vpop.f32.mrf.mxu0  ;;  %v3685_v15 = vpop.f32.mrf.mxu1 }
 0xa73   :  { %v3694_v12 = vmul.f32 0.5, %v3690_v19  ;;  %v3691_v56 = vadd.f32 %v3644_v13, %v3063_v23  ;;  %v3693_v29 = vadd.f32 %v3685_v15, %v3136_v61 }
 0xa74   :  { %v3646_v28 = vpop.f32.mrf.mxu0  ;;  %v3687_v14 = vpop.f32.mrf.mxu1 }
 0xa75   :  { %5075 = vtanh.f32 %v3694_v12  ;;  %v3698_v39 = vmul.f32 0.5, %v3691_v56  ;;  %v3703_v25 = vmul.f32 0.5, %v3693_v29  ;;  %v6563_v29 = vld [vmem:[#allocation17_spill] sm:$0xff] }
 0xa76   :  { %v3647_v18 = vpop.f32.mrf.mxu0  ;;  %v3688_v20 = vpop.f32.mrf.mxu1 }
 0xa77   :  { %5077 = vtanh.f32 %v3698_v39  ;;  %v6562_v39 = vld [vmem:[#allocation16_spill] sm:$0xff] }
 0xa78   :  { %5079 = vtanh.f32 %v3692_v44  ;;  %v3067_v18 = vadd.f32 %v6562_v39, %v6118_v5 }
 0xa79   :  { %5081 = vtanh.f32 %v3703_v25  ;;  %v3138_v25 = vadd.f32 %v6563_v29, %v6127_v46 }
 0xa82   :  { %v5076_v42 = vpop.eup %5075 }
 0xa83   :  { %v3696_v54 = vmul.f32 0.5, %v5076_v42 }
 0xa84   :  { %v5078_v24 = vpop.eup %5077 }
 0xa85   :  { %v3697_v0 = vadd.f32 0.5, %v3696_v54  ;;  %v3700_v49 = vmul.f32 0.5, %v5078_v24  ;;  %v5080_v47 = vpop.eup %5079 }
 0xa86   :  { %v5082_v13 = vpop.eup %5081 }
 0xa87   :  { %v3701_v27 = vadd.f32 0.5, %v3700_v49  ;;  %v3708_v23 = vmul.f32 %v5080_v47, %v3697_v0  ;;  %v3705_v21 = vmul.f32 0.5, %v5082_v13 }
 0xa89   :  { %v3707_v48 = vmul.f32 %v3701_v27, %v6182_v45  ;;  %v3706_v43 = vadd.f32 0.5, %v3705_v21  ;;  %v6561_v45 = vld [vmem:[#allocation15_spill] sm:$0xff] }
 0xa8a   :  { %v3065_v28 = vadd.f32 %v6561_v45, %v6110_v1 }
 0xa8b   :  { %v6228_v19 = vadd.f32 %v3708_v23, %v3707_v48  ;;  %v6564_v48 = vld [vmem:[#allocation18_spill] sm:$0xff] }
 0xa8c   :  { %v3140_v13 = vadd.f32 %v6564_v48, %v6133_v22 }
 0xa8d   :  { %5083 = vtanh.f32 %v6228_v19 }
 0xa9a   :  { %v5084_v15 = vpop.eup %5083 }
 0xa9b   :  { %v3711_v12 = vmul.f32 %v5084_v15, %v3706_v43 }
 0xa9d   :  { %v3716_v56 = vpack.c.bf16 %v3711_v12, %v3711_v12 }
 0xa9f   :  { %3750 = vmatmul.mubr.bf16.vlgmr.msra.gmra.mxu0 %v3716_v56  ;;  %3791 = vmatmul.mubr.bf16.vlgmr.msra.gmra.mxu1 %v3716_v56 }
 0xaa0   :  { %3827 = vmatpush1.bf16.msra.mxu0 %v5920_v9  ;;  %3868 = vmatpush1.bf16.msra.mxu1 %v5922_v11 }
 0xaa1   :  { %3828 = vmatprep.subr.bf16.mxu0 %v5928_v6  ;;  %3869 = vmatprep.subr.bf16.mxu1 %v5930_v3 }
 0xaa2   :  { %3858 = vmatprep.mubr.bf16.mxu0 %v6511_v55  ;;  %3899 = vmatprep.mubr.bf16.mxu1 %v6511_v55 }
 0xaa4   :  { %3829 = vmatpush1.bf16.msra.mxu0 %v5932_v50  ;;  %3870 = vmatpush1.bf16.msra.mxu1 %v5934_v53 }
 0xaa5   :  { %3830 = vmatprep.subr.bf16.mxu0 %v5940_v60  ;;  %3871 = vmatprep.subr.bf16.mxu1 %v5942_v7 }
 0xaa8   :  { %3831 = vmatpush1.bf16.msra.mxu0 %v5944_v62  ;;  %3872 = vmatpush1.bf16.msra.mxu1 %v5946_v17 }
 0xaa9   :  { %3832 = vmatprep.subr.bf16.mxu0 %v5952_v58  ;;  %3873 = vmatprep.subr.bf16.mxu1 %v5954_v4 }
 0xaac   :  { %3833 = vmatpush1.bf16.msra.mxu0 %v5956_v31  ;;  %3874 = vmatpush1.bf16.msra.mxu1 %v5958_v38 }
 0xaad   :  { %3834 = vmatprep.subr.bf16.mxu0 %v5964_v59  ;;  %3875 = vmatprep.subr.bf16.mxu1 %v5966_v16 }
 0xab0   :  { %3835 = vmatpush1.bf16.msra.mxu0 %v5968_v52  ;;  %3876 = vmatpush1.bf16.msra.mxu1 %v5970_v2 }
 0xab1   :  { %3836 = vmatprep.subr.bf16.mxu0 %v5976_v8  ;;  %3877 = vmatprep.subr.bf16.mxu1 %v5978_v10 }
 0xab4   :  { %3837 = vmatpush1.bf16.msra.mxu0 %v5980_v30  ;;  %3878 = vmatpush1.bf16.msra.mxu1 %v5982_v32 }
 0xab5   :  { %3838 = vmatprep.subr.bf16.mxu0 %v5988_v33  ;;  %3879 = vmatprep.subr.bf16.mxu1 %v5990_v34 }
 0xab8   :  { %3839 = vmatpush1.bf16.msra.mxu0 %v5992_v35  ;;  %3880 = vmatpush1.bf16.msra.mxu1 %v5994_v36 }
 0xab9   :  { %3840 = vmatprep.subr.bf16.mxu0 %v5996_v63  ;;  %3881 = vmatprep.subr.bf16.mxu1 %v6000_v37 }
 0xabc   :  { %3841 = vmatpush1.bf16.msra.mxu0 %v6004_v40  ;;  %3882 = vmatpush1.bf16.msra.mxu1 %v6006_v41 }
 0xabd   :  { %3935 = vmatprep.subr.bf16.mxu0 %v5916_v57  ;;  %3976 = vmatprep.subr.bf16.mxu1 %v5918_v51 }
 0xb5f   :  { %v3751_v14 = vpop.f32.mrf.mxu0  ;;  %v3792_v44 = vpop.f32.mrf.mxu1 }
 0xb60   :  { %v3799_v20 = vadd.f32 %v3751_v14, %v3065_v28  ;;  %v3801_v49 = vadd.f32 %v3792_v44, %v3138_v25 }
 0xb61   :  { %v3753_v26 = vpop.f32.mrf.mxu0  ;;  %v3794_v61 = vpop.f32.mrf.mxu1 }
 0xb62   :  { %v3803_v42 = vmul.f32 0.5, %v3799_v20  ;;  %v3800_v54 = vadd.f32 %v3753_v26, %v3067_v18  ;;  %v3802_v21 = vadd.f32 %v3794_v61, %v3140_v13 }
 0xb63   :  { %v3755_v24 = vpop.f32.mrf.mxu0  ;;  %v3796_v0 = vpop.f32.mrf.mxu1 }
 0xb64   :  { %5085 = vtanh.f32 %v3803_v42  ;;  %v3807_v47 = vmul.f32 0.5, %v3800_v54  ;;  %v3812_v43 = vmul.f32 0.5, %v3802_v21 }
 0xb65   :  { %v3756_v27 = vpop.f32.mrf.mxu0  ;;  %v3797_v23 = vpop.f32.mrf.mxu1 }
 0xb66   :  { %5087 = vtanh.f32 %v3807_v47 }
 0xb67   :  { %5089 = vtanh.f32 %v3801_v49 }
 0xb68   :  { %5091 = vtanh.f32 %v3812_v43 }
 0xb71   :  { %v5086_v15 = vpop.eup %5085 }
 0xb72   :  { %v3805_v12 = vmul.f32 0.5, %v5086_v15 }
 0xb73   :  { %v5088_v56 = vpop.eup %5087 }
 0xb74   :  { %v3806_v45 = vadd.f32 0.5, %v3805_v12  ;;  %v3809_v28 = vmul.f32 0.5, %v5088_v56  ;;  %v5090_v14 = vpop.eup %5089 }
 0xb75   :  { %v5092_v26 = vpop.eup %5091 }
 0xb76   :  { %v3810_v39 = vadd.f32 0.5, %v3809_v28  ;;  %v3817_v18 = vmul.f32 %v5090_v14, %v3806_v45  ;;  %v3814_v29 = vmul.f32 0.5, %v5092_v26  ;;  %v6326_v26 = vld [vmem:[#allocation8 + $0xe8] ss:$16 sps:$4 sm:$0xff]  }
 0xb78   :  { %v3816_v44 = vmul.f32 %v3810_v39, %v6228_v19  ;;  %v3815_v25 = vadd.f32 0.5, %v3814_v29  ;;  %v6332_v29 = vld [vmem:[#allocation8 + $0xcc] ss:$16 sps:$4 sm:$0xff]  }
 0xb7a   :  { %v6274_v20 = vadd.f32 %v3817_v18, %v3816_v44  ;;  %v6323_v44 = vld [vmem:[#allocation8 + $0xe0] ss:$16 sps:$4 sm:$0xff]  }
 0xb7c   :  { %5093 = vtanh.f32 %v6274_v20 }
 0xb89   :  { %v5094_v61 = vpop.eup %5093 }
 0xb8a   :  { %v3820_v42 = vmul.f32 %v5094_v61, %v3815_v25  ;;  %v6337_v25 = vld [vmem:[#allocation8 + $0xc0] ss:$16 sps:$4 sm:$0xff]   ;;  %v6340_v61 = vld [vmem:[#allocation8 + $0xc8] ss:$16 sps:$4 sm:$0xff]  }
 0xb8c   :  { %v3825_v54 = vpack.c.bf16 %v3820_v42, %v3820_v42  ;;  %v6343_v42 = vld [vmem:[#allocation8 + $0xa4] ss:$16 sps:$4 sm:$0xff]  }
 0xb8e   :  { %3859 = vmatmul.mubr.bf16.vlgmr.msra.gmra.mxu0 %v3825_v54  ;;  %3900 = vmatmul.mubr.bf16.vlgmr.msra.gmra.mxu1 %v3825_v54  ;;  %v6346_v54 = vld [vmem:[#allocation8 + $0xac] ss:$16 sps:$4 sm:$0xff]  }
 0xb8f   :  { %3936 = vmatpush1.bf16.msra.mxu0 %v5920_v9  ;;  %3977 = vmatpush1.bf16.msra.mxu1 %v5922_v11  ;;  %v6565_v9 = vld [vmem:[#allocation19_spill] sm:$0xff] }
 0xb90   :  { %3937 = vmatprep.subr.bf16.mxu0 %v5928_v6  ;;  %3978 = vmatprep.subr.bf16.mxu1 %v5930_v3  ;;  %v3071_v11 = vadd.f32 %v6565_v9, %v6110_v1  ;;  %v6349_v9 = vld [vmem:[#allocation8 + $0xa0] ss:$16 sps:$4 sm:$0xff]  }
 0xb91   :  { %3967 = vmatprep.mubr.bf16.mxu0 %v6511_v55  ;;  %4008 = vmatprep.mubr.bf16.mxu1 %v6511_v55 }
 0xb93   :  { %3938 = vmatpush1.bf16.msra.mxu0 %v5932_v50  ;;  %3979 = vmatpush1.bf16.msra.mxu1 %v5934_v53  ;;  %v6566_v50 = vld [vmem:[#allocation20_spill] sm:$0xff] }
 0xb94   :  { %3939 = vmatprep.subr.bf16.mxu0 %v5940_v60  ;;  %3980 = vmatprep.subr.bf16.mxu1 %v5942_v7  ;;  %v3073_v53 = vadd.f32 %v6566_v50, %v6118_v5  ;;  %v6361_v50 = vld [vmem:[#allocation8 + $0x80] ss:$16 sps:$4 sm:$0xff]  }
 0xb97   :  { %3940 = vmatpush1.bf16.msra.mxu0 %v5944_v62  ;;  %3981 = vmatpush1.bf16.msra.mxu1 %v5946_v17  ;;  %v6567_v17 = vld [vmem:[#allocation21_spill] sm:$0xff] }
 0xb98   :  { %3941 = vmatprep.subr.bf16.mxu0 %v5952_v58  ;;  %3982 = vmatprep.subr.bf16.mxu1 %v5954_v4  ;;  %v3144_v58 = vadd.f32 %v6567_v17, %v6127_v46  ;;  %v6376_v17 = vld [vmem:[#allocation8 + $0x68] ss:$16 sps:$4 sm:$0xff]  }
 0xb9b   :  { %3942 = vmatpush1.bf16.msra.mxu0 %v5956_v31  ;;  %3983 = vmatpush1.bf16.msra.mxu1 %v5958_v38 }
 0xb9c   :  { %3943 = vmatprep.subr.bf16.mxu0 %v5964_v59  ;;  %3984 = vmatprep.subr.bf16.mxu1 %v5966_v16 }
 0xb9f   :  { %3944 = vmatpush1.bf16.msra.mxu0 %v5968_v52  ;;  %3985 = vmatpush1.bf16.msra.mxu1 %v5970_v2  ;;  %v6568_v2 = vld [vmem:[#allocation22_spill] sm:$0xff] }
 0xba0   :  { %3945 = vmatprep.subr.bf16.mxu0 %v5976_v8  ;;  %3986 = vmatprep.subr.bf16.mxu1 %v5978_v10  ;;  %v3146_v19 = vadd.f32 %v6568_v2, %v6133_v22  ;;  %v6572_v2 = vld [vmem:[#allocation26_spill] sm:$0xff] }
 0xba3   :  { %3946 = vmatpush1.bf16.msra.mxu0 %v5980_v30  ;;  %3987 = vmatpush1.bf16.msra.mxu1 %v5982_v32 }
 0xba4   :  { %3947 = vmatprep.subr.bf16.mxu0 %v5988_v33  ;;  %3988 = vmatprep.subr.bf16.mxu1 %v5990_v34 }
 0xba7   :  { %3948 = vmatpush1.bf16.msra.mxu0 %v5992_v35  ;;  %3989 = vmatpush1.bf16.msra.mxu1 %v5994_v36 }
 0xba8   :  { %3949 = vmatprep.subr.bf16.mxu0 %v5996_v63  ;;  %3990 = vmatprep.subr.bf16.mxu1 %v6000_v37 }
 0xbab   :  { %3950 = vmatpush1.bf16.msra.mxu0 %v6004_v40  ;;  %3991 = vmatpush1.bf16.msra.mxu1 %v6006_v41 }
 0xbac   :  { %4044 = vmatprep.subr.bf16.mxu0 %v5916_v57  ;;  %4085 = vmatprep.subr.bf16.mxu1 %v5918_v51 }
 0xc4e   :  { %v3860_v6 = vpop.f32.mrf.mxu0  ;;  %v3901_v3 = vpop.f32.mrf.mxu1 }
 0xc4f   :  { %v3908_v60 = vadd.f32 %v3860_v6, %v3071_v11  ;;  %v3910_v51 = vadd.f32 %v3901_v3, %v3144_v58  ;;  %v6352_v11 = vld [vmem:[#allocation8 + $0xa8] ss:$16 sps:$4 sm:$0xff]   ;;  %v6355_v6 = vld [vmem:[#allocation8 + $0x84] ss:$16 sps:$4 sm:$0xff]   ;;  %v6358_v3 = vld [vmem:[#allocation8 + $0x8c] ss:$16 sps:$4 sm:$0xff]  }
 0xc50   :  { %v3862_v7 = vpop.f32.mrf.mxu0  ;;  %v3903_v62 = vpop.f32.mrf.mxu1 }
 0xc51   :  { %v3912_v4 = vmul.f32 0.5, %v3908_v60  ;;  %v3909_v31 = vadd.f32 %v3862_v7, %v3073_v53  ;;  %v3911_v24 = vadd.f32 %v3903_v62, %v3146_v19  ;;  %v6364_v53 = vld [vmem:[#allocation8 + $0x88] ss:$16 sps:$4 sm:$0xff]   ;;  %v6367_v60 = vld [vmem:[#allocation8 + $0x64] ss:$16 sps:$4 sm:$0xff]   ;;  %v3150_v19 = vadd.f32 %v6572_v2, %v6133_v22 }
 0xc52   :  { %v3864_v38 = vpop.f32.mrf.mxu0  ;;  %v3905_v57 = vpop.f32.mrf.mxu1  ;;  %v6370_v7 = vld [vmem:[#allocation8 + $0x6c] ss:$16 sps:$4 sm:$0xff]   ;;  %v6373_v62 = vld [vmem:[#allocation8 + $0x60] ss:$16 sps:$4 sm:$0xff]  }
 0xc53   :  { %5095 = vtanh.f32 %v3912_v4  ;;  %v3916_v59 = vmul.f32 0.5, %v3909_v31  ;;  %v3921_v0 = vmul.f32 0.5, %v3911_v24 }
 0xc54   :  { %v3865_v16 = vpop.f32.mrf.mxu0  ;;  %v3906_v52 = vpop.f32.mrf.mxu1 }
 0xc55   :  { %5097 = vtanh.f32 %v3916_v59 }
 0xc56   :  { %5099 = vtanh.f32 %v3910_v51 }
 0xc57   :  { %5101 = vtanh.f32 %v3921_v0 }
 0xc60   :  { %v5096_v49 = vpop.eup %5095 }
 0xc61   :  { %v3914_v47 = vmul.f32 0.5, %v5096_v49 }
 0xc62   :  { %v5098_v27 = vpop.eup %5097 }
 0xc63   :  { %v3915_v23 = vadd.f32 0.5, %v3914_v47  ;;  %v3918_v48 = vmul.f32 0.5, %v5098_v27  ;;  %v5100_v13 = vpop.eup %5099 }
 0xc64   :  { %v5102_v56 = vpop.eup %5101 }
 0xc65   :  { %v3919_v21 = vadd.f32 0.5, %v3918_v48  ;;  %v3926_v43 = vmul.f32 %v5100_v13, %v3915_v23  ;;  %v3923_v45 = vmul.f32 0.5, %v5102_v56 }
 0xc67   :  { %v3925_v15 = vmul.f32 %v3919_v21, %v6274_v20  ;;  %v3924_v28 = vadd.f32 0.5, %v3923_v45  ;;  %v6329_v20 = vld [vmem:[#allocation8 + $0xc4] ss:$16 sps:$4 sm:$0xff]  }
 0xc69   :  { %v6320_v12 = vadd.f32 %v3926_v43, %v3925_v15 }
 0xc6b   :  { %5103 = vtanh.f32 %v6320_v12 }
 0xc78   :  { %v5104_v14 = vpop.eup %5103 }
 0xc79   :  { %v3929_v39 = vmul.f32 %v5104_v14, %v3924_v28 }
 0xc7b   :  { %v3934_v18 = vpack.c.bf16 %v3929_v39, %v3929_v39 }
 0xc7d   :  { %3968 = vmatmul.mubr.bf16.vlgmr.msra.gmra.mxu0 %v3934_v18  ;;  %4009 = vmatmul.mubr.bf16.vlgmr.msra.gmra.mxu1 %v3934_v18 }
 0xc7e   :  { %4045 = vmatpush1.bf16.msra.mxu0 %v6323_v44  ;;  %4086 = vmatpush1.bf16.msra.mxu1 %v6326_v26 }
 0xc7f   :  { %4046 = vmatprep.subr.bf16.mxu0 %v6329_v20  ;;  %4087 = vmatprep.subr.bf16.mxu1 %v6332_v29 }
 0xc80   :  { %4076 = vmatprep.mubr.bf16.mxu0 %v6511_v55  ;;  %4117 = vmatprep.mubr.bf16.mxu1 %v6511_v55 }
 0xc82   :  { %4047 = vmatpush1.bf16.msra.mxu0 %v6337_v25  ;;  %4088 = vmatpush1.bf16.msra.mxu1 %v6340_v61 }
 0xc83   :  { %4048 = vmatprep.subr.bf16.mxu0 %v6343_v42  ;;  %4089 = vmatprep.subr.bf16.mxu1 %v6346_v54 }
 0xc86   :  { %4049 = vmatpush1.bf16.msra.mxu0 %v6349_v9  ;;  %4090 = vmatpush1.bf16.msra.mxu1 %v6352_v11 }
 0xc87   :  { %4050 = vmatprep.subr.bf16.mxu0 %v6355_v6  ;;  %4091 = vmatprep.subr.bf16.mxu1 %v6358_v3 }
 0xc8a   :  { %4051 = vmatpush1.bf16.msra.mxu0 %v6361_v50  ;;  %4092 = vmatpush1.bf16.msra.mxu1 %v6364_v53 }
 0xc8b   :  { %4052 = vmatprep.subr.bf16.mxu0 %v6367_v60  ;;  %4093 = vmatprep.subr.bf16.mxu1 %v6370_v7 }
 0xc8e   :  { %4053 = vmatpush1.bf16.msra.mxu0 %v6373_v62  ;;  %4094 = vmatpush1.bf16.msra.mxu1 %v6376_v17 }
 0xc8f   :  { %4054 = vmatprep.subr.bf16.mxu0 %v5976_v8  ;;  %4095 = vmatprep.subr.bf16.mxu1 %v5978_v10  ;;  %v5153_v8 = vld [vmem:[#allocation8 + $0xe4] ss:$16 sps:$4 sm:$0xff]   ;;  %v5154_v10 = vld [vmem:[#allocation8 + $0xec] ss:$16 sps:$4 sm:$0xff]  }
 0xc92   :  { %4055 = vmatpush1.bf16.msra.mxu0 %v5980_v30  ;;  %4096 = vmatpush1.bf16.msra.mxu1 %v5982_v32  ;;  %v6569_v30 = vld [vmem:[#allocation23_spill] sm:$0xff] }
 0xc93   :  { %4056 = vmatprep.subr.bf16.mxu0 %v5988_v33  ;;  %4097 = vmatprep.subr.bf16.mxu1 %v5990_v34  ;;  %v3075_v32 = vadd.f32 %v6569_v30, %v6110_v1  ;;  %v6575_v30 = vld [vmem:[#allocation29_spill] sm:$0xff] }
 0xc96   :  { %4057 = vmatpush1.bf16.msra.mxu0 %v5992_v35  ;;  %4098 = vmatpush1.bf16.msra.mxu1 %v5994_v36  ;;  %v6570_v35 = vld [vmem:[#allocation24_spill] sm:$0xff] }
 0xc97   :  { %4058 = vmatprep.subr.bf16.mxu0 %v5996_v63  ;;  %4099 = vmatprep.subr.bf16.mxu1 %v6000_v37  ;;  %v3077_v36 = vadd.f32 %v6570_v35, %v6118_v5  ;;  %v6571_v37 = vld [vmem:[#allocation25_spill] sm:$0xff] }
 0xc9a   :  { %4059 = vmatpush1.bf16.msra.mxu0 %v6004_v40  ;;  %4100 = vmatpush1.bf16.msra.mxu1 %v6006_v41  ;;  %v3148_v40 = vadd.f32 %v6571_v37, %v6127_v46 }
 0xc9b   :  { %4153 = vmatprep.subr.bf16.mxu0 %v5153_v8  ;;  %4194 = vmatprep.subr.bf16.mxu1 %v5154_v10 }
 0xd3d   :  { %v3969_v33 = vpop.f32.mrf.mxu0  ;;  %v4010_v34 = vpop.f32.mrf.mxu1 }
 0xd3e   :  { %v4017_v58 = vadd.f32 %v3969_v33, %v3075_v32  ;;  %v4019_v51 = vadd.f32 %v4010_v34, %v3148_v40  ;;  %v3154_v32 = vadd.f32 %v6575_v30, %v6127_v46  ;;  %v6576_v40 = vld [vmem:[#allocation30_spill] sm:$0xff] }
 0xd3f   :  { %v3971_v63 = vpop.f32.mrf.mxu0  ;;  %v4012_v4 = vpop.f32.mrf.mxu1 }
 0xd40   :  { %v4021_v31 = vmul.f32 0.5, %v4017_v58  ;;  %v4018_v41 = vadd.f32 %v3971_v63, %v3077_v36  ;;  %v4020_v24 = vadd.f32 %v4012_v4, %v3150_v19 }
 0xd41   :  { %v3973_v38 = vpop.f32.mrf.mxu0  ;;  %v4014_v57 = vpop.f32.mrf.mxu1 }
 0xd42   :  { %5105 = vtanh.f32 %v4021_v31  ;;  %v4025_v59 = vmul.f32 0.5, %v4018_v41  ;;  %v4030_v0 = vmul.f32 0.5, %v4020_v24  ;;  %v3156_v31 = vadd.f32 %v6576_v40, %v6133_v22 }
 0xd43   :  { %v3974_v16 = vpop.f32.mrf.mxu0  ;;  %v4015_v52 = vpop.f32.mrf.mxu1 }
 0xd44   :  { %5107 = vtanh.f32 %v4025_v59 }
 0xd45   :  { %5109 = vtanh.f32 %v4019_v51 }
 0xd46   :  { %5111 = vtanh.f32 %v4030_v0 }
 0xd4f   :  { %v5106_v49 = vpop.eup %5105 }
 0xd50   :  { %v4023_v47 = vmul.f32 0.5, %v5106_v49 }
 0xd51   :  { %v5108_v27 = vpop.eup %5107 }
 0xd52   :  { %v4024_v23 = vadd.f32 0.5, %v4023_v47  ;;  %v4027_v48 = vmul.f32 0.5, %v5108_v27  ;;  %v5110_v13 = vpop.eup %5109 }
 0xd53   :  { %v5112_v45 = vpop.eup %5111 }
 0xd54   :  { %v4028_v21 = vadd.f32 0.5, %v4027_v48  ;;  %v4035_v43 = vmul.f32 %v5110_v13, %v4024_v23  ;;  %v4032_v28 = vmul.f32 0.5, %v5112_v45  ;;  %v4969_v45 = vld [vmem:[%s6481_s7 + $0x28] sm:$0xff]  }
 0xd56   :  { %v4034_v15 = vmul.f32 %v4028_v21, %v6320_v12  ;;  %v4033_v14 = vadd.f32 0.5, %v4032_v28  ;;  %v5156_v12 = vld [vmem:[#allocation8 + $0x4c] ss:$16 sps:$4 sm:$0xff]   ;;  %v4970_v28 = vld [vmem:[%s6481_s7 + $0x20] sm:$0xff]  }
 0xd58   :  { %v6400_v56 = vadd.f32 %v4035_v43, %v4034_v15  ;;  %v4967_v43 = vld [vmem:[%s6481_s7 + $0x38] sm:$0xff]   ;;  %v5237_v15 = vmov 0.0  }
 0xd5a   :  { %5113 = vtanh.f32 %v6400_v56 }
 0xd67   :  { %v5114_v39 = vpop.eup %5113 }
 0xd68   :  { %v4038_v18 = vmul.f32 %v5114_v39, %v4033_v14  ;;  %v4971_v14 = vld [vmem:[%s6481_s7 + $0x18] sm:$0xff]   ;;  %v4972_v39 = vld [vmem:[%s6481_s7 + $0x10] sm:$0xff]  }
 0xd6a   :  { %v4043_v8 = vpack.c.bf16 %v4038_v18, %v4038_v18  ;;  %v4973_v18 = vld [vmem:[%s6481_s7 + $0x8] sm:$0xff]  }
 0xd6c   :  { %4077 = vmatmul.mubr.bf16.vlgmr.msra.gmra.mxu0 %v4043_v8  ;;  %4118 = vmatmul.mubr.bf16.vlgmr.msra.gmra.mxu1 %v4043_v8  ;;  %v4974_v8 = vld [vmem:[%s6481_s7] sm:$0xff]  }
 0xd6d   :  { %4154 = vmatpush1.bf16.msra.mxu0 %v6323_v44  ;;  %4195 = vmatpush1.bf16.msra.mxu1 %v6326_v26  ;;  %v5157_v44 = vld [vmem:[#allocation8 + $0x40] ss:$16 sps:$4 sm:$0xff]   ;;  %v5158_v26 = vld [vmem:[#allocation8 + $0x48] ss:$16 sps:$4 sm:$0xff]  }
 0xd6e   :  { %4155 = vmatprep.subr.bf16.mxu0 %v6329_v20  ;;  %4196 = vmatprep.subr.bf16.mxu1 %v6332_v29  ;;  %v5159_v20 = vld [vmem:[#allocation8 + $0x24] ss:$16 sps:$4 sm:$0xff]   ;;  %v5160_v29 = vld [vmem:[#allocation8 + $0x2c] ss:$16 sps:$4 sm:$0xff]  }
 0xd6f   :  { %4185 = vmatprep.mubr.bf16.mxu0 %v6511_v55  ;;  %4226 = vmatprep.mubr.bf16.mxu1 %v6511_v55  ;;  %v5155_v55 = vld [vmem:[#allocation8 + $0x44] ss:$16 sps:$4 sm:$0xff]  }
 0xd71   :  { %4156 = vmatpush1.bf16.msra.mxu0 %v6337_v25  ;;  %4197 = vmatpush1.bf16.msra.mxu1 %v6340_v61  ;;  %v5161_v25 = vld [vmem:[#allocation8 + $0x20] ss:$16 sps:$4 sm:$0xff]   ;;  %v5162_v61 = vld [vmem:[#allocation8 + $0x28] ss:$16 sps:$4 sm:$0xff]  }
 0xd72   :  { %4157 = vmatprep.subr.bf16.mxu0 %v6343_v42  ;;  %4198 = vmatprep.subr.bf16.mxu1 %v6346_v54  ;;  %v5163_v42 = vld [vmem:[#allocation8 + $0x4] ss:$16 sps:$4 sm:$0xff]   ;;  %v5164_v54 = vld [vmem:[#allocation8 + $0xc] ss:$16 sps:$4 sm:$0xff]  }
 0xd75   :  { %4158 = vmatpush1.bf16.msra.mxu0 %v6349_v9  ;;  %4199 = vmatpush1.bf16.msra.mxu1 %v6352_v11  ;;  %v5165_v9 = vld [vmem:[#allocation8] ss:$16 sps:$4 sm:$0xff]   ;;  %v5166_v11 = vld [vmem:[#allocation8 + $0x8] ss:$16 sps:$4 sm:$0xff]  }
 0xd76   :  { %4159 = vmatprep.subr.bf16.mxu0 %v6355_v6  ;;  %4200 = vmatprep.subr.bf16.mxu1 %v6358_v3  ;;  %v6573_v6 = vld [vmem:[#allocation27_spill] sm:$0xff] }
 0xd77   :  { %v3081_v3 = vadd.f32 %v6573_v6, %v6110_v1 }
 0xd79   :  { %4160 = vmatpush1.bf16.msra.mxu0 %v6361_v50  ;;  %4201 = vmatpush1.bf16.msra.mxu1 %v6364_v53 }
 0xd7a   :  { %4161 = vmatprep.subr.bf16.mxu0 %v6367_v60  ;;  %4202 = vmatprep.subr.bf16.mxu1 %v6370_v7  ;;  %v6574_v60 = vld [vmem:[#allocation28_spill] sm:$0xff] }
 0xd7b   :  { %v3083_v7 = vadd.f32 %v6574_v60, %v6118_v5 }
 0xd7d   :  { %4162 = vmatpush1.bf16.msra.mxu0 %v6373_v62  ;;  %4203 = vmatpush1.bf16.msra.mxu1 %v6376_v17 }
 0xd7e   :  { %4163 = vmatprep.subr.bf16.mxu0 %v5155_v55  ;;  %4204 = vmatprep.subr.bf16.mxu1 %v5156_v12  ;;  %v6577_v55 = vld [vmem:[#allocation11_spill] sm:$0xff] }
 0xd7f   :  { %v3085_v12 = vadd.f32 %v6577_v55, %v6110_v1 }
 0xd81   :  { %4164 = vmatpush1.bf16.msra.mxu0 %v5157_v44  ;;  %4205 = vmatpush1.bf16.msra.mxu1 %v5158_v26 }
 0xd82   :  { %4165 = vmatprep.subr.bf16.mxu0 %v5159_v20  ;;  %4206 = vmatprep.subr.bf16.mxu1 %v5160_v29  ;;  %v6578_v20 = vld [vmem:[#allocation32_spill] sm:$0xff] }
 0xd83   :  { %v3087_v29 = vadd.f32 %v6578_v20, %v6118_v5 }
 0xd85   :  { %4166 = vmatpush1.bf16.msra.mxu0 %v5161_v25  ;;  %4207 = vmatpush1.bf16.msra.mxu1 %v5162_v61 }
 0xd86   :  { %4167 = vmatprep.subr.bf16.mxu0 %v5163_v42  ;;  %4208 = vmatprep.subr.bf16.mxu1 %v5164_v54  ;;  %v6579_v54 = vld [vmem:[#allocation31_spill] sm:$0xff] }
 0xd89   :  { %4168 = vmatpush1.bf16.msra.mxu0 %v5165_v9  ;;  %4209 = vmatpush1.bf16.msra.mxu1 %v5166_v11  ;;  %v3158_v9 = vadd.f32 %v6579_v54, %v6127_v46 }
 0xd8a   :  { %4737 = vmatprep.subr.bf16.mxu0 %v5237_v15 }
 0xe2c   :  { %v4078_v50 = vpop.f32.mrf.mxu0  ;;  %v4119_v53 = vpop.f32.mrf.mxu1 }
 0xe2d   :  { %v4126_v62 = vadd.f32 %v4078_v50, %v3081_v3  ;;  %v4128_v58 = vadd.f32 %v4119_v53, %v3154_v32 }
 0xe2e   :  { %v4080_v17 = vpop.f32.mrf.mxu0  ;;  %v4121_v10 = vpop.f32.mrf.mxu1 }
 0xe2f   :  { %v4130_v33 = vmul.f32 0.5, %v4126_v62  ;;  %v4127_v34 = vadd.f32 %v4080_v17, %v3083_v7  ;;  %v4129_v41 = vadd.f32 %v4121_v10, %v3156_v31  ;;  %v6580_v62 = vld [vmem:[#allocation33_spill] sm:$0xff] }
 0xe30   :  { %v4082_v35 = vpop.f32.mrf.mxu0  ;;  %v4123_v36 = vpop.f32.mrf.mxu1  ;;  %v3160_v5 = vadd.f32 %v6580_v62, %v6133_v22 }
 0xe31   :  { %5115 = vtanh.f32 %v4130_v33  ;;  %v4134_v63 = vmul.f32 0.5, %v4127_v34  ;;  %v4139_v38 = vmul.f32 0.5, %v4129_v41 }
 0xe32   :  { %v4083_v4 = vpop.f32.mrf.mxu0  ;;  %v4124_v37 = vpop.f32.mrf.mxu1 }
 0xe33   :  { %5117 = vtanh.f32 %v4134_v63 }
 0xe34   :  { %5119 = vtanh.f32 %v4128_v58 }
 0xe35   :  { %5121 = vtanh.f32 %v4139_v38 }
 0xe3e   :  { %v5116_v57 = vpop.eup %5115 }
 0xe3f   :  { %v4132_v51 = vmul.f32 0.5, %v5116_v57  ;;  %v4719_v57 = vld [vmem:[%s6482_s8] ss:$0 sm:$0xff] }
 0xe40   :  { %v5118_v59 = vpop.eup %5117 }
 0xe41   :  { %v4133_v16 = vadd.f32 0.5, %v4132_v51  ;;  %v4136_v52 = vmul.f32 0.5, %v5118_v59  ;;  %v5120_v2 = vpop.eup %5119 }
 0xe42   :  { %v5122_v47 = vpop.eup %5121 }
 0xe43   :  { %v4137_v19 = vadd.f32 0.5, %v4136_v52  ;;  %v4144_v24 = vmul.f32 %v5120_v2, %v4133_v16  ;;  %v4141_v27 = vmul.f32 0.5, %v5122_v47 }
 0xe45   :  { %v4143_v0 = vmul.f32 %v4137_v19, %v6400_v56  ;;  %v4142_v23 = vadd.f32 0.5, %v4141_v27  ;;  %v4968_v56 = vld [vmem:[%s6481_s7 + $0x30] sm:$0xff]  }
 0xe47   :  { %v6432_v49 = vadd.f32 %v4144_v24, %v4143_v0 }
 0xe49   :  { %5123 = vtanh.f32 %v6432_v49 }
 0xe56   :  { %v5124_v48 = vpop.eup %5123 }
 0xe57   :  { %v4147_v13 = vmul.f32 %v5124_v48, %v4142_v23 }
 0xe59   :  { %v4152_v21 = vpack.c.bf16 %v4147_v13, %v4147_v13 }
 0xe5b   :  { %4186 = vmatmul.mubr.bf16.vlgmr.msra.gmra.mxu0 %v4152_v21  ;;  %4227 = vmatmul.mubr.bf16.vlgmr.msra.gmra.mxu1 %v4152_v21 }
 0xe5c   :  { %4738 = vmatpush3.bf16.msra.mxu0 %v4967_v43  ;;  %4753 = vmatprep.mubr.msk.bf16.mxu0 %vm5238_vm1, %v5237_v15 }
 0xe5d   :  { %4739 = vmatprep.subr.bf16.mxu0 %v5237_v15 }
 0xe60   :  { %4740 = vmatpush3.bf16.msra.mxu0 %v4968_v56 }
 0xe61   :  { %4741 = vmatprep.subr.bf16.mxu0 %v5237_v15 }
 0xe64   :  { %4742 = vmatpush3.bf16.msra.mxu0 %v4969_v45 }
 0xe65   :  { %4743 = vmatprep.subr.bf16.mxu0 %v5237_v15 }
 0xe68   :  { %4744 = vmatpush3.bf16.msra.mxu0 %v4970_v28 }
 0xe69   :  { %4745 = vmatprep.subr.bf16.mxu0 %v5237_v15 }
 0xe6c   :  { %4746 = vmatpush3.bf16.msra.mxu0 %v4971_v14 }
 0xe6d   :  { %4747 = vmatprep.subr.bf16.mxu0 %v5237_v15 }
 0xe70   :  { %4748 = vmatpush3.bf16.msra.mxu0 %v4972_v39 }
 0xe71   :  { %4749 = vmatprep.subr.bf16.mxu0 %v5237_v15 }
 0xe74   :  { %4750 = vmatpush3.bf16.msra.mxu0 %v4973_v18 }
 0xe75   :  { %4751 = vmatprep.subr.bf16.mxu0 %v5237_v15 }
 0xe78   :  { %4752 = vmatpush3.bf16.msra.mxu0 %v4974_v8 }
 0xf1b   :  { %v4187_v44 = vpop.f32.mrf.mxu0  ;;  %v4228_v26 = vpop.f32.mrf.mxu1 }
 0xf1c   :  { %v4235_v25 = vadd.f32 %v4187_v44, %v3085_v12  ;;  %v4237_v53 = vadd.f32 %v4228_v26, %v3158_v9 }
 0xf1d   :  { %v4189_v61 = vpop.f32.mrf.mxu0  ;;  %v4230_v42 = vpop.f32.mrf.mxu1 }
 0xf1e   :  { %v4239_v11 = vmul.f32 0.5, %v4235_v25  ;;  %v4236_v6 = vadd.f32 %v4189_v61, %v3087_v29  ;;  %v4238_v17 = vadd.f32 %v4230_v42, %v3160_v5 }
 0xf1f   :  { %v4191_v3 = vpop.f32.mrf.mxu0  ;;  %v4232_v50 = vpop.f32.mrf.mxu1 }
 0xf20   :  { %5125 = vtanh.f32 %v4239_v11  ;;  %v4243_v60 = vmul.f32 0.5, %v4236_v6  ;;  %v4248_v10 = vmul.f32 0.5, %v4238_v17 }
 0xf21   :  { %v4192_v7 = vpop.f32.mrf.mxu0  ;;  %v4233_v1 = vpop.f32.mrf.mxu1 }
 0xf22   :  { %5127 = vtanh.f32 %v4243_v60 }
 0xf23   :  { %5129 = vtanh.f32 %v4237_v53 }
 0xf24   :  { %5131 = vtanh.f32 %v4248_v10 }
 0xf2d   :  { %v5126_v30 = vpop.eup %5125 }
 0xf2e   :  { %v4241_v32 = vmul.f32 0.5, %v5126_v30 }
 0xf2f   :  { %v5128_v33 = vpop.eup %5127 }
 0xf30   :  { %v4242_v46 = vadd.f32 0.5, %v4241_v32  ;;  %v4245_v34 = vmul.f32 0.5, %v5128_v33  ;;  %v5130_v35 = vpop.eup %5129 }
 0xf31   :  { %v5132_v37 = vpop.eup %5131 }
 0xf32   :  { %v4246_v36 = vadd.f32 0.5, %v4245_v34  ;;  %v4253_v58 = vmul.f32 %v5130_v35, %v4242_v46  ;;  %v4250_v40 = vmul.f32 0.5, %v5132_v37 }
 0xf34   :  { %v4252_v63 = vmul.f32 %v4246_v36, %v6432_v49  ;;  %v4251_v31 = vadd.f32 0.5, %v4250_v40 }
 0xf36   :  { %v4254_v4 = vadd.f32 %v4253_v58, %v4252_v63 }
 0xf38   :  { %5133 = vtanh.f32 %v4254_v4 }
 0xf45   :  { %v5134_v41 = vpop.eup %5133 }
 0xf46   :  { %v4256_v22 = vmul.f32 %v5134_v41, %v4251_v31 }
 0xf48   :  { %v4257_v38 = vpack.c.bf16 %v4256_v22, %v4256_v22 }
 0xf4a   :  { %4754 = vmatmul.mubr.bf16.vlgmr.msra.gmra.mxu0 %v4257_v38 }
0x100a   :  { %v4363_v51 = vpop.f32.mrf.mxu0 }
0x100b   :  { %v4364_v59 = vadd.f32 %v4719_v57, %v4363_v51 }
0x100c   :  { %v4755_v16 = vpop.f32.mrf.mxu0 }
0x100d   :  { %4369 = vst [vmem:[%s6483_s9] sm:$0xff] %v4364_v59 }
0x100e   :  { %v4366_v52 = vpop.f32.mrf.mxu0 }
0x1010   :  { %v4756_v2 = vpop.f32.mrf.mxu0 }
0x1011   :  { %4374 = vsyncpa [#allocation5], 1 }
0x1012   :  { %4375 = vsyncpa [#allocation7], 1 }

</bundles_post_ra>
